<compile_context>
chip_gen: v5e
topology: v5e:2x2
jax: 0.10.0
libtpu: 0.0.40
codegen_flags: <defaults>
</compile_context>

<pallas_src>
import jax
import jax.numpy as jnp
from jax.experimental import pallas as pl
from jax.experimental.pallas import tpu as pltpu

BN_EPS = 1e-3  # EfficientNet BN eps; eval-mode default stats fold to 1/sqrt(1+eps)

# small proxy channel config
C_STEM = 8
C_EXP = 32     # expand ratio 4
C_SE = 2       # max(1, C_STEM // 4)
C_OUT = 16
C_HEAD = 32


# ---------------------------------------------------------------------------
# Fused Pallas kernel: stem -> MBConv (expand/dw/SE/project) -> head -> mean(F)
# One grid step == one batch element; everything stays in VMEM.
# ---------------------------------------------------------------------------

def _effinet_fused_kernel(x_ref, a_ref, b_ref, s_ref, m_ref,
                          stem_w_ref, stem_b_ref, exp_w_ref, exp_b_ref,
                          dw_w_ref, se_r_w_ref, se_r_b_ref,
                          se_e_w_ref, se_e_b_ref, proj_w_ref, proj_b_ref,
                          head_w_ref, head_b_ref, o_ref):
    f32 = jnp.float32
    hw = a_ref.shape[1]                     # Ho * Wo (post-stem pixels)

    x = x_ref[0].astype(f32)                # (F, T)

    # ---- stem: conv3x3 stride 2, TF-SAME pad, BN(folded), swish -------------
    # tap k=(kh,kw): value at output pixel r is x[2*(r//Wo)+kh, 2*(r%Wo)+kw]
    # (zero outside), realized as rowwise-dot of (A_kh @ x) with B_kw.
    stem = jnp.zeros((hw, stem_w_ref.shape[1]), f32)
    for kh in range(3):
        ax = jnp.dot(a_ref[kh], x, preferred_element_type=f32)        # (HW, T)
        for kw in range(3):
            k = kh * 3 + kw
            tap = jnp.sum(ax * b_ref[kw], axis=1, keepdims=True)      # (HW, 1)
            stem = stem + tap * stem_w_ref[k:k + 1, :]                # (HW, C_STEM)
    stem = stem + stem_b_ref[...]
    stem = stem * jax.nn.sigmoid(stem)                                # swish

    # ---- MBConv: expand 1x1 + swish -----------------------------------------
    e = jnp.dot(stem, exp_w_ref[...], preferred_element_type=f32) + exp_b_ref[...]
    e = e * jax.nn.sigmoid(e)                                         # (HW, C_EXP)

    # ---- MBConv: depthwise 3x3 stride 1 SAME + swish ------------------------
    # Each tap is a zero-padded spatial shift == a (HW, HW) 0/1 matrix matmul.
    d = jnp.zeros((hw, dw_w_ref.shape[1]), f32)
    for k in range(9):
        tap = jnp.dot(s_ref[k], e, preferred_element_type=f32)        # (HW, C_EXP)
        d = d + tap * dw_w_ref[k:k + 1, :]
    d = d * jax.nn.sigmoid(d)

    # ---- squeeze-and-excite (fully in-VMEM, no extra launches) --------------
    se = jnp.mean(d, axis=0, keepdims=True)                           # (1, C_EXP)
    se = jnp.dot(se, se_r_w_ref[...], preferred_element_type=f32) + se_r_b_ref[...]
    se = se * jax.nn.sigmoid(se)                                      # (1, C_SE)
    se = jnp.dot(se, se_e_w_ref[...], preferred_element_type=f32) + se_e_b_ref[...]
    se = jax.nn.sigmoid(se)                                           # (1, C_EXP)
    d = d * se

    # ---- MBConv: project 1x1 (linear, BN folded); no residual ---------------
    p = jnp.dot(d, proj_w_ref[...], preferred_element_type=f32) + proj_b_ref[...]

    # ---- head: conv1x1 + BN(folded) + swish ---------------------------------
    hd = jnp.dot(p, head_w_ref[...], preferred_element_type=f32) + head_b_ref[...]
    hd = hd * jax.nn.sigmoid(hd)                                      # (HW, C_HEAD)

    # ---- reduce 'b c f t -> b t c': mean over frequency via matmul ----------
    o_ref[0] = jnp.dot(m_ref[...], hd, preferred_element_type=f32).astype(o_ref.dtype)


# ---------------------------------------------------------------------------
# Selector / shift-matrix constants (built once; constant-folded under jit)
# ---------------------------------------------------------------------------

def _build_selectors(F_, T):
    Ho, Wo = -(-F_ // 2), -(-T // 2)          # TF-SAME, stride 2
    hw = Ho * Wo
    r = jnp.arange(hw)
    i, j = r // Wo, r % Wo

    # stem row / col selectors (zero rows where 2*i+kh / 2*j+kw fall in the pad)
    a_sel = jnp.stack([
        (jnp.arange(F_)[None, :] == (2 * i + kh)[:, None]).astype(jnp.float32)
        for kh in range(3)])                                    # (3, HW, F)
    b_sel = jnp.stack([
        (jnp.arange(T)[None, :] == (2 * j + kw)[:, None]).astype(jnp.float32)
        for kw in range(3)])                                    # (3, HW, T)

    # depthwise 3x3 stride-1 SAME shift matrices
    s_list = []
    for kh in range(3):
        for kw in range(3):
            si, sj = i + kh - 1, j + kw - 1
            valid = (si >= 0) & (si < Ho) & (sj >= 0) & (sj < Wo)
            src = si * Wo + sj
            s_list.append(((jnp.arange(hw)[None, :] == src[:, None])
                           & valid[:, None]).astype(jnp.float32))
    s_sel = jnp.stack(s_list)                                   # (9, HW, HW)

    # mean over frequency: out[t, :] = (1/Ho) * sum_i act[i*Wo + t, :]
    m_sel = (j[None, :] == jnp.arange(Wo)[:, None]).astype(jnp.float32) / Ho  # (Wo, HW)
    return a_sel, b_sel, s_sel, m_sel, Ho, Wo


# ---------------------------------------------------------------------------
# Parameters (weights pre-packed once: taps flattened to (9, C), biases (1, C))
# ---------------------------------------------------------------------------

def init_params(key):
    ks = jax.random.split(key, 8)
    bn = 1.0 / jnp.sqrt(1.0 + BN_EPS)   # folded eval-mode BatchNorm scale

    def w(k, shape, fan_in):
        return jax.random.normal(k, shape, jnp.float32) / jnp.sqrt(float(fan_in))

    return {
        # stem conv 3x3 / stride 2, BN folded; taps flattened (kh*3+kw, Cout)
        "stem_w": w(ks[0], (9, C_STEM), 9) * bn,
        "stem_b": jnp.zeros((1, C_STEM), jnp.float32),
        # MBConv expand 1x1, BN folded
        "exp_w": w(ks[1], (C_STEM, C_EXP), C_STEM) * bn,
        "exp_b": jnp.zeros((1, C_EXP), jnp.float32),
        # MBConv depthwise 3x3, BN folded; taps flattened (kh*3+kw, C)
        "dw_w": w(ks[2], (9, C_EXP), 9) * bn,
        # squeeze-and-excite reduce/expand 1x1 (real biases)
        "se_r_w": w(ks[3], (C_EXP, C_SE), C_EXP),
        "se_r_b": jnp.zeros((1, C_SE), jnp.float32),
        "se_e_w": w(ks[4], (C_SE, C_EXP), C_SE),
        "se_e_b": jnp.zeros((1, C_EXP), jnp.float32),
        # MBConv project 1x1 (linear), BN folded
        "proj_w": w(ks[5], (C_EXP, C_OUT), C_EXP) * bn,
        "proj_b": jnp.zeros((1, C_OUT), jnp.float32),
        # head conv 1x1, BN folded
        "head_w": w(ks[6], (C_OUT, C_HEAD), C_OUT) * bn,
        "head_b": jnp.zeros((1, C_HEAD), jnp.float32),
    }


# ---------------------------------------------------------------------------
# Forward pass (mirrors _EffiNet.forward) -- a single pallas_call over batch
# ---------------------------------------------------------------------------

def effinet_forward(x, params):
    B, F_, T = x.shape
    a_sel, b_sel, s_sel, m_sel, Ho, Wo = _build_selectors(F_, T)

    consts = [a_sel, b_sel, s_sel, m_sel]
    weight_order = ["stem_w", "stem_b", "exp_w", "exp_b", "dw_w",
                    "se_r_w", "se_r_b", "se_e_w", "se_e_b",
                    "proj_w", "proj_b", "head_w", "head_b"]
    weights = [params[k] for k in weight_order]

    def _const_spec(arr):
        zeros = (0,) * arr.ndim
        return pl.BlockSpec(arr.shape, lambda b, _z=zeros: _z)

    in_specs = ([pl.BlockSpec((1, F_, T), lambda b: (b, 0, 0))]
                + [_const_spec(a) for a in consts]
                + [_const_spec(w) for w in weights])
    out_specs = pl.BlockSpec((1, Wo, C_HEAD), lambda b: (b, 0, 0))

    # TODO(synk): if scaled to real EfficientNet resolutions, cast dot inputs
    # to bf16 (v6e/v7x MXU), tile HW, and set vmem_limit_bytes explicitly.
    return pl.pallas_call(
        _effinet_fused_kernel,
        out_shape=jax.ShapeDtypeStruct((B, Wo, C_HEAD), jnp.float32),
        grid_spec=pltpu.PrefetchScalarGridSpec(
            num_scalar_prefetch=0,
            grid=(B,),
            in_specs=in_specs,
            out_specs=out_specs),
        compiler_params=pltpu.CompilerParams(
            dimension_semantics=("parallel",)),
    )(x, *consts, *weights)


# TODO(synk): full default EfficientNet-B0 (16 MBConv blocks) is replaced by a
# single representative MBConv block with reduced channels for this synthetic
# proxy; the per-block math (expand/dw/SE/project, swish, folded BN) is exact.

if __name__ == "__main__":
    key = jax.random.PRNGKey(0)
    kx, kp = jax.random.split(key)

    B, F_, T = 2, 16, 16
    x = jax.random.normal(kx, (B, F_, T), jnp.float32)
    params = init_params(kp)

    fwd = jax.jit(effinet_forward)
    out = jax.block_until_ready(fwd(x, params))

    assert out.shape == (B, T // 2, C_HEAD), out.shape
    assert bool(jnp.all(jnp.isfinite(out)))
    print("KERNEL_OK")
</pallas_src>

<mosaic_0001>
module attributes {stable_mosaic.version = 11 : i64} {
  func.func @_effinet_fused_kernel(%arg0: i32, %arg1: memref<1x16x16xf32, #tpu.memory_space<vmem>>, %arg2: memref<3x64x16xf32, #tpu.memory_space<vmem>>, %arg3: memref<3x64x16xf32, #tpu.memory_space<vmem>>, %arg4: memref<9x64x64xf32, #tpu.memory_space<vmem>>, %arg5: memref<8x64xf32, #tpu.memory_space<vmem>>, %arg6: memref<9x8xf32, #tpu.memory_space<vmem>>, %arg7: memref<1x8xf32, #tpu.memory_space<vmem>>, %arg8: memref<8x32xf32, #tpu.memory_space<vmem>>, %arg9: memref<1x32xf32, #tpu.memory_space<vmem>>, %arg10: memref<9x32xf32, #tpu.memory_space<vmem>>, %arg11: memref<32x2xf32, #tpu.memory_space<vmem>>, %arg12: memref<1x2xf32, #tpu.memory_space<vmem>>, %arg13: memref<2x32xf32, #tpu.memory_space<vmem>>, %arg14: memref<1x32xf32, #tpu.memory_space<vmem>>, %arg15: memref<32x16xf32, #tpu.memory_space<vmem>>, %arg16: memref<1x16xf32, #tpu.memory_space<vmem>>, %arg17: memref<16x32xf32, #tpu.memory_space<vmem>>, %arg18: memref<1x32xf32, #tpu.memory_space<vmem>>, %arg19: memref<1x8x32xf32, #tpu.memory_space<vmem>>) attributes {dimension_semantics = [#tpu.dimension_semantics<parallel>], iteration_bounds = array<i64: 2>, scalar_prefetch = 0 : i64, scratch_operands = 0 : i64, tpu.core_type = #tpu.core_type<tc>, window_params = [{transform_indices = @transform_0, window_bounds = array<i64: 1, 16, 16>}, {pipeline_mode = #tpu.pipeline_mode<synchronous>, transform_indices = @transform_1, window_bounds = array<i64: 3, 64, 16>}, {pipeline_mode = #tpu.pipeline_mode<synchronous>, transform_indices = @transform_2, window_bounds = array<i64: 3, 64, 16>}, {pipeline_mode = #tpu.pipeline_mode<synchronous>, transform_indices = @transform_3, window_bounds = array<i64: 9, 64, 64>}, {pipeline_mode = #tpu.pipeline_mode<synchronous>, transform_indices = @transform_4, window_bounds = array<i64: 8, 64>}, {pipeline_mode = #tpu.pipeline_mode<synchronous>, transform_indices = @transform_5, window_bounds = array<i64: 9, 8>}, {pipeline_mode = #tpu.pipeline_mode<synchronous>, transform_indices = @transform_6, window_bounds = array<i64: 1, 8>}, {pipeline_mode = #tpu.pipeline_mode<synchronous>, transform_indices = @transform_7, window_bounds = array<i64: 8, 32>}, {pipeline_mode = #tpu.pipeline_mode<synchronous>, transform_indices = @transform_8, window_bounds = array<i64: 1, 32>}, {pipeline_mode = #tpu.pipeline_mode<synchronous>, transform_indices = @transform_9, window_bounds = array<i64: 9, 32>}, {pipeline_mode = #tpu.pipeline_mode<synchronous>, transform_indices = @transform_10, window_bounds = array<i64: 32, 2>}, {pipeline_mode = #tpu.pipeline_mode<synchronous>, transform_indices = @transform_11, window_bounds = array<i64: 1, 2>}, {pipeline_mode = #tpu.pipeline_mode<synchronous>, transform_indices = @transform_12, window_bounds = array<i64: 2, 32>}, {pipeline_mode = #tpu.pipeline_mode<synchronous>, transform_indices = @transform_13, window_bounds = array<i64: 1, 32>}, {pipeline_mode = #tpu.pipeline_mode<synchronous>, transform_indices = @transform_14, window_bounds = array<i64: 32, 16>}, {pipeline_mode = #tpu.pipeline_mode<synchronous>, transform_indices = @transform_15, window_bounds = array<i64: 1, 16>}, {pipeline_mode = #tpu.pipeline_mode<synchronous>, transform_indices = @transform_16, window_bounds = array<i64: 16, 32>}, {pipeline_mode = #tpu.pipeline_mode<synchronous>, transform_indices = @transform_17, window_bounds = array<i64: 1, 32>}, {transform_indices = @transform_18, window_bounds = array<i64: 1, 8, 32>}]} {
    %c0 = arith.constant 0 : index
    %c0_0 = arith.constant 0 : index
    %c0_1 = arith.constant 0 : index
    %0 = vector.load %arg1[%c0, %c0_0, %c0_1] : memref<1x16x16xf32, #tpu.memory_space<vmem>>, vector<1x16x16xf32>
    %1 = vector.shape_cast %0 : vector<1x16x16xf32> to vector<16x16xf32>
    %cst = arith.constant 0.000000e+00 : f32
    %2 = vector.broadcast %cst : f32 to vector<64x8xf32>
    %c0_2 = arith.constant 0 : index
    %c0_3 = arith.constant 0 : index
    %c0_4 = arith.constant 0 : index
    %3 = vector.load %arg2[%c0_2, %c0_3, %c0_4] : memref<3x64x16xf32, #tpu.memory_space<vmem>>, vector<1x64x16xf32>
    %4 = vector.shape_cast %3 : vector<1x64x16xf32> to vector<64x16xf32>
    %cst_5 = arith.constant dense<0.000000e+00> : vector<64x16xf32>
    %5 = tpu.matmul %4, %1, %cst_5 {dimension_numbers = #tpu.dot_dimension_numbers<[1], [0], [0], [1], [0, 0, 1, 1], [], []>} : vector<64x16xf32>, vector<16x16xf32>, vector<64x16xf32> -> vector<64x16xf32>
    %c0_6 = arith.constant 0 : index
    %c0_7 = arith.constant 0 : index
    %c0_8 = arith.constant 0 : index
    %6 = vector.load %arg3[%c0_6, %c0_7, %c0_8] : memref<3x64x16xf32, #tpu.memory_space<vmem>>, vector<1x64x16xf32>
    %7 = vector.shape_cast %6 : vector<1x64x16xf32> to vector<64x16xf32>
    %8 = arith.mulf %5, %7 : vector<64x16xf32>
    %cst_9 = arith.constant dense<0.000000e+00> : vector<64xf32>
    %9 = vector.multi_reduction <add>, %8, %cst_9 [1] : vector<64x16xf32> to vector<64xf32>
    %10 = vector.shape_cast %9 : vector<64xf32> to vector<64x1xf32>
    %c0_10 = arith.constant 0 : index
    %c0_11 = arith.constant 0 : index
    %11 = vector.load %arg6[%c0_10, %c0_11] : memref<9x8xf32, #tpu.memory_space<vmem>>, vector<1x8xf32>
    %12 = vector.broadcast %10 : vector<64x1xf32> to vector<64x8xf32>
    %13 = vector.broadcast %11 : vector<1x8xf32> to vector<64x8xf32>
    %14 = arith.mulf %12, %13 : vector<64x8xf32>
    %15 = arith.addf %2, %14 : vector<64x8xf32>
    %c1 = arith.constant 1 : index
    %c0_12 = arith.constant 0 : index
    %c0_13 = arith.constant 0 : index
    %16 = vector.load %arg3[%c1, %c0_12, %c0_13] : memref<3x64x16xf32, #tpu.memory_space<vmem>>, vector<1x64x16xf32>
    %17 = vector.shape_cast %16 : vector<1x64x16xf32> to vector<64x16xf32>
    %18 = arith.mulf %5, %17 : vector<64x16xf32>
    %cst_14 = arith.constant dense<0.000000e+00> : vector<64xf32>
    %19 = vector.multi_reduction <add>, %18, %cst_14 [1] : vector<64x16xf32> to vector<64xf32>
    %20 = vector.shape_cast %19 : vector<64xf32> to vector<64x1xf32>
    %c1_15 = arith.constant 1 : index
    %c0_16 = arith.constant 0 : index
    %21 = vector.load %arg6[%c1_15, %c0_16] : memref<9x8xf32, #tpu.memory_space<vmem>>, vector<1x8xf32>
    %22 = vector.broadcast %20 : vector<64x1xf32> to vector<64x8xf32>
    %23 = vector.broadcast %21 : vector<1x8xf32> to vector<64x8xf32>
    %24 = arith.mulf %22, %23 : vector<64x8xf32>
    %25 = arith.addf %15, %24 : vector<64x8xf32>
    %c2 = arith.constant 2 : index
    %c0_17 = arith.constant 0 : index
    %c0_18 = arith.constant 0 : index
    %26 = vector.load %arg3[%c2, %c0_17, %c0_18] : memref<3x64x16xf32, #tpu.memory_space<vmem>>, vector<1x64x16xf32>
    %27 = vector.shape_cast %26 : vector<1x64x16xf32> to vector<64x16xf32>
    %28 = arith.mulf %5, %27 : vector<64x16xf32>
    %cst_19 = arith.constant dense<0.000000e+00> : vector<64xf32>
    %29 = vector.multi_reduction <add>, %28, %cst_19 [1] : vector<64x16xf32> to vector<64xf32>
    %30 = vector.shape_cast %29 : vector<64xf32> to vector<64x1xf32>
    %c2_20 = arith.constant 2 : index
    %c0_21 = arith.constant 0 : index
    %31 = vector.load %arg6[%c2_20, %c0_21] : memref<9x8xf32, #tpu.memory_space<vmem>>, vector<1x8xf32>
    %32 = vector.broadcast %30 : vector<64x1xf32> to vector<64x8xf32>
    %33 = vector.broadcast %31 : vector<1x8xf32> to vector<64x8xf32>
    %34 = arith.mulf %32, %33 : vector<64x8xf32>
    %35 = arith.addf %25, %34 : vector<64x8xf32>
    %c1_22 = arith.constant 1 : index
    %c0_23 = arith.constant 0 : index
    %c0_24 = arith.constant 0 : index
    %36 = vector.load %arg2[%c1_22, %c0_23, %c0_24] : memref<3x64x16xf32, #tpu.memory_space<vmem>>, vector<1x64x16xf32>
    %37 = vector.shape_cast %36 : vector<1x64x16xf32> to vector<64x16xf32>
    %cst_25 = arith.constant dense<0.000000e+00> : vector<64x16xf32>
    %38 = tpu.matmul %37, %1, %cst_25 {dimension_numbers = #tpu.dot_dimension_numbers<[1], [0], [0], [1], [0, 0, 1, 1], [], []>} : vector<64x16xf32>, vector<16x16xf32>, vector<64x16xf32> -> vector<64x16xf32>
    %c0_26 = arith.constant 0 : index
    %c0_27 = arith.constant 0 : index
    %c0_28 = arith.constant 0 : index
    %39 = vector.load %arg3[%c0_26, %c0_27, %c0_28] : memref<3x64x16xf32, #tpu.memory_space<vmem>>, vector<1x64x16xf32>
    %40 = vector.shape_cast %39 : vector<1x64x16xf32> to vector<64x16xf32>
    %41 = arith.mulf %38, %40 : vector<64x16xf32>
    %cst_29 = arith.constant dense<0.000000e+00> : vector<64xf32>
    %42 = vector.multi_reduction <add>, %41, %cst_29 [1] : vector<64x16xf32> to vector<64xf32>
    %43 = vector.shape_cast %42 : vector<64xf32> to vector<64x1xf32>
    %c3 = arith.constant 3 : index
    %c0_30 = arith.constant 0 : index
    %44 = vector.load %arg6[%c3, %c0_30] : memref<9x8xf32, #tpu.memory_space<vmem>>, vector<1x8xf32>
    %45 = vector.broadcast %43 : vector<64x1xf32> to vector<64x8xf32>
    %46 = vector.broadcast %44 : vector<1x8xf32> to vector<64x8xf32>
    %47 = arith.mulf %45, %46 : vector<64x8xf32>
    %48 = arith.addf %35, %47 : vector<64x8xf32>
    %c1_31 = arith.constant 1 : index
    %c0_32 = arith.constant 0 : index
    %c0_33 = arith.constant 0 : index
    %49 = vector.load %arg3[%c1_31, %c0_32, %c0_33] : memref<3x64x16xf32, #tpu.memory_space<vmem>>, vector<1x64x16xf32>
    %50 = vector.shape_cast %49 : vector<1x64x16xf32> to vector<64x16xf32>
    %51 = arith.mulf %38, %50 : vector<64x16xf32>
    %cst_34 = arith.constant dense<0.000000e+00> : vector<64xf32>
    %52 = vector.multi_reduction <add>, %51, %cst_34 [1] : vector<64x16xf32> to vector<64xf32>
    %53 = vector.shape_cast %52 : vector<64xf32> to vector<64x1xf32>
    %c4 = arith.constant 4 : index
    %c0_35 = arith.constant 0 : index
    %54 = vector.load %arg6[%c4, %c0_35] : memref<9x8xf32, #tpu.memory_space<vmem>>, vector<1x8xf32>
    %55 = vector.broadcast %53 : vector<64x1xf32> to vector<64x8xf32>
    %56 = vector.broadcast %54 : vector<1x8xf32> to vector<64x8xf32>
    %57 = arith.mulf %55, %56 : vector<64x8xf32>
    %58 = arith.addf %48, %57 : vector<64x8xf32>
    %c2_36 = arith.constant 2 : index
    %c0_37 = arith.constant 0 : index
    %c0_38 = arith.constant 0 : index
    %59 = vector.load %arg3[%c2_36, %c0_37, %c0_38] : memref<3x64x16xf32, #tpu.memory_space<vmem>>, vector<1x64x16xf32>
    %60 = vector.shape_cast %59 : vector<1x64x16xf32> to vector<64x16xf32>
    %61 = arith.mulf %38, %60 : vector<64x16xf32>
    %cst_39 = arith.constant dense<0.000000e+00> : vector<64xf32>
    %62 = vector.multi_reduction <add>, %61, %cst_39 [1] : vector<64x16xf32> to vector<64xf32>
    %63 = vector.shape_cast %62 : vector<64xf32> to vector<64x1xf32>
    %c5 = arith.constant 5 : index
    %c0_40 = arith.constant 0 : index
    %64 = vector.load %arg6[%c5, %c0_40] : memref<9x8xf32, #tpu.memory_space<vmem>>, vector<1x8xf32>
    %65 = vector.broadcast %63 : vector<64x1xf32> to vector<64x8xf32>
    %66 = vector.broadcast %64 : vector<1x8xf32> to vector<64x8xf32>
    %67 = arith.mulf %65, %66 : vector<64x8xf32>
    %68 = arith.addf %58, %67 : vector<64x8xf32>
    %c2_41 = arith.constant 2 : index
    %c0_42 = arith.constant 0 : index
    %c0_43 = arith.constant 0 : index
    %69 = vector.load %arg2[%c2_41, %c0_42, %c0_43] : memref<3x64x16xf32, #tpu.memory_space<vmem>>, vector<1x64x16xf32>
    %70 = vector.shape_cast %69 : vector<1x64x16xf32> to vector<64x16xf32>
    %cst_44 = arith.constant dense<0.000000e+00> : vector<64x16xf32>
    %71 = tpu.matmul %70, %1, %cst_44 {dimension_numbers = #tpu.dot_dimension_numbers<[1], [0], [0], [1], [0, 0, 1, 1], [], []>} : vector<64x16xf32>, vector<16x16xf32>, vector<64x16xf32> -> vector<64x16xf32>
    %c0_45 = arith.constant 0 : index
    %c0_46 = arith.constant 0 : index
    %c0_47 = arith.constant 0 : index
    %72 = vector.load %arg3[%c0_45, %c0_46, %c0_47] : memref<3x64x16xf32, #tpu.memory_space<vmem>>, vector<1x64x16xf32>
    %73 = vector.shape_cast %72 : vector<1x64x16xf32> to vector<64x16xf32>
    %74 = arith.mulf %71, %73 : vector<64x16xf32>
    %cst_48 = arith.constant dense<0.000000e+00> : vector<64xf32>
    %75 = vector.multi_reduction <add>, %74, %cst_48 [1] : vector<64x16xf32> to vector<64xf32>
    %76 = vector.shape_cast %75 : vector<64xf32> to vector<64x1xf32>
    %c6 = arith.constant 6 : index
    %c0_49 = arith.constant 0 : index
    %77 = vector.load %arg6[%c6, %c0_49] : memref<9x8xf32, #tpu.memory_space<vmem>>, vector<1x8xf32>
    %78 = vector.broadcast %76 : vector<64x1xf32> to vector<64x8xf32>
    %79 = vector.broadcast %77 : vector<1x8xf32> to vector<64x8xf32>
    %80 = arith.mulf %78, %79 : vector<64x8xf32>
    %81 = arith.addf %68, %80 : vector<64x8xf32>
    %c1_50 = arith.constant 1 : index
    %c0_51 = arith.constant 0 : index
    %c0_52 = arith.constant 0 : index
    %82 = vector.load %arg3[%c1_50, %c0_51, %c0_52] : memref<3x64x16xf32, #tpu.memory_space<vmem>>, vector<1x64x16xf32>
    %83 = vector.shape_cast %82 : vector<1x64x16xf32> to vector<64x16xf32>
    %84 = arith.mulf %71, %83 : vector<64x16xf32>
    %cst_53 = arith.constant dense<0.000000e+00> : vector<64xf32>
    %85 = vector.multi_reduction <add>, %84, %cst_53 [1] : vector<64x16xf32> to vector<64xf32>
    %86 = vector.shape_cast %85 : vector<64xf32> to vector<64x1xf32>
    %c7 = arith.constant 7 : index
    %c0_54 = arith.constant 0 : index
    %87 = vector.load %arg6[%c7, %c0_54] : memref<9x8xf32, #tpu.memory_space<vmem>>, vector<1x8xf32>
    %88 = vector.broadcast %86 : vector<64x1xf32> to vector<64x8xf32>
    %89 = vector.broadcast %87 : vector<1x8xf32> to vector<64x8xf32>
    %90 = arith.mulf %88, %89 : vector<64x8xf32>
    %91 = arith.addf %81, %90 : vector<64x8xf32>
    %c2_55 = arith.constant 2 : index
    %c0_56 = arith.constant 0 : index
    %c0_57 = arith.constant 0 : index
    %92 = vector.load %arg3[%c2_55, %c0_56, %c0_57] : memref<3x64x16xf32, #tpu.memory_space<vmem>>, vector<1x64x16xf32>
    %93 = vector.shape_cast %92 : vector<1x64x16xf32> to vector<64x16xf32>
    %94 = arith.mulf %71, %93 : vector<64x16xf32>
    %cst_58 = arith.constant dense<0.000000e+00> : vector<64xf32>
    %95 = vector.multi_reduction <add>, %94, %cst_58 [1] : vector<64x16xf32> to vector<64xf32>
    %96 = vector.shape_cast %95 : vector<64xf32> to vector<64x1xf32>
    %c8 = arith.constant 8 : index
    %c0_59 = arith.constant 0 : index
    %97 = vector.load %arg6[%c8, %c0_59] : memref<9x8xf32, #tpu.memory_space<vmem>>, vector<1x8xf32>
    %98 = vector.broadcast %96 : vector<64x1xf32> to vector<64x8xf32>
    %99 = vector.broadcast %97 : vector<1x8xf32> to vector<64x8xf32>
    %100 = arith.mulf %98, %99 : vector<64x8xf32>
    %101 = arith.addf %91, %100 : vector<64x8xf32>
    %c0_60 = arith.constant 0 : index
    %c0_61 = arith.constant 0 : index
    %102 = vector.load %arg7[%c0_60, %c0_61] : memref<1x8xf32, #tpu.memory_space<vmem>>, vector<1x8xf32>
    %103 = vector.broadcast %102 : vector<1x8xf32> to vector<64x8xf32>
    %104 = arith.addf %101, %103 : vector<64x8xf32>
    %105 = arith.negf %104 : vector<64x8xf32>
    %106 = math.exp %105 : vector<64x8xf32>
    %cst_62 = arith.constant 1.000000e+00 : f32
    %107 = vector.broadcast %cst_62 : f32 to vector<64x8xf32>
    %108 = arith.addf %107, %106 : vector<64x8xf32>
    %109 = arith.divf %107, %108 : vector<64x8xf32>
    %110 = arith.mulf %104, %109 : vector<64x8xf32>
    %c0_63 = arith.constant 0 : index
    %c0_64 = arith.constant 0 : index
    %111 = vector.load %arg8[%c0_63, %c0_64] : memref<8x32xf32, #tpu.memory_space<vmem>>, vector<8x32xf32>
    %cst_65 = arith.constant dense<0.000000e+00> : vector<64x32xf32>
    %112 = tpu.matmul %110, %111, %cst_65 {dimension_numbers = #tpu.dot_dimension_numbers<[1], [0], [0], [1], [0, 0, 1, 1], [], []>} : vector<64x8xf32>, vector<8x32xf32>, vector<64x32xf32> -> vector<64x32xf32>
    %c0_66 = arith.constant 0 : index
    %c0_67 = arith.constant 0 : index
    %113 = vector.load %arg9[%c0_66, %c0_67] : memref<1x32xf32, #tpu.memory_space<vmem>>, vector<1x32xf32>
    %114 = vector.broadcast %113 : vector<1x32xf32> to vector<64x32xf32>
    %115 = arith.addf %112, %114 : vector<64x32xf32>
    %116 = arith.negf %115 : vector<64x32xf32>
    %117 = math.exp %116 : vector<64x32xf32>
    %cst_68 = arith.constant 1.000000e+00 : f32
    %118 = vector.broadcast %cst_68 : f32 to vector<64x32xf32>
    %119 = arith.addf %118, %117 : vector<64x32xf32>
    %120 = arith.divf %118, %119 : vector<64x32xf32>
    %121 = arith.mulf %115, %120 : vector<64x32xf32>
    %cst_69 = arith.constant 0.000000e+00 : f32
    %122 = vector.broadcast %cst_69 : f32 to vector<64x32xf32>
    %c0_70 = arith.constant 0 : index
    %c0_71 = arith.constant 0 : index
    %c0_72 = arith.constant 0 : index
    %123 = vector.load %arg4[%c0_70, %c0_71, %c0_72] : memref<9x64x64xf32, #tpu.memory_space<vmem>>, vector<1x64x64xf32>
    %124 = vector.shape_cast %123 : vector<1x64x64xf32> to vector<64x64xf32>
    %cst_73 = arith.constant dense<0.000000e+00> : vector<64x32xf32>
    %125 = tpu.matmul %124, %121, %cst_73 {dimension_numbers = #tpu.dot_dimension_numbers<[1], [0], [0], [1], [0, 0, 1, 1], [], []>} : vector<64x64xf32>, vector<64x32xf32>, vector<64x32xf32> -> vector<64x32xf32>
    %c0_74 = arith.constant 0 : index
    %c0_75 = arith.constant 0 : index
    %126 = vector.load %arg10[%c0_74, %c0_75] : memref<9x32xf32, #tpu.memory_space<vmem>>, vector<1x32xf32>
    %127 = vector.broadcast %126 : vector<1x32xf32> to vector<64x32xf32>
    %128 = arith.mulf %125, %127 : vector<64x32xf32>
    %129 = arith.addf %122, %128 : vector<64x32xf32>
    %c1_76 = arith.constant 1 : index
    %c0_77 = arith.constant 0 : index
    %c0_78 = arith.constant 0 : index
    %130 = vector.load %arg4[%c1_76, %c0_77, %c0_78] : memref<9x64x64xf32, #tpu.memory_space<vmem>>, vector<1x64x64xf32>
    %131 = vector.shape_cast %130 : vector<1x64x64xf32> to vector<64x64xf32>
    %cst_79 = arith.constant dense<0.000000e+00> : vector<64x32xf32>
    %132 = tpu.matmul %131, %121, %cst_79 {dimension_numbers = #tpu.dot_dimension_numbers<[1], [0], [0], [1], [0, 0, 1, 1], [], []>} : vector<64x64xf32>, vector<64x32xf32>, vector<64x32xf32> -> vector<64x32xf32>
    %c1_80 = arith.constant 1 : index
    %c0_81 = arith.constant 0 : index
    %133 = vector.load %arg10[%c1_80, %c0_81] : memref<9x32xf32, #tpu.memory_space<vmem>>, vector<1x32xf32>
    %134 = vector.broadcast %133 : vector<1x32xf32> to vector<64x32xf32>
    %135 = arith.mulf %132, %134 : vector<64x32xf32>
    %136 = arith.addf %129, %135 : vector<64x32xf32>
    %c2_82 = arith.constant 2 : index
    %c0_83 = arith.constant 0 : index
    %c0_84 = arith.constant 0 : index
    %137 = vector.load %arg4[%c2_82, %c0_83, %c0_84] : memref<9x64x64xf32, #tpu.memory_space<vmem>>, vector<1x64x64xf32>
    %138 = vector.shape_cast %137 : vector<1x64x64xf32> to vector<64x64xf32>
    %cst_85 = arith.constant dense<0.000000e+00> : vector<64x32xf32>
    %139 = tpu.matmul %138, %121, %cst_85 {dimension_numbers = #tpu.dot_dimension_numbers<[1], [0], [0], [1], [0, 0, 1, 1], [], []>} : vector<64x64xf32>, vector<64x32xf32>, vector<64x32xf32> -> vector<64x32xf32>
    %c2_86 = arith.constant 2 : index
    %c0_87 = arith.constant 0 : index
    %140 = vector.load %arg10[%c2_86, %c0_87] : memref<9x32xf32, #tpu.memory_space<vmem>>, vector<1x32xf32>
    %141 = vector.broadcast %140 : vector<1x32xf32> to vector<64x32xf32>
    %142 = arith.mulf %139, %141 : vector<64x32xf32>
    %143 = arith.addf %136, %142 : vector<64x32xf32>
    %c3_88 = arith.constant 3 : index
    %c0_89 = arith.constant 0 : index
    %c0_90 = arith.constant 0 : index
    %144 = vector.load %arg4[%c3_88, %c0_89, %c0_90] : memref<9x64x64xf32, #tpu.memory_space<vmem>>, vector<1x64x64xf32>
    %145 = vector.shape_cast %144 : vector<1x64x64xf32> to vector<64x64xf32>
    %cst_91 = arith.constant dense<0.000000e+00> : vector<64x32xf32>
    %146 = tpu.matmul %145, %121, %cst_91 {dimension_numbers = #tpu.dot_dimension_numbers<[1], [0], [0], [1], [0, 0, 1, 1], [], []>} : vector<64x64xf32>, vector<64x32xf32>, vector<64x32xf32> -> vector<64x32xf32>
    %c3_92 = arith.constant 3 : index
    %c0_93 = arith.constant 0 : index
    %147 = vector.load %arg10[%c3_92, %c0_93] : memref<9x32xf32, #tpu.memory_space<vmem>>, vector<1x32xf32>
    %148 = vector.broadcast %147 : vector<1x32xf32> to vector<64x32xf32>
    %149 = arith.mulf %146, %148 : vector<64x32xf32>
    %150 = arith.addf %143, %149 : vector<64x32xf32>
    %c4_94 = arith.constant 4 : index
    %c0_95 = arith.constant 0 : index
    %c0_96 = arith.constant 0 : index
    %151 = vector.load %arg4[%c4_94, %c0_95, %c0_96] : memref<9x64x64xf32, #tpu.memory_space<vmem>>, vector<1x64x64xf32>
    %152 = vector.shape_cast %151 : vector<1x64x64xf32> to vector<64x64xf32>
    %cst_97 = arith.constant dense<0.000000e+00> : vector<64x32xf32>
    %153 = tpu.matmul %152, %121, %cst_97 {dimension_numbers = #tpu.dot_dimension_numbers<[1], [0], [0], [1], [0, 0, 1, 1], [], []>} : vector<64x64xf32>, vector<64x32xf32>, vector<64x32xf32> -> vector<64x32xf32>
    %c4_98 = arith.constant 4 : index
    %c0_99 = arith.constant 0 : index
    %154 = vector.load %arg10[%c4_98, %c0_99] : memref<9x32xf32, #tpu.memory_space<vmem>>, vector<1x32xf32>
    %155 = vector.broadcast %154 : vector<1x32xf32> to vector<64x32xf32>
    %156 = arith.mulf %153, %155 : vector<64x32xf32>
    %157 = arith.addf %150, %156 : vector<64x32xf32>
    %c5_100 = arith.constant 5 : index
    %c0_101 = arith.constant 0 : index
    %c0_102 = arith.constant 0 : index
    %158 = vector.load %arg4[%c5_100, %c0_101, %c0_102] : memref<9x64x64xf32, #tpu.memory_space<vmem>>, vector<1x64x64xf32>
    %159 = vector.shape_cast %158 : vector<1x64x64xf32> to vector<64x64xf32>
    %cst_103 = arith.constant dense<0.000000e+00> : vector<64x32xf32>
    %160 = tpu.matmul %159, %121, %cst_103 {dimension_numbers = #tpu.dot_dimension_numbers<[1], [0], [0], [1], [0, 0, 1, 1], [], []>} : vector<64x64xf32>, vector<64x32xf32>, vector<64x32xf32> -> vector<64x32xf32>
    %c5_104 = arith.constant 5 : index
    %c0_105 = arith.constant 0 : index
    %161 = vector.load %arg10[%c5_104, %c0_105] : memref<9x32xf32, #tpu.memory_space<vmem>>, vector<1x32xf32>
    %162 = vector.broadcast %161 : vector<1x32xf32> to vector<64x32xf32>
    %163 = arith.mulf %160, %162 : vector<64x32xf32>
    %164 = arith.addf %157, %163 : vector<64x32xf32>
    %c6_106 = arith.constant 6 : index
    %c0_107 = arith.constant 0 : index
    %c0_108 = arith.constant 0 : index
    %165 = vector.load %arg4[%c6_106, %c0_107, %c0_108] : memref<9x64x64xf32, #tpu.memory_space<vmem>>, vector<1x64x64xf32>
    %166 = vector.shape_cast %165 : vector<1x64x64xf32> to vector<64x64xf32>
    %cst_109 = arith.constant dense<0.000000e+00> : vector<64x32xf32>
    %167 = tpu.matmul %166, %121, %cst_109 {dimension_numbers = #tpu.dot_dimension_numbers<[1], [0], [0], [1], [0, 0, 1, 1], [], []>} : vector<64x64xf32>, vector<64x32xf32>, vector<64x32xf32> -> vector<64x32xf32>
    %c6_110 = arith.constant 6 : index
    %c0_111 = arith.constant 0 : index
    %168 = vector.load %arg10[%c6_110, %c0_111] : memref<9x32xf32, #tpu.memory_space<vmem>>, vector<1x32xf32>
    %169 = vector.broadcast %168 : vector<1x32xf32> to vector<64x32xf32>
    %170 = arith.mulf %167, %169 : vector<64x32xf32>
    %171 = arith.addf %164, %170 : vector<64x32xf32>
    %c7_112 = arith.constant 7 : index
    %c0_113 = arith.constant 0 : index
    %c0_114 = arith.constant 0 : index
    %172 = vector.load %arg4[%c7_112, %c0_113, %c0_114] : memref<9x64x64xf32, #tpu.memory_space<vmem>>, vector<1x64x64xf32>
    %173 = vector.shape_cast %172 : vector<1x64x64xf32> to vector<64x64xf32>
    %cst_115 = arith.constant dense<0.000000e+00> : vector<64x32xf32>
    %174 = tpu.matmul %173, %121, %cst_115 {dimension_numbers = #tpu.dot_dimension_numbers<[1], [0], [0], [1], [0, 0, 1, 1], [], []>} : vector<64x64xf32>, vector<64x32xf32>, vector<64x32xf32> -> vector<64x32xf32>
    %c7_116 = arith.constant 7 : index
    %c0_117 = arith.constant 0 : index
    %175 = vector.load %arg10[%c7_116, %c0_117] : memref<9x32xf32, #tpu.memory_space<vmem>>, vector<1x32xf32>
    %176 = vector.broadcast %175 : vector<1x32xf32> to vector<64x32xf32>
    %177 = arith.mulf %174, %176 : vector<64x32xf32>
    %178 = arith.addf %171, %177 : vector<64x32xf32>
    %c8_118 = arith.constant 8 : index
    %c0_119 = arith.constant 0 : index
    %c0_120 = arith.constant 0 : index
    %179 = vector.load %arg4[%c8_118, %c0_119, %c0_120] : memref<9x64x64xf32, #tpu.memory_space<vmem>>, vector<1x64x64xf32>
    %180 = vector.shape_cast %179 : vector<1x64x64xf32> to vector<64x64xf32>
    %cst_121 = arith.constant dense<0.000000e+00> : vector<64x32xf32>
    %181 = tpu.matmul %180, %121, %cst_121 {dimension_numbers = #tpu.dot_dimension_numbers<[1], [0], [0], [1], [0, 0, 1, 1], [], []>} : vector<64x64xf32>, vector<64x32xf32>, vector<64x32xf32> -> vector<64x32xf32>
    %c8_122 = arith.constant 8 : index
    %c0_123 = arith.constant 0 : index
    %182 = vector.load %arg10[%c8_122, %c0_123] : memref<9x32xf32, #tpu.memory_space<vmem>>, vector<1x32xf32>
    %183 = vector.broadcast %182 : vector<1x32xf32> to vector<64x32xf32>
    %184 = arith.mulf %181, %183 : vector<64x32xf32>
    %185 = arith.addf %178, %184 : vector<64x32xf32>
    %186 = arith.negf %185 : vector<64x32xf32>
    %187 = math.exp %186 : vector<64x32xf32>
    %cst_124 = arith.constant 1.000000e+00 : f32
    %188 = vector.broadcast %cst_124 : f32 to vector<64x32xf32>
    %189 = arith.addf %188, %187 : vector<64x32xf32>
    %190 = arith.divf %188, %189 : vector<64x32xf32>
    %191 = arith.mulf %185, %190 : vector<64x32xf32>
    %cst_125 = arith.constant dense<0.000000e+00> : vector<32xf32>
    %192 = vector.multi_reduction <add>, %191, %cst_125 [0] : vector<64x32xf32> to vector<32xf32>
    %193 = vector.shape_cast %192 : vector<32xf32> to vector<1x32xf32>
    %cst_126 = arith.constant 6.400000e+01 : f32
    %194 = vector.broadcast %cst_126 : f32 to vector<1x32xf32>
    %195 = arith.divf %193, %194 : vector<1x32xf32>
    %c0_127 = arith.constant 0 : index
    %c0_128 = arith.constant 0 : index
    %196 = vector.load %arg11[%c0_127, %c0_128] : memref<32x2xf32, #tpu.memory_space<vmem>>, vector<32x2xf32>
    %cst_129 = arith.constant dense<0.000000e+00> : vector<1x2xf32>
    %197 = tpu.matmul %195, %196, %cst_129 {dimension_numbers = #tpu.dot_dimension_numbers<[1], [0], [0], [1], [0, 0, 1, 1], [], []>} : vector<1x32xf32>, vector<32x2xf32>, vector<1x2xf32> -> vector<1x2xf32>
    %c0_130 = arith.constant 0 : index
    %c0_131 = arith.constant 0 : index
    %198 = vector.load %arg12[%c0_130, %c0_131] : memref<1x2xf32, #tpu.memory_space<vmem>>, vector<1x2xf32>
    %199 = arith.addf %197, %198 : vector<1x2xf32>
    %200 = arith.negf %199 : vector<1x2xf32>
    %201 = math.exp %200 : vector<1x2xf32>
    %cst_132 = arith.constant 1.000000e+00 : f32
    %202 = vector.broadcast %cst_132 : f32 to vector<1x2xf32>
    %203 = arith.addf %202, %201 : vector<1x2xf32>
    %204 = arith.divf %202, %203 : vector<1x2xf32>
    %205 = arith.mulf %199, %204 : vector<1x2xf32>
    %c0_133 = arith.constant 0 : index
    %c0_134 = arith.constant 0 : index
    %206 = vector.load %arg13[%c0_133, %c0_134] : memref<2x32xf32, #tpu.memory_space<vmem>>, vector<2x32xf32>
    %cst_135 = arith.constant dense<0.000000e+00> : vector<1x32xf32>
    %207 = tpu.matmul %205, %206, %cst_135 {dimension_numbers = #tpu.dot_dimension_numbers<[1], [0], [0], [1], [0, 0, 1, 1], [], []>} : vector<1x2xf32>, vector<2x32xf32>, vector<1x32xf32> -> vector<1x32xf32>
    %c0_136 = arith.constant 0 : index
    %c0_137 = arith.constant 0 : index
    %208 = vector.load %arg14[%c0_136, %c0_137] : memref<1x32xf32, #tpu.memory_space<vmem>>, vector<1x32xf32>
    %209 = arith.addf %207, %208 : vector<1x32xf32>
    %210 = arith.negf %209 : vector<1x32xf32>
    %211 = math.exp %210 : vector<1x32xf32>
    %cst_138 = arith.constant 1.000000e+00 : f32
    %212 = vector.broadcast %cst_138 : f32 to vector<1x32xf32>
    %213 = arith.addf %212, %211 : vector<1x32xf32>
    %214 = arith.divf %212, %213 : vector<1x32xf32>
    %215 = vector.broadcast %214 : vector<1x32xf32> to vector<64x32xf32>
    %216 = arith.mulf %191, %215 : vector<64x32xf32>
    %c0_139 = arith.constant 0 : index
    %c0_140 = arith.constant 0 : index
    %217 = vector.load %arg15[%c0_139, %c0_140] : memref<32x16xf32, #tpu.memory_space<vmem>>, vector<32x16xf32>
    %cst_141 = arith.constant dense<0.000000e+00> : vector<64x16xf32>
    %218 = tpu.matmul %216, %217, %cst_141 {dimension_numbers = #tpu.dot_dimension_numbers<[1], [0], [0], [1], [0, 0, 1, 1], [], []>} : vector<64x32xf32>, vector<32x16xf32>, vector<64x16xf32> -> vector<64x16xf32>
    %c0_142 = arith.constant 0 : index
    %c0_143 = arith.constant 0 : index
    %219 = vector.load %arg16[%c0_142, %c0_143] : memref<1x16xf32, #tpu.memory_space<vmem>>, vector<1x16xf32>
    %220 = vector.broadcast %219 : vector<1x16xf32> to vector<64x16xf32>
    %221 = arith.addf %218, %220 : vector<64x16xf32>
    %c0_144 = arith.constant 0 : index
    %c0_145 = arith.constant 0 : index
    %222 = vector.load %arg17[%c0_144, %c0_145] : memref<16x32xf32, #tpu.memory_space<vmem>>, vector<16x32xf32>
    %cst_146 = arith.constant dense<0.000000e+00> : vector<64x32xf32>
    %223 = tpu.matmul %221, %222, %cst_146 {dimension_numbers = #tpu.dot_dimension_numbers<[1], [0], [0], [1], [0, 0, 1, 1], [], []>} : vector<64x16xf32>, vector<16x32xf32>, vector<64x32xf32> -> vector<64x32xf32>
    %c0_147 = arith.constant 0 : index
    %c0_148 = arith.constant 0 : index
    %224 = vector.load %arg18[%c0_147, %c0_148] : memref<1x32xf32, #tpu.memory_space<vmem>>, vector<1x32xf32>
    %225 = vector.broadcast %224 : vector<1x32xf32> to vector<64x32xf32>
    %226 = arith.addf %223, %225 : vector<64x32xf32>
    %227 = arith.negf %226 : vector<64x32xf32>
    %228 = math.exp %227 : vector<64x32xf32>
    %cst_149 = arith.constant 1.000000e+00 : f32
    %229 = vector.broadcast %cst_149 : f32 to vector<64x32xf32>
    %230 = arith.addf %229, %228 : vector<64x32xf32>
    %231 = arith.divf %229, %230 : vector<64x32xf32>
    %232 = arith.mulf %226, %231 : vector<64x32xf32>
    %c0_150 = arith.constant 0 : index
    %c0_151 = arith.constant 0 : index
    %233 = vector.load %arg5[%c0_150, %c0_151] : memref<8x64xf32, #tpu.memory_space<vmem>>, vector<8x64xf32>
    %cst_152 = arith.constant dense<0.000000e+00> : vector<8x32xf32>
    %234 = tpu.matmul %233, %232, %cst_152 {dimension_numbers = #tpu.dot_dimension_numbers<[1], [0], [0], [1], [0, 0, 1, 1], [], []>} : vector<8x64xf32>, vector<64x32xf32>, vector<8x32xf32> -> vector<8x32xf32>
    %c0_153 = arith.constant 0 : index
    %c0_154 = arith.constant 0 : index
    %c0_155 = arith.constant 0 : index
    %235 = vector.load %arg19[%c0_153, %c0_154, %c0_155] : memref<1x8x32xf32, #tpu.memory_space<vmem>>, vector<1x8x32xf32>
    %236 = vector.shape_cast %235 : vector<1x8x32xf32> to vector<8x32xf32>
    %237 = vector.shape_cast %234 : vector<8x32xf32> to vector<1x8x32xf32>
    tpu.vector_store %arg19[%c0_153, %c0_154, %c0_155], %237 {strides = array<i32>} : memref<1x8x32xf32, #tpu.memory_space<vmem>>, vector<1x8x32xf32>,
    return
  }
  func.func @transform_0(%arg0: i32) -> (i32, i32, i32) {
    %c0_i32 = arith.constant 0 : i32
    %c0_i32_0 = arith.constant 0 : i32
    %c0_i32_1 = arith.constant 0 : i32
    return %arg0, %c0_i32, %c0_i32_0 : i32, i32, i32
  }
  func.func @transform_1(%arg0: i32) -> (i32, i32, i32) {
    %c0_i32 = arith.constant 0 : i32
    %c0_i32_0 = arith.constant 0 : i32
    %c0_i32_1 = arith.constant 0 : i32
    %c0_i32_2 = arith.constant 0 : i32
    return %c0_i32, %c0_i32_0, %c0_i32_1 : i32, i32, i32
  }
  func.func @transform_2(%arg0: i32) -> (i32, i32, i32) {
    %c0_i32 = arith.constant 0 : i32
    %c0_i32_0 = arith.constant 0 : i32
    %c0_i32_1 = arith.constant 0 : i32
    %c0_i32_2 = arith.constant 0 : i32
    return %c0_i32, %c0_i32_0, %c0_i32_1 : i32, i32, i32
  }
  func.func @transform_3(%arg0: i32) -> (i32, i32, i32) {
    %c0_i32 = arith.constant 0 : i32
    %c0_i32_0 = arith.constant 0 : i32
    %c0_i32_1 = arith.constant 0 : i32
    %c0_i32_2 = arith.constant 0 : i32
    return %c0_i32, %c0_i32_0, %c0_i32_1 : i32, i32, i32
  }
  func.func @transform_4(%arg0: i32) -> (i32, i32) {
    %c0_i32 = arith.constant 0 : i32
    %c0_i32_0 = arith.constant 0 : i32
    %c0_i32_1 = arith.constant 0 : i32
    return %c0_i32, %c0_i32_0 : i32, i32
  }
  func.func @transform_5(%arg0: i32) -> (i32, i32) {
    %c0_i32 = arith.constant 0 : i32
    %c0_i32_0 = arith.constant 0 : i32
    %c0_i32_1 = arith.constant 0 : i32
    return %c0_i32, %c0_i32_0 : i32, i32
  }
  func.func @transform_6(%arg0: i32) -> (i32, i32) {
    %c0_i32 = arith.constant 0 : i32
    %c0_i32_0 = arith.constant 0 : i32
    %c0_i32_1 = arith.constant 0 : i32
    return %c0_i32, %c0_i32_0 : i32, i32
  }
  func.func @transform_7(%arg0: i32) -> (i32, i32) {
    %c0_i32 = arith.constant 0 : i32
    %c0_i32_0 = arith.constant 0 : i32
    %c0_i32_1 = arith.constant 0 : i32
    return %c0_i32, %c0_i32_0 : i32, i32
  }
  func.func @transform_8(%arg0: i32) -> (i32, i32) {
    %c0_i32 = arith.constant 0 : i32
    %c0_i32_0 = arith.constant 0 : i32
    %c0_i32_1 = arith.constant 0 : i32
    return %c0_i32, %c0_i32_0 : i32, i32
  }
  func.func @transform_9(%arg0: i32) -> (i32, i32) {
    %c0_i32 = arith.constant 0 : i32
    %c0_i32_0 = arith.constant 0 : i32
    %c0_i32_1 = arith.constant 0 : i32
    return %c0_i32, %c0_i32_0 : i32, i32
  }
  func.func @transform_10(%arg0: i32) -> (i32, i32) {
    %c0_i32 = arith.constant 0 : i32
    %c0_i32_0 = arith.constant 0 : i32
    %c0_i32_1 = arith.constant 0 : i32
    return %c0_i32, %c0_i32_0 : i32, i32
  }
  func.func @transform_11(%arg0: i32) -> (i32, i32) {
    %c0_i32 = arith.constant 0 : i32
    %c0_i32_0 = arith.constant 0 : i32
    %c0_i32_1 = arith.constant 0 : i32
    return %c0_i32, %c0_i32_0 : i32, i32
  }
  func.func @transform_12(%arg0: i32) -> (i32, i32) {
    %c0_i32 = arith.constant 0 : i32
    %c0_i32_0 = arith.constant 0 : i32
    %c0_i32_1 = arith.constant 0 : i32
    return %c0_i32, %c0_i32_0 : i32, i32
  }
  func.func @transform_13(%arg0: i32) -> (i32, i32) {
    %c0_i32 = arith.constant 0 : i32
    %c0_i32_0 = arith.constant 0 : i32
    %c0_i32_1 = arith.constant 0 : i32
    return %c0_i32, %c0_i32_0 : i32, i32
  }
  func.func @transform_14(%arg0: i32) -> (i32, i32) {
    %c0_i32 = arith.constant 0 : i32
    %c0_i32_0 = arith.constant 0 : i32
    %c0_i32_1 = arith.constant 0 : i32
    return %c0_i32, %c0_i32_0 : i32, i32
  }
  func.func @transform_15(%arg0: i32) -> (i32, i32) {
    %c0_i32 = arith.constant 0 : i32
    %c0_i32_0 = arith.constant 0 : i32
    %c0_i32_1 = arith.constant 0 : i32
    return %c0_i32, %c0_i32_0 : i32, i32
  }
  func.func @transform_16(%arg0: i32) -> (i32, i32) {
    %c0_i32 = arith.constant 0 : i32
    %c0_i32_0 = arith.constant 0 : i32
    %c0_i32_1 = arith.constant 0 : i32
    return %c0_i32, %c0_i32_0 : i32, i32
  }
  func.func @transform_17(%arg0: i32) -> (i32, i32) {
    %c0_i32 = arith.constant 0 : i32
    %c0_i32_0 = arith.constant 0 : i32
    %c0_i32_1 = arith.constant 0 : i32
    return %c0_i32, %c0_i32_0 : i32, i32
  }
  func.func @transform_18(%arg0: i32) -> (i32, i32, i32) {
    %c0_i32 = arith.constant 0 : i32
    %c0_i32_0 = arith.constant 0 : i32
    %c0_i32_1 = arith.constant 0 : i32
    return %arg0, %c0_i32, %c0_i32_0 : i32, i32, i32
  }
}

</mosaic_0001>

<bundles_post_ra>
// kernel: effinet_forward.1
= control target key start
LH: loop header
LB: loop body
LE: loop exit
PB: predicated region body
PF: predicated region fallthrough
CT: control target
= control target key end

     0   :  { %s5763_s0 = inlined_call_operand.vmem [shape: f32[2,16,16], index: 0, kind: input, shape index: {}]   ;;  %s5764_s1 = inlined_call_operand.vmem [shape: f32[3,64,16], index: 1, kind: input, shape index: {}]   ;;  %s5765_s2 = inlined_call_operand.vmem [shape: f32[3,64,16], index: 2, kind: input, shape index: {}]   ;;  %s5766_s3 = inlined_call_operand.vmem [shape: f32[9,64,64], index: 3, kind: input, shape index: {}]   ;;  %s5767_s4 = inlined_call_operand.vmem [shape: f32[8,64], index: 4, kind: input, shape index: {}]   ;;  %s5768_s5 = inlined_call_operand.vmem [shape: f32[9,8], index: 5, kind: input, shape index: {}]   ;;  %s5769_s6 = inlined_call_operand.vmem [shape: f32[1,8], index: 6, kind: input, shape index: {}]   ;;  %s5770_s7 = inlined_call_operand.vmem [shape: f32[8,32], index: 7, kind: input, shape index: {}]   ;;  %s5771_s8 = inlined_call_operand.vmem [shape: f32[1,32], index: 8, kind: input, shape index: {}]   ;;  %s5772_s9 = inlined_call_operand.vmem [shape: f32[9,32], index: 9, kind: input, shape index: {}]   ;;  %s5773_s10 = inlined_call_operand.vmem [shape: f32[32,2], index: 10, kind: input, shape index: {}]   ;;  %s5774_s11 = inlined_call_operand.vmem [shape: f32[1,2], index: 11, kind: input, shape index: {}]   ;;  %s5775_s12 = inlined_call_operand.vmem [shape: f32[2,32], index: 12, kind: input, shape index: {}]   ;;  %s5776_s13 = inlined_call_operand.vmem [shape: f32[1,32], index: 13, kind: input, shape index: {}]   ;;  %s5777_s14 = inlined_call_operand.vmem [shape: f32[32,16], index: 14, kind: input, shape index: {}]   ;;  %s5778_s15 = inlined_call_operand.vmem [shape: f32[1,16], index: 15, kind: input, shape index: {}]   ;;  %s5779_s16 = inlined_call_operand.vmem [shape: f32[16,32], index: 16, kind: input, shape index: {}]   ;;  %s5780_s17 = inlined_call_operand.vmem [shape: f32[1,32], index: 17, kind: input, shape index: {}]   ;;  %s5781_s18 = inlined_call_operand.hbm [shape: f32[2,8,32], index: 18, kind: output, shape index: {}]  }
   0x1   :  { %5794 = sst [smem:[#allocation11_spill]] %s5763_s0 }
   0x2   :  { %5795 = sst [smem:[#allocation12_spill]] %s5764_s1 }
   0x3   :  { %5796 = sst [smem:[#allocation13_spill]] %s5765_s2 }
   0x4   :  { %5797 = sst [smem:[#allocation14_spill]] %s5766_s3 }
   0x5   :  { %5798 = sst [smem:[#allocation15_spill]] %s5767_s4 }
   0x6   :  { %5799 = sst [smem:[#allocation16_spill]] %s5781_s18 }
   0x7   :  { %23 = vsyncpa [#allocation3], 0 }
   0x8   :  { %25 = vsyncpa [#allocation3 + $0x1], 0  ;;  %s3841_s27 = smov 0   ;;  %s3843_s28 = smov 0  }
   0x9   :  { %s3845_s29 = smov 0   ;;  %s3847_s30 = smov 0  }
   0xa LB: > { %5800 = sst [smem:[#allocation5_spill]] %s3731_s27  ;;  %s3862_s0 = sadd.s32 4294967295, %s3743_s30   ;;  %s3743_s30 = sphi %s3847_s30, %s5862_s30   ;;  %s3739_s29 = sphi %s3845_s29, %s5864_s29   ;;  %s3735_s28 = sphi %s3843_s28, %s5866_s28   ;;  %s3731_s27 = sphi %s3841_s27, %s5865_s27  }
   0xb   : > { %5801 = sst [smem:[#allocation6_spill]] %s3739_s29  ;;  %s3205_s19 = sadd.s32 4294967294, %s3743_s30  }
   0xc   : > { %5802 = sst [smem:[#allocation7_spill]] %s3743_s30  ;;  %s3866_s1 = sadd.s32 1, %s3743_s30  }
   0xd   : > { %5803 = sst [smem:[#allocation8_spill]] %s3866_s1  ;;  %s421_s20 = sadd.s32 1, %s3739_s29 }
   0xe   : > { %s418_s21 = ssub.s32 %s3743_s30, %s3866_s1  ;;  %p431_p0 = scmp.ne.s32.totalorder %s3739_s29, %s3735_s28 }
   0xf   : > { %p419_p1 = scmp.eq.s32.totalorder %s418_s21, 0  ;;  %p432_p2 = scmp.eq.s32.totalorder %s3862_s0, 1 }
  0x10   : > { %p437_p3 = scmp.ne.s32.totalorder %s3735_s28, %s3731_s27  ;;  %p438_p4 = scmp.eq.s32.totalorder %s3205_s19, 1 }
  0x11   : > { %s3877_s22 = scalar_select %p419_p1, %s3739_s29, %s421_s20  }
  0x12   : > { %p3879_p5 = por %p432_p2, %p431_p0  ;;  %p3883_p6 = por %p438_p4, %p437_p3 }
  0x13   : > { %5804 = sst [smem:[#allocation9_spill]] %s3877_s22  ;;  %p3208_p7 = scmp.ge.s32.totalorder %s3743_s30, 1 }
  0x14   : > { %s5806_s23 = scalar_select %p3883_p6, 1, 0 }
  0x15   : > { %p515_p8 = scmp.lt.s32.totalorder %s3743_s30, 3 }
  0x16   : > { %5807 = sst [smem:[#allocation10_spill]] %s5806_s23 }
  0x17   : > { %p516_p9 = pnand %p3208_p7, %p515_p8 }
  0x18   : > { %p569_p10 = scmp.lt.s32.totalorder (!%p516_p9), %s3862_s0, 1  ;;  %s5808_s20 = sld [smem:[#allocation11_spill]] (!%p516_p9) }
  0x19   : > { %519 = sbr.rel (%p516_p9) target bundleno = 1871 (0x74f), region = 92  ;;  %s5809_s1 = sld [smem:[#allocation12_spill]] (!%p516_p9) }
  0x1a   : > { %s5810_s30 = sld [smem:[#allocation13_spill]] (!%p516_p9)  ;;  %s3467_s18 = sshll.u32 (!%p516_p9), %s3862_s0, 3 }
  0x1b   : > { %s5826_s3 = sld [smem:[#allocation14_spill]] (!%p516_p9) }
  0x1c   : > { %s5855_s4 = sld [smem:[#allocation15_spill]] (!%p516_p9) }
  0x1d   : > { %s5857_s22 = sld [smem:[#allocation16_spill]] (!%p516_p9) }
  0x1e   : > { %s570_s24 = scalar_select %p569_p10, %s3862_s0, 1  ;;  %vm584_vm0 = vcmask 130048   ;;  %vm1451_vm5 = vcmask 64512  }
  0x1f   : > { %v576_v0 = vld [vmem:[%s5809_s1] sm:$0xff]  ;;  %v582_v1 = vld [vmem:[%s5809_s1 + $0x30] sm:$0xff]  ;;  %v583_v5 = vld [vmem:[%s5809_s1 + $0x38] sm:$0xff] }
  0x20   : > { %s3470_s25 = sshll.u32 %s570_s24, 4  ;;  %v3252_v4 = vld [vmem:[%s5809_s1 + $0x80] sm:$0xff]  ;;  %v577_v6 = vld [vmem:[%s5809_s1 + $0x8] sm:$0xff]  ;;  %v578_v9 = vld [vmem:[%s5809_s1 + $0x10] sm:$0xff]  ;;  %s5811_s23 = smov %s5810_s30 }
  0x21   : > { %s573_s21 = scalar_lea.vmem %s5808_s20, %s3470_s25  ;;  %v3253_v7 = vld [vmem:[%s5809_s1 + $0x88] sm:$0xff]  ;;  %v3236_v8 = vld [vmem:[%s5809_s1 + $0x40] sm:$0xff]  ;;  %v3254_v10 = vld [vmem:[%s5809_s1 + $0x90] sm:$0xff]  ;;  %s566_s20 = sand.u32 1, %s3735_s28  }
  0x22   : > { %v575_v2 = vld [vmem:[%s573_s21 + $0x8] sm:$0xff]  ;;  %v574_v3 = vld [vmem:[%s573_s21] sm:$0xff]  ;;  %v579_v12 = vld [vmem:[%s5809_s1 + $0x18] sm:$0xff]  ;;  %s3209_s21 = sshll.u32 %s566_s20, 3  ;;  %s3131_s26 = scalar_lea.sflag [#allocation3], %s566_s20 }
  0x23   : > { %623 = vmatpush.msra.mxu0 %v575_v2  ;;  %3471 = vmatpush.msra.mxu1 %v575_v2  ;;  %v3237_v11 = vld [vmem:[%s5809_s1 + $0x48] sm:$0xff]  ;;  %v3255_v13 = vld [vmem:[%s5809_s1 + $0x98] sm:$0xff]  ;;  %v3238_v14 = vld [vmem:[%s5809_s1 + $0x50] sm:$0xff]  ;;  %s568_s24 = scalar_lea.vmem [#allocation2], %s3209_s21 }
  0x24   : > { %1097 = vmatpush.msra.mxu2 %v575_v2  ;;  %v580_v15 = vld [vmem:[%s5809_s1 + $0x20] sm:$0xff]  ;;  %v3239_v17 = vld [vmem:[%s5809_s1 + $0x58] sm:$0xff]  ;;  %v3257_v18 = vld [vmem:[%s5809_s1 + $0xa8] sm:$0xff]  ;;  %s3143_s25 = sshll.u32 %s568_s24, 4  ;;  %s3144_s25 = int_to_ptr.vmem [resolvable:$true] %s3143_s25 }
  0x25   : > { %624 = vmatpush.msra.mxu0 %v574_v3  ;;  %3472 = vmatpush.msra.mxu1 %v574_v3  ;;  %v3256_v16 = vld [vmem:[%s5809_s1 + $0xa0] sm:$0xff]  ;;  %v581_v20 = vld [vmem:[%s5809_s1 + $0x28] sm:$0xff]  ;;  %v3258_v21 = vld [vmem:[%s5809_s1 + $0xb0] sm:$0xff] }
  0x26   : > { %3212 = vmatmul.msk.f32.vlgmr.msra.gmra.mxu0 %vm584_vm0, %v576_v0  ;;  %3218 = vmatmul.msk.f32.vlgmr.msra.gmra.mxu1 %vm584_vm0, %v582_v1  ;;  %v3240_v19 = vld [vmem:[%s5809_s1 + $0x60] sm:$0xff]  ;;  %v3241_v22 = vld [vmem:[%s5809_s1 + $0x68] sm:$0xff]  ;;  %v3242_v23 = vld [vmem:[%s5809_s1 + $0x70] sm:$0xff] }
  0x27   : > { %1098 = vmatpush.msra.mxu2 %v574_v3  ;;  %873 = vmatpush.msrb.mxu1 %v575_v2  ;;  %v3984_v24 = vld [vmem:[%s5810_s30 + $0x30] sm:$0xff]  ;;  %v3228_v25 = vld [vmem:[%s5811_s23 + $0x80] sm:$0xff]  ;;  %v3243_v46 = vld [vmem:[%s5809_s1 + $0x78] sm:$0xff]  ;;  %s3141_s30 = scalar_lea.hbm %s5857_s22, %s3467_s18  ;;  %s3701_s18 = scalar_lea.hbm %s5857_s22, 16 }
  0x28   : > { %3260 = vmatmul.msk.f32.vlgmr.msra.gmra.mxu2 %vm584_vm0, %v3252_v4  ;;  %v650_v26 = vld [vmem:[%s5811_s23] sm:$0xff]  ;;  %v4000_v35 = vld [vmem:[%s5811_s23 + $0xb0] sm:$0xff]  ;;  %v4023_v47 = vld [vmem:[%s5811_s23 + $0x88] sm:$0xff] }
  0x29   : > { %874 = vmatpush.msrb.mxu1 %v574_v3  ;;  %v4005_v36 = vld [vmem:[%s5811_s23 + $0x40] sm:$0xff]  ;;  %v4015_v45 = vld [vmem:[%s5811_s23 + $0x70] sm:$0xff]  ;;  %v651_v57 = vld [vmem:[%s5811_s23 + $0x8] sm:$0xff] }
  0x2a   : > { %v3259_v60 = vld [vmem:[%s5809_s1 + $0xb8] sm:$0xff]  ;;  %v3221_v2 = vld [vmem:[%s5811_s23 + $0x48] sm:$0xff]  ;;  %s3145_s1 = sshll.u32 %s3141_s30, 4  ;;  %s3146_s1 = int_to_ptr.hbm [resolvable:$true] %s3145_s1 }
  0x2b   : > { %s3695_s19 = sshra.s32 %s3146_s1, 4  ;;  %s3696_s19 = int_to_ptr.hbm [resolvable:$true] %s3695_s19 }
  0x2c   : > { %p3702_p0 = scmp.lt.s32.totalorder %s3696_s19, %s5857_s22 }
  0x2e   : > { %3219 = vmatmul.msk.f32.gmra.mxu1 %vm584_vm0, %v583_v5  ;;  %3213 = vmatmul.msk.f32.gmra.mxu0 %vm584_vm0, %v577_v6  ;;  %v4055_v6 = vld [vmem:[%s5811_s23 + $0x90] sm:$0xff] }
  0x30   : > { %3261 = vmatmul.msk.f32.gmra.mxu2 %vm584_vm0, %v3253_v7 }
  0x36   : > { %3244 = vmatmul.msk.f32.vlgmr.msrb.gmra.mxu1 %vm584_vm0, %v3236_v8  ;;  %3214 = vmatmul.msk.f32.gmra.mxu0 %vm584_vm0, %v578_v9 }
  0x38   : > { %3262 = vmatmul.msk.f32.gmra.mxu2 %vm584_vm0, %v3254_v10  ;;  %v4063_v10 = vld [vmem:[%s5811_s23 + $0x38] sm:$0xff] }
  0x3e   : > { %3245 = vmatmul.msk.f32.gmra.mxu1 %vm584_vm0, %v3237_v11  ;;  %3215 = vmatmul.msk.f32.gmra.mxu0 %vm584_vm0, %v579_v12  ;;  %v4070_v12 = vld [vmem:[%s5811_s23 + $0x78] sm:$0xff] }
  0x40   : > { %3263 = vmatmul.msk.f32.gmra.mxu2 %vm584_vm0, %v3255_v13 }
  0x46   : > { %3246 = vmatmul.msk.f32.gmra.mxu1 %vm584_vm0, %v3238_v14  ;;  %3216 = vmatmul.msk.f32.gmra.mxu0 %vm584_vm0, %v580_v15 }
  0x48   : > { %3264 = vmatmul.msk.f32.gmra.mxu2 %vm584_vm0, %v3256_v16 }
  0x4e   : > { %3247 = vmatmul.msk.f32.gmra.mxu1 %vm584_vm0, %v3239_v17  ;;  %3217 = vmatmul.msk.f32.gmra.mxu0 %vm584_vm0, %v581_v20 }
  0x50   : > { %3265 = vmatmul.msk.f32.gmra.mxu2 %vm584_vm0, %v3257_v18 }
  0x56   : > { %3248 = vmatmul.msk.f32.gmra.mxu1 %vm584_vm0, %v3240_v19  ;;  %v4080_v19 = vld [vmem:[%s5811_s23 + $0xb8] sm:$0xff] }
  0x58   : > { %3266 = vmatmul.msk.f32.gmra.mxu2 %vm584_vm0, %v3258_v21 }
  0x5e   : > { %3249 = vmatmul.msk.f32.gmra.mxu1 %vm584_vm0, %v3241_v22 }
  0x60   : > { %3267 = vmatmul.msk.f32.gmra.mxu2 %vm584_vm0, %v3259_v60  ;;  %v4125_v60 = vld [vmem:[%s5811_s23 + $0xa0] sm:$0xff] }
  0x66   : > { %3250 = vmatmul.msk.f32.gmra.mxu1 %vm584_vm0, %v3242_v23 }
  0x6e   : > { %3251 = vmatmul.msk.f32.gmra.mxu1 %vm584_vm0, %v3243_v46 }
  0xa3   : > { %v626_v27 = vpop.f32.mrf.mxu0  ;;  %v644_v28 = vpop.f32.mrf.mxu1 }
  0xa4   : > { %v664_v29 = vmul.f32 %v3984_v24, %v644_v28  ;;  %v776_v30 = vmul.f32 %v3228_v25, %v626_v27  ;;  %v658_v31 = vmul.f32 %v650_v26, %v626_v27  ;;  %v782_v37 = vmul.f32 %v4000_v35, %v644_v28 }
  0xa5   : > { %v717_v39 = vmul.f32 %v4005_v36, %v626_v27  ;;  %v723_v50 = vmul.f32 %v4015_v45, %v644_v28  ;;  %v3222_v28 = vld [vmem:[%s5811_s23 + $0x50] sm:$0xff] }
  0xa6   : > { %v684_v32 = vsel %vm584_vm0, %v664_v29, 0.0  ;;  %v784_v33 = vsel %vm584_vm0, %v776_v30, 0.0  ;;  %v666_v34 = vsel %vm584_vm0, %v658_v31, 0.0  ;;  %v802_v42 = vsel %vm584_vm0, %v782_v37, 0.0 }
  0xa7   : > { %685 = vadd.xlane.f32.xlu2 %v684_v32  ;;  %785 = vadd.xlane.f32.xlu1 %v784_v33  ;;  %v725_v44 = vsel %vm584_vm0, %v717_v39, 0.0  ;;  %v743_v56 = vsel %vm584_vm0, %v723_v50, 0.0 }
  0xa8   : > { %667 = vadd.xlane.f32.xlu0 %v666_v34  ;;  %v4096_v34 = vld [vmem:[%s5811_s23 + $0x98] sm:$0xff] }
  0xab   : > { %v1100_v38 = vpop.f32.mrf.mxu2  ;;  %v647_v40 = vpop.f32.mrf.mxu1 }
  0xac   : > { %v1224_v41 = vmul.f32 %v3228_v25, %v1100_v38  ;;  %v1174_v48 = vmul.f32 %v4005_v36, %v1100_v38  ;;  %v629_v52 = vpop.f32.mrf.mxu0  ;;  %v1124_v61 = vmul.f32 %v1100_v38, %v650_v26  ;;  %v665_v13 = vmul.f32 %v4063_v10, %v647_v40 }
  0xad   : > { %v659_v59 = vmul.f32 %v651_v57, %v629_v52  ;;  %v777_v3 = vmul.f32 %v4023_v47, %v629_v52  ;;  %v718_v4 = vmul.f32 %v3221_v2, %v629_v52  ;;  %v724_v14 = vmul.f32 %v4070_v12, %v647_v40 }
  0xae   : > { %v1232_v43 = vsel %vm584_vm0, %v1224_v41, 0.0  ;;  %v1182_v54 = vsel %vm584_vm0, %v1174_v48, 0.0  ;;  %v1132_v0 = vsel %vm584_vm0, %v1124_v61, 0.0  ;;  %v687_v17 = vsel %vm584_vm0, %v665_v13, 0.0 }
  0xaf   : > { %803 = vadd.xlane.f32.xlu2 %v802_v42  ;;  %1233 = vadd.xlane.f32.xlu1 %v1232_v43  ;;  %v669_v63 = vsel %vm584_vm0, %v659_v59, 0.0  ;;  %v787_v8 = vsel %vm584_vm0, %v777_v3, 0.0  ;;  %v728_v9 = vsel %vm584_vm0, %v718_v4, 0.0  ;;  %v746_v18 = vsel %vm584_vm0, %v724_v14, 0.0 }
  0xb0   : > { %726 = vadd.xlane.f32.xlu0 %v725_v44  ;;  %v783_v21 = vmul.f32 %v4080_v19, %v647_v40  ;;  %v652_v40 = vld [vmem:[%s5811_s23 + $0x10] sm:$0xff] }
  0xb3   : > { %v1103_v49 = vpop.f32.mrf.mxu2  ;;  %v4029_v53 = vpop.f32.mrf.mxu1 }
  0xb4   : > { %v1225_v51 = vmul.f32 %v4023_v47, %v1103_v49  ;;  %v900_v58 = vmul.f32 %v4029_v53, %v650_v26  ;;  %v1000_v1 = vmul.f32 %v3228_v25, %v4029_v53  ;;  %v1125_v22 = vmul.f32 %v1103_v49, %v651_v57  ;;  %v632_v26 = vpop.f32.mrf.mxu0 }
  0xb5   : > { %v805_v25 = vsel %vm584_vm0, %v783_v21, 0.0  ;;  %v719_v29 = vmul.f32 %v3222_v28, %v632_v26  ;;  %v1175_v31 = vmul.f32 %v3221_v2, %v1103_v49  ;;  %v950_v41 = vmul.f32 %v4005_v36, %v4029_v53 }
  0xb6   : > { %v1235_v55 = vsel %vm584_vm0, %v1225_v51, 0.0  ;;  %v908_v62 = vsel %vm584_vm0, %v900_v58, 0.0  ;;  %v1008_v7 = vsel %vm584_vm0, %v1000_v1, 0.0  ;;  %v1135_v27 = vsel %vm584_vm0, %v1125_v22, 0.0 }
  0xb7   : > { %1183 = vadd.xlane.f32.xlu2 %v1182_v54  ;;  %1236 = vadd.xlane.f32.xlu1 %v1235_v55  ;;  %v731_v32 = vsel %vm584_vm0, %v719_v29, 0.0  ;;  %v1185_v38 = vsel %vm584_vm0, %v1175_v31, 0.0  ;;  %v958_v46 = vsel %vm584_vm0, %v950_v41, 0.0  ;;  %v660_v49 = vmul.f32 %v652_v40, %v632_v26  ;;  %v3223_v54 = vld [vmem:[%s5811_s23 + $0x58] sm:$0xff] }
  0xb8   : > { %744 = vadd.xlane.f32.xlu0 %v743_v56 }
  0xb9   : > { %v672_v52 = vsel %vm584_vm0, %v660_v49, 0.0 }
  0xbb   : > { %v4050_v5 = vpop.f32.mrf.mxu2  ;;  %v879_v16 = vpop.f32.mrf.mxu1 }
  0xbc   : > { %v1226_v11 = vmul.f32 %v4055_v6, %v4050_v5  ;;  %v901_v20 = vmul.f32 %v879_v16, %v651_v57  ;;  %v1001_v30 = vmul.f32 %v4023_v47, %v879_v16  ;;  %v1126_v42 = vmul.f32 %v4050_v5, %v652_v40  ;;  %v635_v36 = vpop.f32.mrf.mxu0 }
  0xbd   : > { %v951_v50 = vmul.f32 %v3221_v2, %v879_v16  ;;  %v720_v55 = vmul.f32 %v3223_v54, %v635_v36  ;;  %v778_v57 = vmul.f32 %v4055_v6, %v632_v26  ;;  %v1176_v1 = vmul.f32 %v3222_v28, %v4050_v5  ;;  %v4145_v16 = vld [vmem:[%s5811_s23 + $0x60] sm:$0xff] }
  0xbe   : > { %v1238_v15 = vsel %vm584_vm0, %v1226_v11, 0.0  ;;  %v911_v23 = vsel %vm584_vm0, %v901_v20, 0.0  ;;  %v1011_v37 = vsel %vm584_vm0, %v1001_v30, 0.0  ;;  %v1138_v47 = vsel %vm584_vm0, %v1126_v42, 0.0 }
  0xbf   : > { %909 = vadd.xlane.f32.xlu1 %v908_v62  ;;  %670 = vadd.xlane.f32.xlu2 %v669_v63  ;;  %v961_v53 = vsel %vm584_vm0, %v951_v50, 0.0  ;;  %v734_v58 = vsel %vm584_vm0, %v720_v55, 0.0  ;;  %v790_v62 = vsel %vm584_vm0, %v778_v57, 0.0  ;;  %v779_v20 = vmul.f32 %v4096_v34, %v635_v36 }
  0xc0   : > { %1133 = vadd.xlane.f32.xlu0 %v1132_v0  ;;  %v653_v0 = vld [vmem:[%s5811_s23 + $0x18] sm:$0xff] }
  0xc1   : > { %v793_v26 = vsel %vm584_vm0, %v779_v20, 0.0 }
  0xc3   : > { %v4091_v33 = vpop.f32.mrf.mxu2  ;;  %v882_v44 = vpop.f32.mrf.mxu1 }
  0xc4   : > { %v1227_v39 = vmul.f32 %v4096_v34, %v4091_v33  ;;  %v902_v48 = vmul.f32 %v882_v44, %v652_v40  ;;  %v1002_v56 = vmul.f32 %v4055_v6, %v882_v44  ;;  %v1127_v2 = vmul.f32 %v4091_v33, %v653_v0  ;;  %v638_v5 = vpop.f32.mrf.mxu0 }
  0xc5   : > { %v1188_v6 = vsel %vm584_vm0, %v1176_v1, 0.0  ;;  %v952_v11 = vmul.f32 %v3222_v28, %v882_v44  ;;  %v654_v28 = vld [vmem:[%s5811_s23 + $0x20] sm:$0xff]  ;;  %v1177_v29 = vmul.f32 %v3223_v54, %v4091_v33 }
  0xc6   : > { %v1241_v43 = vsel %vm584_vm0, %v1227_v39, 0.0  ;;  %v914_v51 = vsel %vm584_vm0, %v902_v48, 0.0  ;;  %v1014_v61 = vsel %vm584_vm0, %v1002_v56, 0.0  ;;  %v662_v41 = vmul.f32 %v654_v28, %v638_v5  ;;  %v4180_v48 = vld [vmem:[%s5811_s23 + $0x68] sm:$0xff] }
  0xc7   : > { %1009 = vadd.xlane.f32.xlu1 %v1008_v7  ;;  %788 = vadd.xlane.f32.xlu2 %v787_v8  ;;  %v1141_v7 = vsel %vm584_vm0, %v1127_v2, 0.0 }
  0xc8   : > { %729 = vadd.xlane.f32.xlu0 %v728_v9  ;;  %v661_v9 = vmul.f32 %v653_v0, %v635_v36  ;;  %v678_v44 = vsel %vm584_vm0, %v662_v41, 0.0  ;;  %v780_v36 = vmul.f32 %v4125_v60, %v638_v5 }
  0xca   : > { %v675_v14 = vsel %vm584_vm0, %v661_v9, 0.0  ;;  %v796_v57 = vsel %vm584_vm0, %v780_v36, 0.0 }
  0xcb   : > { %v4120_v59 = vpop.f32.mrf.mxu2  ;;  %v885_v4 = vpop.f32.mrf.mxu1 }
  0xcc   : > { %v1228_v63 = vmul.f32 %v4125_v60, %v4120_v59  ;;  %v903_v8 = vmul.f32 %v885_v4, %v653_v0  ;;  %v1128_v30 = vmul.f32 %v4120_v59, %v654_v28  ;;  %v953_v33 = vmul.f32 %v3223_v54, %v885_v4 }
  0xcd   : > { %v1178_v1 = vmul.f32 %v4145_v16, %v4120_v59 }
  0xce   : > { %v1244_v3 = vsel %vm584_vm0, %v1228_v63, 0.0  ;;  %v917_v13 = vsel %vm584_vm0, %v903_v8, 0.0 }
  0xcf   : > { %1239 = vadd.xlane.f32.xlu1 %v1238_v15  ;;  %688 = vadd.xlane.f32.xlu2 %v687_v17  ;;  %v964_v15 = vsel %vm584_vm0, %v952_v11, 0.0  ;;  %v721_v17 = vmul.f32 %v4145_v16, %v638_v5  ;;  %v1194_v59 = vsel %vm584_vm0, %v1178_v1, 0.0 }
  0xd0   : > { %747 = vadd.xlane.f32.xlu0 %v746_v18  ;;  %v1003_v18 = vmul.f32 %v4096_v34, %v885_v4  ;;  %v1191_v34 = vsel %vm584_vm0, %v1177_v29, 0.0 }
  0xd1   : > { %v737_v21 = vsel %vm584_vm0, %v721_v17, 0.0 }
  0xd3   : > { %v4151_v22 = vpop.f32.mrf.mxu2 }
  0xd7   : > { %912 = vadd.xlane.f32.xlu1 %v911_v23  ;;  %806 = vadd.xlane.f32.xlu2 %v805_v25  ;;  %v4156_v23 = vld [vmem:[%s5811_s23 + $0xa8] sm:$0xff]  ;;  %v1017_v25 = vsel %vm584_vm0, %v1003_v18, 0.0 }
  0xd8   : > { %1136 = vadd.xlane.f32.xlu0 %v1135_v27  ;;  %v1229_v27 = vmul.f32 %v4156_v23, %v4151_v22 }
  0xda   : > { %v1247_v31 = vsel %vm584_vm0, %v1229_v27, 0.0 }
  0xdb   : > { %v4190_v55 = vpop.f32.mrf.mxu2 }
  0xdf   : > { %1012 = vadd.xlane.f32.xlu1 %v1011_v37  ;;  %1186 = vadd.xlane.f32.xlu2 %v1185_v38  ;;  %v1144_v37 = vsel %vm584_vm0, %v1128_v30, 0.0 }
  0xe0   : > { %732 = vadd.xlane.f32.xlu0 %v731_v32  ;;  %v888_v32 = vpop.f32.mrf.mxu1 }
  0xe1   : > { %v904_v38 = vmul.f32 %v888_v32, %v654_v28 }
  0xe7   : > { %1242 = vadd.xlane.f32.xlu1 %v1241_v43  ;;  %959 = vadd.xlane.f32.xlu2 %v958_v46  ;;  %v920_v43 = vsel %vm584_vm0, %v904_v38, 0.0  ;;  %v641_v46 = vpop.f32.mrf.mxu0 }
  0xe8   : > { %1139 = vadd.xlane.f32.xlu0 %v1138_v47  ;;  %v967_v47 = vsel %vm584_vm0, %v953_v33, 0.0  ;;  %v722_v49 = vmul.f32 %v4180_v48, %v641_v46  ;;  %v891_v9 = vpop.f32.mrf.mxu1 }
  0xea   : > { %v740_v54 = vsel %vm584_vm0, %v722_v49, 0.0  ;;  %v955_v49 = vmul.f32 %v4180_v48, %v891_v9 }
  0xef   : > { %915 = vadd.xlane.f32.xlu1 %v914_v51  ;;  %673 = vadd.xlane.f32.xlu2 %v672_v52  ;;  %v1004_v52 = vmul.f32 %v4125_v60, %v888_v32  ;;  %v655_v60 = vld [vmem:[%s5811_s23 + $0x28] sm:$0xff] }
  0xf0   : > { %962 = vadd.xlane.f32.xlu0 %v961_v53  ;;  %v905_v5 = vmul.f32 %v891_v9, %v655_v60  ;;  %v663_v20 = vmul.f32 %v655_v60, %v641_v46 }
  0xf1   : > { %v1020_v56 = vsel %vm584_vm0, %v1004_v52, 0.0 }
  0xf2   : > { %v681_v27 = vsel %vm584_vm0, %v663_v20, 0.0 }
  0xf7   : > { %1015 = vadd.xlane.f32.xlu1 %v1014_v61  ;;  %791 = vadd.xlane.f32.xlu2 %v790_v62  ;;  %v4202_v61 = vld [vmem:[%s5768_s5] ss:$0 sm:$0xff]  ;;  %v4207_v62 = vld [vmem:[%s5768_s5 + $0x1] ss:$0 sm:$0xff] }
  0xf8   : > { %735 = vadd.xlane.f32.xlu0 %v734_v58  ;;  %v1230_v58 = vmul.f32 %v4000_v35, %v4190_v55 }
  0xfa   : > { %v1250_v8 = vsel %vm584_vm0, %v1230_v58, 0.0  ;;  %v1180_v58 = vmul.f32 %v4015_v45, %v4190_v55 }
  0xff   : > { %1245 = vadd.xlane.f32.xlu1 %v1244_v3  ;;  %1189 = vadd.xlane.f32.xlu2 %v1188_v6  ;;  %v1129_v3 = vmul.f32 %v4151_v22, %v655_v60  ;;  %v4220_v6 = vld [vmem:[%s5768_s5 + $0x2] ss:$0 sm:$0xff] }
 0x100   : > { %1142 = vadd.xlane.f32.xlu0 %v1141_v7 }
 0x107   : > { %918 = vadd.xlane.f32.xlu1 %v917_v13  ;;  %676 = vadd.xlane.f32.xlu2 %v675_v14  ;;  %v1147_v14 = vsel %vm584_vm0, %v1129_v3, 0.0 }
 0x108   : > { %965 = vadd.xlane.f32.xlu0 %v964_v15 }
 0x10f   : > { %1018 = vadd.xlane.f32.xlu1 %v1017_v25  ;;  %794 = vadd.xlane.f32.xlu2 %v793_v26  ;;  %v954_v25 = vmul.f32 %v4145_v16, %v888_v32  ;;  %v923_v26 = vsel %vm584_vm0, %v905_v5, 0.0  ;;  %v1130_v16 = vmul.f32 %v4190_v55, %v3984_v24  ;;  %v894_v32 = vpop.f32.mrf.mxu1 }
 0x110   : > { %738 = vadd.xlane.f32.xlu0 %v737_v21  ;;  %v906_v33 = vmul.f32 %v894_v32, %v3984_v24  ;;  %v973_v24 = vsel %vm584_vm0, %v955_v49, 0.0  ;;  %v956_v1 = vmul.f32 %v4015_v45, %v894_v32 }
 0x111   : > { %v970_v28 = vsel %vm584_vm0, %v954_v25, 0.0  ;;  %v1150_v41 = vsel %vm584_vm0, %v1130_v16, 0.0 }
 0x112   : > { %v926_v52 = vsel %vm584_vm0, %v906_v33, 0.0 }
 0x117   : > { %1248 = vadd.xlane.f32.xlu1 %v1247_v31  ;;  %1192 = vadd.xlane.f32.xlu2 %v1191_v34  ;;  %v1005_v31 = vmul.f32 %v4156_v23, %v891_v9  ;;  %v781_v34 = vmul.f32 %v4156_v23, %v641_v46  ;;  %v897_v3 = vpop.f32.mrf.mxu1 }
 0x118   : > { %1145 = vadd.xlane.f32.xlu0 %v1144_v37  ;;  %v1007_v55 = vmul.f32 %v4080_v19, %v897_v3  ;;  %v957_v45 = vmul.f32 %v4070_v12, %v897_v3 }
 0x119   : > { %v1023_v38 = vsel %vm584_vm0, %v1005_v31, 0.0  ;;  %v4301_v31 = vld [vmem:[%s5768_s5 + $0x4] ss:$0 sm:$0xff] }
 0x11a   : > { %v686_v39 = vpop.xlane.xlu2 %685  ;;  %v4170_v40 = vpop.xlane.xlu1 %785  ;;  %v1029_v25 = vsel %vm584_vm0, %v1007_v55, 0.0 }
 0x11b   : > { %v4172_v42 = vpop.xlane.xlu0 %667  ;;  %v698_v4 = vmul.f32 %v4202_v61, %v686_v39  ;;  %v799_v39 = vsel %vm584_vm0, %v781_v34, 0.0 }
 0x11f   : > { %921 = vadd.xlane.f32.xlu1 %v920_v43  ;;  %679 = vadd.xlane.f32.xlu2 %v678_v44  ;;  %v1179_v44 = vmul.f32 %v4180_v48, %v4151_v22  ;;  %v1006_v22 = vmul.f32 %v4000_v35, %v894_v32  ;;  %v907_v35 = vmul.f32 %v897_v3, %v4063_v10 }
 0x120   : > { %968 = vadd.xlane.f32.xlu0 %v967_v47 }
 0x121   : > { %v929_v20 = vsel %vm584_vm0, %v907_v35, 0.0 }
 0x122   : > { %v804_v50 = vpop.xlane.xlu2 %803  ;;  %v4183_v51 = vpop.xlane.xlu1 %1233 }
 0x123   : > { %v4187_v53 = vpop.xlane.xlu0 %726  ;;  %v816_v11 = vmul.f32 %v4220_v6, %v804_v50 }
 0x124   : > { %v751_v9 = vmul.f32 %v4207_v62, %v4187_v53 }
 0x127   : > { %1021 = vadd.xlane.f32.xlu1 %v1020_v56  ;;  %797 = vadd.xlane.f32.xlu2 %v796_v57 }
 0x128   : > { %741 = vadd.xlane.f32.xlu0 %v740_v54  ;;  %v1197_v54 = vsel %vm584_vm0, %v1179_v44, 0.0 }
 0x12a   : > { %v4209_v63 = vpop.xlane.xlu2 %1183  ;;  %v4211_v0 = vpop.xlane.xlu1 %1236 }
 0x12b   : > { %v745_v2 = vpop.xlane.xlu0 %744 }
 0x12c   : > { %v757_v7 = vmul.f32 %v4207_v62, %v745_v2 }
 0x12e   : > { %v765_v13 = vadd.f32 %v757_v7, %v698_v4  ;;  %v1026_v4 = vsel %vm584_vm0, %v1006_v22, 0.0  ;;  %v1200_v7 = vsel %vm584_vm0, %v1180_v58, 0.0 }
 0x12f   : > { %1251 = vadd.xlane.f32.xlu1 %v1250_v8  ;;  %1195 = vadd.xlane.f32.xlu2 %v1194_v59  ;;  %v976_v8 = vsel %vm584_vm0, %v956_v1, 0.0  ;;  %v692_v59 = vmul.f32 %v4202_v61, %v4172_v42 }
 0x130   : > { %1148 = vadd.xlane.f32.xlu0 %v1147_v14  ;;  %v4227_v15 = vadd.f32 %v816_v11, %v765_v13  ;;  %v4287_v14 = vld [vmem:[%s5768_s5 + $0x3] ss:$0 sm:$0xff] }
 0x131   : > { %v759_v53 = vadd.f32 %v751_v9, %v692_v59 }
 0x132   : > { %v4229_v17 = vpop.xlane.xlu1 %909  ;;  %v4231_v18 = vpop.xlane.xlu2 %670 }
 0x133   : > { %v4233_v21 = vpop.xlane.xlu0 %1133  ;;  %v934_v42 = vmul.f32 %v4287_v14, %v4229_v17  ;;  %v693_v44 = vmul.f32 %v4202_v61, %v4231_v18  ;;  %v4338_v18 = vld [vmem:[%s5768_s5 + $0x8] ss:$0 sm:$0xff] }
 0x134   : > { %v1258_v3 = vmul.f32 %v4338_v18, %v4183_v51 }
 0x137   : > { %924 = vadd.xlane.f32.xlu1 %v923_v26  ;;  %682 = vadd.xlane.f32.xlu2 %v681_v27  ;;  %v979_v26 = vsel %vm584_vm0, %v957_v45, 0.0  ;;  %v1121_v27 = vpop.f32.mrf.mxu2 }
 0x138   : > { %971 = vadd.xlane.f32.xlu0 %v970_v28  ;;  %v810_v28 = vmul.f32 %v4220_v6, %v4170_v40  ;;  %v1181_v34 = vmul.f32 %v4070_v12, %v1121_v27  ;;  %v1231_v16 = vmul.f32 %v4080_v19, %v1121_v27  ;;  %v4308_v40 = vld [vmem:[%s5768_s5 + $0x5] ss:$0 sm:$0xff]  ;;  %v1131_v17 = vmul.f32 %v1121_v27, %v4063_v10  ;;  %v4318_v12 = vld [vmem:[%s5768_s5 + $0x6] ss:$0 sm:$0xff] }
 0x13a   : > { %v4239_v29 = vpop.xlane.xlu1 %1009  ;;  %v4241_v30 = vpop.xlane.xlu2 %788  ;;  %v818_v32 = vadd.f32 %v810_v28, %v759_v53  ;;  %v1203_v10 = vsel %vm584_vm0, %v1181_v34, 0.0 }
 0x13b   : > { %v4245_v37 = vpop.xlane.xlu0 %729 }
 0x13c   : > { %v942_v33 = vadd.f32 %v934_v42, %v818_v32 }
 0x13f   : > { %1024 = vadd.xlane.f32.xlu1 %v1023_v38  ;;  %800 = vadd.xlane.f32.xlu2 %v799_v39  ;;  %v752_v38 = vmul.f32 %v4207_v62, %v4245_v37  ;;  %v1253_v37 = vsel %vm584_vm0, %v1231_v16, 0.0 }
 0x140   : > { %1151 = vadd.xlane.f32.xlu0 %v1150_v41 }
 0x142   : > { %v4253_v43 = vpop.xlane.xlu1 %1239  ;;  %v689_v23 = vpop.xlane.xlu2 %688 }
 0x143   : > { %v748_v46 = vpop.xlane.xlu0 %747  ;;  %v699_v47 = vmul.f32 %v4202_v61, %v689_v23 }
 0x144   : > { %v758_v50 = vmul.f32 %v4207_v62, %v748_v46  ;;  %v4330_v46 = vld [vmem:[%s5768_s5 + $0x7] ss:$0 sm:$0xff] }
 0x146   : > { %v766_v36 = vadd.f32 %v758_v50, %v699_v47  ;;  %v1034_v47 = vmul.f32 %v4308_v40, %v4239_v29  ;;  %v1153_v50 = vsel %vm584_vm0, %v1131_v17, 0.0 }
 0x147   : > { %927 = vadd.xlane.f32.xlu1 %v926_v52  ;;  %1198 = vadd.xlane.f32.xlu2 %v1197_v54  ;;  %v760_v52 = vadd.f32 %v752_v38, %v693_v44 }
 0x148   : > { %974 = vadd.xlane.f32.xlu0 %v973_v24  ;;  %v811_v24 = vmul.f32 %v4220_v6, %v4241_v30 }
 0x14a   : > { %v913_v56 = vpop.xlane.xlu1 %912  ;;  %v807_v57 = vpop.xlane.xlu2 %806  ;;  %v819_v58 = vadd.f32 %v811_v24, %v760_v52 }
 0x14b   : > { %v4266_v48 = vpop.xlane.xlu0 %1136  ;;  %v817_v60 = vmul.f32 %v4220_v6, %v807_v57  ;;  %v935_v29 = vmul.f32 %v4287_v14, %v913_v56  ;;  %v1208_v57 = vmul.f32 %v4330_v46, %v4209_v63  ;;  %v1446_v63 = vld [vmem:[%s5770_s7] sm:$0xff] }
 0x14c   : > { %1491 = vmatpush.msra.mxu3 %v1446_v63  ;;  %v1159_v9 = vmul.f32 %v4318_v12, %v4266_v48 }
 0x14d   : > { %v4270_v2 = vadd.f32 %v817_v60, %v766_v36  ;;  %v1158_v36 = vmul.f32 %v4318_v12, %v4233_v21  ;;  %v943_v30 = vadd.f32 %v935_v29, %v819_v58 }
 0x14f   : > { %1027 = vadd.xlane.f32.xlu1 %v1026_v4  ;;  %1201 = vadd.xlane.f32.xlu2 %v1200_v7  ;;  %v4352_v7 = vld [vmem:[%s5769_s6] ss:$0 sm:$0xff] }
 0x150   : > { %977 = vadd.xlane.f32.xlu0 %v976_v8 }
 0x152   : > { %v1013_v11 = vpop.xlane.xlu1 %1012  ;;  %v4280_v13 = vpop.xlane.xlu2 %1186 }
 0x153   : > { %v4289_v5 = vpop.xlane.xlu0 %732  ;;  %v1035_v35 = vmul.f32 %v4308_v40, %v1013_v11  ;;  %v1259_v11 = vmul.f32 %v4338_v18, %v4211_v0 }
 0x157   : > { %930 = vadd.xlane.f32.xlu1 %v929_v20  ;;  %1030 = vadd.xlane.f32.xlu2 %v1029_v25  ;;  %v1209_v20 = vmul.f32 %v4330_v46, %v4280_v13 }
 0x158   : > { %980 = vadd.xlane.f32.xlu0 %v979_v26 }
 0x15a   : > { %v4313_v39 = vpop.xlane.xlu1 %1242  ;;  %v960_v41 = vpop.xlane.xlu2 %959 }
 0x15b   : > { %v984_v19 = vmul.f32 %v4301_v31, %v960_v41  ;;  %v4321_v23 = vpop.xlane.xlu0 %1139 }
 0x15d   : > { %v992_v49 = vadd.f32 %v984_v19, %v942_v33  ;;  %v753_v33 = vmul.f32 %v4207_v62, %v4289_v5 }
 0x15f   : > { %v1042_v54 = vadd.f32 %v1034_v47, %v992_v49  ;;  %1204 = vadd.xlane.f32.xlu1 %v1203_v10  ;;  %1254 = vadd.xlane.f32.xlu2 %v1253_v37 }
 0x160   : > { %1154 = vadd.xlane.f32.xlu0 %v1153_v50 }
 0x161   : > { %v1166_v22 = vadd.f32 %v1158_v36, %v1042_v54 }
 0x162   : > { %v916_v60 = vpop.xlane.xlu1 %915  ;;  %v674_v1 = vpop.xlane.xlu2 %673 }
 0x163   : > { %v1216_v21 = vadd.f32 %v1208_v57, %v1166_v22  ;;  %v963_v4 = vpop.xlane.xlu0 %962  ;;  %v694_v16 = vmul.f32 %v4202_v61, %v674_v1  ;;  %v936_v37 = vmul.f32 %v4287_v14, %v916_v60  ;;  %v1160_v60 = vmul.f32 %v4318_v12, %v4321_v23 }
 0x164   : > { %v985_v56 = vmul.f32 %v4301_v31, %v963_v4 }
 0x165   : > { %v1266_v8 = vadd.f32 %v1258_v3, %v1216_v21  ;;  %v761_v19 = vadd.f32 %v753_v33, %v694_v16 }
 0x166   : > { %v993_v55 = vadd.f32 %v985_v56, %v943_v30 }
 0x167   : > { %v4360_v51 = vadd.f32 %v4352_v7, %v1266_v8 }
 0x168   : > { %v1043_v45 = vadd.f32 %v1035_v35, %v993_v55 }
 0x169   : > { %v3268_v59 = vmul.f32 -1.442695, %v4360_v51 }
 0x16a   : > { %v1167_v25 = vadd.f32 %v1159_v9, %v1043_v45  ;;  %v1016_v53 = vpop.xlane.xlu1 %1015  ;;  %v792_v26 = vpop.xlane.xlu2 %791 }
 0x16b   : > { %v4367_v27 = vpop.xlane.xlu0 %735  ;;  %3543 = vpow2.f32 %v3268_v59  ;;  %v812_v0 = vmul.f32 %v4220_v6, %v792_v26  ;;  %v1036_v57 = vmul.f32 %v4308_v40, %v1016_v53  ;;  %v1260_v59 = vmul.f32 %v4338_v18, %v4253_v43 }
 0x16c   : > { %v1217_v28 = vadd.f32 %v1209_v20, %v1167_v25 }
 0x16d   : > { %v820_v44 = vadd.f32 %v812_v0, %v761_v19  ;;  %v754_v0 = vmul.f32 %v4207_v62, %v4367_v27 }
 0x16e   : > { %v1267_v42 = vadd.f32 %v1259_v11, %v1217_v28 }
 0x16f   : > { %v944_v54 = vadd.f32 %v936_v37, %v820_v44 }
 0x170   : > { %v4372_v34 = vadd.f32 %v4352_v7, %v1267_v42 }
 0x171   : > { %v3544_v48 = vpop.eup %3543 }
 0x172   : > { %v4375_v32 = vpop.xlane.xlu1 %1245  ;;  %v1190_v13 = vpop.xlane.xlu2 %1189  ;;  %v1310_v17 = vadd.f32 1.0, %v3544_v48  ;;  %v3269_v38 = vmul.f32 -1.442695, %v4372_v34 }
 0x173   : > { %v4378_v41 = vpop.xlane.xlu0 %1142  ;;  %v1210_v30 = vmul.f32 %v4330_v46, %v1190_v13 }
 0x174   : > { %3545 = vrcp.f32 %v1310_v17  ;;  %v1329_v58 = vand.u32 2147483648, %v1310_v17  ;;  %v1327_v3 = vand.u32 2147483647, %v1310_v17  ;;  %vm1323_vm2 = vweird.f32 %v1310_v17 }
 0x175   : > { %3547 = vpow2.f32 %v3269_v38 }
 0x176   : > { %v1330_v35 = vor.u32 1.1754944e-38, %v1329_v58  ;;  %vm1328_vm4 = vcmp.eq.f32.partialorder %v1327_v3, 8.507059e+37 }
 0x17a   : > { %v3546_v10 = vpop.eup %3545  ;;  %v4384_v47 = vpop.xlane.xlu1 %918 }
 0x17b   : > { %v677_v49 = vpop.xlane.xlu2 %676  ;;  %v3548_v50 = vpop.eup %3547  ;;  %v1319_v36 = vmul.f32 %v3546_v10, %v1310_v17  ;;  %vm1324_vm1 = vweird.f32 %v3546_v10 }
 0x17c   : > { %v966_v52 = vpop.xlane.xlu0 %965  ;;  %v1311_v29 = vadd.f32 1.0, %v3548_v50  ;;  %vm1325_vm3 = vmor %vm1323_vm2, %vm1324_vm1  ;;  %v695_v13 = vmul.f32 %v4202_v61, %v677_v49 }
 0x17d   : > { %v986_v24 = vmul.f32 %v4301_v31, %v966_v52  ;;  %v1320_v5 = vsub.f32 1.0, %v1319_v36 }
 0x17e   : > { %3549 = vrcp.f32 %v1311_v29  ;;  %v1344_v28 = vand.u32 2147483648, %v1311_v29  ;;  %v1342_v16 = vand.u32 2147483647, %v1311_v29  ;;  %vm1338_vm7 = vweird.f32 %v1311_v29 }
 0x17f   : > { %v994_v22 = vadd.f32 %v986_v24, %v944_v54  ;;  %v1321_v1 = vmul.f32 %v3546_v10, %v1320_v5  ;;  %v762_v37 = vadd.f32 %v754_v0, %v695_v13  ;;  %v937_v54 = vmul.f32 %v4287_v14, %v4384_v47 }
 0x180   : > { %v1345_v44 = vor.u32 1.1754944e-38, %v1344_v28  ;;  %vm1343_vm9 = vcmp.eq.f32.partialorder %v1342_v16, 8.507059e+37 }
 0x181   : > { %v1044_v21 = vadd.f32 %v1036_v57, %v994_v22  ;;  %v1322_v4 = vadd.f32 %v3546_v10, %v1321_v1 }
 0x182   : > { %v1019_v63 = vpop.xlane.xlu1 %1018 }
 0x183   : > { %v1168_v56 = vadd.f32 %v1160_v60, %v1044_v21  ;;  %v795_v8 = vpop.xlane.xlu2 %794  ;;  %v1326_v9 = vsel %vm1325_vm3, %v3546_v10, %v1322_v4  ;;  %v1037_v58 = vmul.f32 %v4308_v40, %v1019_v63 }
 0x184   : > { %v4391_v55 = vpop.xlane.xlu0 %738  ;;  %v3550_v45 = vpop.eup %3549  ;;  %v1331_v23 = vsel %vm1328_vm4, %v1330_v35, %v1326_v9  ;;  %v813_v19 = vmul.f32 %v4220_v6, %v795_v8  ;;  %v1261_v8 = vmul.f32 %v4338_v18, %v4313_v39 }
 0x185   : > { %v1218_v20 = vadd.f32 %v1210_v30, %v1168_v56  ;;  %v1438_v25 = vmul.f32 %v1331_v23, %v4360_v51  ;;  %v1334_v53 = vmul.f32 %v3550_v45, %v1311_v29  ;;  %vm1339_vm6 = vweird.f32 %v3550_v45 }
 0x186   : > { %vm1340_vm8 = vmor %vm1338_vm7, %vm1339_vm6  ;;  %v821_v52 = vadd.f32 %v813_v19, %v762_v37  ;;  %v755_v28 = vmul.f32 %v4207_v62, %v4391_v55 }
 0x187   : > { %v1268_v26 = vadd.f32 %v1260_v59, %v1218_v20  ;;  %3276 = vmatmul.msk.f32.vlgmr.msra.gmra.mxu3 %vm1451_vm5, %v1438_v25  ;;  %v1335_v11 = vsub.f32 1.0, %v1334_v53 }
 0x188   : > { %v945_v57 = vadd.f32 %v937_v54, %v821_v52 }
 0x189   : > { %v4398_v42 = vadd.f32 %v4352_v7, %v1268_v26  ;;  %v1336_v48 = vmul.f32 %v3550_v45, %v1335_v11 }
 0x18a   : > { %v4401_v43 = vpop.xlane.xlu1 %1248 }
 0x18b   : > { %v1193_v17 = vpop.xlane.xlu2 %1192  ;;  %v3270_v38 = vmul.f32 -1.442695, %v4398_v42  ;;  %v1337_v33 = vadd.f32 %v3550_v45, %v1336_v48 }
 0x18c   : > { %v4404_v51 = vpop.xlane.xlu0 %1145  ;;  %v1211_v60 = vmul.f32 %v4330_v46, %v1193_v17 }
 0x18d   : > { %3551 = vpow2.f32 %v3270_v38  ;;  %v1341_v10 = vsel %vm1340_vm8, %v3550_v45, %v1337_v33 }
 0x18e   : > { %v1346_v49 = vsel %vm1343_vm9, %v1345_v44, %v1341_v10 }
 0x18f   : > { %v1439_v50 = vmul.f32 %v1346_v49, %v4372_v34  ;;  %v1161_v34 = vmul.f32 %v4318_v12, %v4378_v41 }
 0x191   : > { %3277 = vmatmul.msk.f32.gmra.mxu3 %vm1451_vm5, %v1439_v50 }
 0x192   : > { %v922_v24 = vpop.xlane.xlu1 %921 }
 0x193   : > { %v3552_v36 = vpop.eup %3551  ;;  %v680_v27 = vpop.xlane.xlu2 %679  ;;  %v938_v10 = vmul.f32 %v4287_v14, %v922_v24 }
 0x194   : > { %v969_v29 = vpop.xlane.xlu0 %968  ;;  %v1312_v5 = vadd.f32 1.0, %v3552_v36  ;;  %v696_v25 = vmul.f32 %v4202_v61, %v680_v27 }
 0x195   : > { %v987_v22 = vmul.f32 %v4301_v31, %v969_v29 }
 0x196   : > { %3553 = vrcp.f32 %v1312_v5  ;;  %v1359_v63 = vand.u32 2147483648, %v1312_v5  ;;  %v1357_v23 = vand.u32 2147483647, %v1312_v5  ;;  %vm1353_vm11 = vweird.f32 %v1312_v5 }
 0x197   : > { %v995_v1 = vadd.f32 %v987_v22, %v945_v57  ;;  %v763_v33 = vadd.f32 %v755_v28, %v696_v25 }
 0x198   : > { %v1360_v16 = vor.u32 1.1754944e-38, %v1359_v63  ;;  %vm1358_vm13 = vcmp.eq.f32.partialorder %v1357_v23, 8.507059e+37 }
 0x199   : > { %v1045_v3 = vadd.f32 %v1037_v58, %v995_v1 }
 0x19a   : > { %v1022_v4 = vpop.xlane.xlu1 %1021 }
 0x19b   : > { %v1169_v21 = vadd.f32 %v1161_v34, %v1045_v3  ;;  %v798_v47 = vpop.xlane.xlu2 %797  ;;  %v1038_v54 = vmul.f32 %v4308_v40, %v1022_v4  ;;  %v1262_v34 = vmul.f32 %v4338_v18, %v4375_v32 }
 0x19c   : > { %v3554_v30 = vpop.eup %3553  ;;  %v742_v56 = vpop.xlane.xlu0 %741  ;;  %v814_v13 = vmul.f32 %v4220_v6, %v798_v47 }
 0x19d   : > { %v1219_v35 = vadd.f32 %v1211_v60, %v1169_v21  ;;  %v1349_v9 = vmul.f32 %v3554_v30, %v1312_v5  ;;  %vm1354_vm10 = vweird.f32 %v3554_v30  ;;  %v756_v60 = vmul.f32 %v4207_v62, %v742_v56 }
 0x19e   : > { %vm1355_vm12 = vmor %vm1353_vm11, %vm1354_vm10  ;;  %v822_v19 = vadd.f32 %v814_v13, %v763_v33 }
 0x19f   : > { %v1350_v45 = vsub.f32 1.0, %v1349_v9  ;;  %v1269_v59 = vadd.f32 %v1261_v8, %v1219_v35 }
 0x1a0   : > { %v946_v52 = vadd.f32 %v938_v10, %v822_v19 }
 0x1a1   : > { %v1351_v20 = vmul.f32 %v3554_v30, %v1350_v45  ;;  %v4421_v41 = vadd.f32 %v4352_v7, %v1269_v59 }
 0x1a2   : > { %v4424_v53 = vpop.xlane.xlu1 %1251 }
 0x1a3   : > { %v1196_v26 = vpop.xlane.xlu2 %1195  ;;  %v1352_v11 = vadd.f32 %v3554_v30, %v1351_v20  ;;  %v3271_v39 = vmul.f32 -1.442695, %v4421_v41 }
 0x1a4   : > { %v4429_v48 = vpop.xlane.xlu0 %1148  ;;  %v1212_v5 = vmul.f32 %v4330_v46, %v1196_v26 }
 0x1a5   : > { %v1356_v17 = vsel %vm1355_vm12, %v3554_v30, %v1352_v11  ;;  %3555 = vpow2.f32 %v3271_v39 }
 0x1a6   : > { %v1361_v38 = vsel %vm1358_vm13, %v1360_v16, %v1356_v17  ;;  %v1163_v17 = vmul.f32 %v4318_v12, %v4429_v48 }
 0x1a7   : > { %v1440_v0 = vmul.f32 %v1361_v38, %v4398_v42  ;;  %v1162_v42 = vmul.f32 %v4318_v12, %v4404_v51 }
 0x1a9   : > { %3278 = vmatmul.msk.f32.gmra.mxu3 %vm1451_vm5, %v1440_v0 }
 0x1aa   : > { %v925_v55 = vpop.xlane.xlu1 %924 }
 0x1ab   : > { %v3556_v44 = vpop.eup %3555  ;;  %v683_v37 = vpop.xlane.xlu2 %682  ;;  %v939_v32 = vmul.f32 %v4287_v14, %v925_v55 }
 0x1ac   : > { %v972_v49 = vpop.xlane.xlu0 %971  ;;  %v1313_v50 = vadd.f32 1.0, %v3556_v44  ;;  %v697_v24 = vmul.f32 %v4202_v61, %v683_v37 }
 0x1ad   : > { %v988_v36 = vmul.f32 %v4301_v31, %v972_v49 }
 0x1ae   : > { %3557 = vrcp.f32 %v1313_v50  ;;  %v764_v51 = vadd.f32 %v756_v60, %v697_v24  ;;  %v1372_v35 = vand.u32 2147483647, %v1313_v50  ;;  %v1374_v9 = vand.u32 2147483648, %v1313_v50 }
 0x1af   : > { %v996_v27 = vadd.f32 %v988_v36, %v946_v52  ;;  %vm1368_vm15 = vweird.f32 %v1313_v50  ;;  %v1264_v60 = vmul.f32 %v4338_v18, %v4424_v53 }
 0x1b0   : > { %vm1373_vm2 = vcmp.eq.f32.partialorder %v1372_v35, 8.507059e+37  ;;  %v1375_v23 = vor.u32 1.1754944e-38, %v1374_v9 }
 0x1b1   : > { %v1046_v29 = vadd.f32 %v1038_v54, %v996_v27 }
 0x1b2   : > { %v1025_v22 = vpop.xlane.xlu1 %1024 }
 0x1b3   : > { %v1170_v57 = vadd.f32 %v1162_v42, %v1046_v29  ;;  %v801_v58 = vpop.xlane.xlu2 %800  ;;  %v1039_v28 = vmul.f32 %v4308_v40, %v1025_v22 }
 0x1b4   : > { %v3558_v1 = vpop.eup %3557  ;;  %v1152_v3 = vpop.xlane.xlu0 %1151  ;;  %v815_v4 = vmul.f32 %v4220_v6, %v801_v58 }
 0x1b5   : > { %v1220_v21 = vadd.f32 %v1212_v5, %v1170_v57  ;;  %v1364_v47 = vmul.f32 %v3558_v1, %v1313_v50  ;;  %vm1369_vm14 = vweird.f32 %v3558_v1  ;;  %v1263_v50 = vmul.f32 %v4338_v18, %v4401_v43 }
 0x1b6   : > { %v823_v45 = vadd.f32 %v815_v4, %v764_v51  ;;  %vm1370_vm1 = vmor %vm1368_vm15, %vm1369_vm14  ;;  %v1164_v42 = vmul.f32 %v4318_v12, %v1152_v3 }
 0x1b7   : > { %v1365_v30 = vsub.f32 1.0, %v1364_v47  ;;  %v1270_v8 = vadd.f32 %v1262_v34, %v1220_v21 }
 0x1b8   : > { %v947_v25 = vadd.f32 %v939_v32, %v823_v45 }
 0x1b9   : > { %v1366_v61 = vmul.f32 %v3558_v1, %v1365_v30  ;;  %v4446_v59 = vadd.f32 %v4352_v7, %v1270_v8 }
 0x1ba   : > { %v928_v63 = vpop.xlane.xlu1 %927 }
 0x1bb   : > { %v1199_v20 = vpop.xlane.xlu2 %1198  ;;  %v1367_v62 = vadd.f32 %v3558_v1, %v1366_v61  ;;  %v3272_v6 = vmul.f32 -1.442695, %v4446_v59  ;;  %v940_v38 = vmul.f32 %v4287_v14, %v928_v63 }
 0x1bc   : > { %v975_v56 = vpop.xlane.xlu0 %974  ;;  %v1213_v44 = vmul.f32 %v4330_v46, %v1199_v20 }
 0x1bd   : > { %v989_v26 = vmul.f32 %v4301_v31, %v975_v56  ;;  %v1371_v11 = vsel %vm1370_vm1, %v3558_v1, %v1367_v62  ;;  %3559 = vpow2.f32 %v3272_v6 }
 0x1be   : > { %v1376_v39 = vsel %vm1373_vm2, %v1375_v23, %v1371_v11 }
 0x1bf   : > { %v997_v16 = vadd.f32 %v989_v26, %v947_v25  ;;  %v1441_v13 = vmul.f32 %v1376_v39, %v4421_v41  ;;  %v948_v41 = vadd.f32 %v940_v38, %v4227_v15 }
 0x1c1   : > { %v1047_v33 = vadd.f32 %v1039_v28, %v997_v16  ;;  %3279 = vmatmul.msk.f32.gmra.mxu3 %vm1451_vm5, %v1441_v13 }
 0x1c2   : > { %v1028_v10 = vpop.xlane.xlu1 %1027 }
 0x1c3   : > { %v3560_v0 = vpop.eup %3559  ;;  %v1171_v19 = vadd.f32 %v1163_v17, %v1047_v33  ;;  %v1202_v55 = vpop.xlane.xlu2 %1201  ;;  %v1040_v54 = vmul.f32 %v4308_v40, %v1028_v10 }
 0x1c4   : > { %v978_v37 = vpop.xlane.xlu0 %977  ;;  %v1314_v49 = vadd.f32 1.0, %v3560_v0  ;;  %v1214_v24 = vmul.f32 %v4330_v46, %v1202_v55 }
 0x1c5   : > { %v1221_v52 = vadd.f32 %v1213_v44, %v1171_v19  ;;  %v990_v48 = vmul.f32 %v4301_v31, %v978_v37 }
 0x1c6   : > { %3561 = vrcp.f32 %v1314_v49  ;;  %v1387_v35 = vand.u32 2147483647, %v1314_v49  ;;  %v1389_v9 = vand.u32 2147483648, %v1314_v49  ;;  %vm1383_vm4 = vweird.f32 %v1314_v49 }
 0x1c7   : > { %v1271_v36 = vadd.f32 %v1263_v50, %v1221_v52  ;;  %v998_v27 = vadd.f32 %v990_v48, %v948_v41 }
 0x1c8   : > { %vm1388_vm7 = vcmp.eq.f32.partialorder %v1387_v35, 8.507059e+37  ;;  %v1390_v62 = vor.u32 1.1754944e-38, %v1389_v9 }
 0x1c9   : > { %v1048_v29 = vadd.f32 %v1040_v54, %v998_v27  ;;  %v4465_v5 = vadd.f32 %v4352_v7, %v1271_v36 }
 0x1ca   : > { %v931_v43 = vpop.xlane.xlu1 %930 }
 0x1cb   : > { %v1172_v57 = vadd.f32 %v1164_v42, %v1048_v29  ;;  %v3273_v15 = vmul.f32 -1.442695, %v4465_v5  ;;  %v941_v58 = vmul.f32 %v4287_v14, %v931_v43  ;;  %v1031_v34 = vpop.xlane.xlu2 %1030 }
 0x1cc   : > { %v3562_v22 = vpop.eup %3561  ;;  %v981_v1 = vpop.xlane.xlu0 %980  ;;  %v1041_v61 = vmul.f32 %v4308_v40, %v1031_v34 }
 0x1cd   : > { %v1222_v21 = vadd.f32 %v1214_v24, %v1172_v57  ;;  %v1379_v3 = vmul.f32 %v3562_v22, %v1314_v49  ;;  %v949_v4 = vadd.f32 %v941_v58, %v4270_v2  ;;  %v991_v47 = vmul.f32 %v4301_v31, %v981_v1 }
 0x1ce   : > { %3563 = vpow2.f32 %v3273_v15  ;;  %vm1384_vm3 = vweird.f32 %v3562_v22 }
 0x1cf   : > { %v1272_v51 = vadd.f32 %v1264_v60, %v1222_v21  ;;  %v1380_v30 = vsub.f32 1.0, %v1379_v3  ;;  %v999_v8 = vadd.f32 %v991_v47, %v949_v4  ;;  %vm1385_vm6 = vmor %vm1383_vm4, %vm1384_vm3 }
 0x1d1   : > { %v1381_v45 = vmul.f32 %v3562_v22, %v1380_v30  ;;  %v4475_v14 = vadd.f32 %v4352_v7, %v1272_v51  ;;  %v1049_v63 = vadd.f32 %v1041_v61, %v999_v8 }
 0x1d2   : > { %v1205_v31 = vpop.xlane.xlu1 %1204 }
 0x1d3   : > { %v1382_v53 = vadd.f32 %v3562_v22, %v1381_v45  ;;  %v3274_v32 = vmul.f32 -1.442695, %v4475_v14  ;;  %v1255_v25 = vpop.xlane.xlu2 %1254  ;;  %v1215_v40 = vmul.f32 %v4330_v46, %v1205_v31 }
 0x1d4   : > { %v3564_v2 = vpop.eup %3563  ;;  %v1155_v20 = vpop.xlane.xlu0 %1154  ;;  %v1265_v16 = vmul.f32 %v4338_v18, %v1255_v25 }
 0x1d5   : > { %v1165_v6 = vmul.f32 %v4318_v12, %v1155_v20  ;;  %v1386_v56 = vsel %vm1385_vm6, %v3562_v22, %v1382_v53  ;;  %v1315_v23 = vadd.f32 1.0, %v3564_v2  ;;  %3565 = vpow2.f32 %v3274_v32 }
 0x1d6   : > { %v1391_v26 = vsel %vm1388_vm7, %v1390_v62, %v1386_v56 }
 0x1d7   : > { %v1173_v11 = vadd.f32 %v1165_v6, %v1049_v63  ;;  %v1442_v39 = vmul.f32 %v1391_v26, %v4446_v59  ;;  %3567 = vrcp.f32 %v1315_v23  ;;  %v1404_v46 = vand.u32 2147483648, %v1315_v23 }
 0x1d8   : > { %v1402_v59 = vand.u32 2147483647, %v1315_v23  ;;  %vm1398_vm9 = vweird.f32 %v1315_v23 }
 0x1d9   : > { %v1223_v28 = vadd.f32 %v1215_v40, %v1173_v11  ;;  %3280 = vmatmul.msk.f32.gmra.mxu3 %vm1451_vm5, %v1442_v39  ;;  %v1405_v18 = vor.u32 1.1754944e-38, %v1404_v46 }
 0x1da   : > { %vm1403_vm11 = vcmp.eq.f32.partialorder %v1402_v59, 8.507059e+37 }
 0x1db   : > { %v3566_v13 = vpop.eup %3565  ;;  %v1273_v17 = vadd.f32 %v1265_v16, %v1223_v28 }
 0x1dc   : > { %v1316_v38 = vadd.f32 1.0, %v3566_v13 }
 0x1dd   : > { %v3568_v12 = vpop.eup %3567  ;;  %v1285_v33 = vadd.f32 %v4352_v7, %v1273_v17 }
 0x1de   : > { %v1394_v0 = vmul.f32 %v3568_v12, %v1315_v23  ;;  %3569 = vrcp.f32 %v1316_v38  ;;  %vm1399_vm8 = vweird.f32 %v3568_v12  ;;  %v1419_v54 = vand.u32 2147483648, %v1316_v38 }
 0x1df   : > { %v3275_v19 = vmul.f32 -1.442695, %v1285_v33  ;;  %vm1400_vm10 = vmor %vm1398_vm9, %vm1399_vm8  ;;  %v1417_v42 = vand.u32 2147483647, %v1316_v38  ;;  %vm1413_vm13 = vweird.f32 %v1316_v38 }
 0x1e0   : > { %v1395_v44 = vsub.f32 1.0, %v1394_v0  ;;  %v1420_v57 = vor.u32 1.1754944e-38, %v1419_v54 }
 0x1e1   : > { %3571 = vpow2.f32 %v3275_v19  ;;  %vm1418_vm15 = vcmp.eq.f32.partialorder %v1417_v42, 8.507059e+37 }
 0x1e2   : > { %v1396_v10 = vmul.f32 %v3568_v12, %v1395_v44 }
 0x1e4   : > { %v3570_v55 = vpop.eup %3569  ;;  %v1397_v37 = vadd.f32 %v3568_v12, %v1396_v10 }
 0x1e5   : > { %v1409_v49 = vmul.f32 %v3570_v55, %v1316_v38  ;;  %vm1414_vm12 = vweird.f32 %v3570_v55 }
 0x1e6   : > { %v1401_v50 = vsel %vm1400_vm10, %v3568_v12, %v1397_v37  ;;  %vm1415_vm14 = vmor %vm1413_vm13, %vm1414_vm12 }
 0x1e7   : > { %v3572_v41 = vpop.eup %3571  ;;  %v1406_v52 = vsel %vm1403_vm11, %v1405_v18, %v1401_v50  ;;  %v1410_v7 = vsub.f32 1.0, %v1409_v49 }
 0x1e8   : > { %v1317_v48 = vadd.f32 1.0, %v3572_v41  ;;  %v1443_v36 = vmul.f32 %v1406_v52, %v4465_v5 }
 0x1e9   : > { %v1411_v27 = vmul.f32 %v3570_v55, %v1410_v7 }
 0x1ea   : > { %3573 = vrcp.f32 %v1317_v48  ;;  %3281 = vmatmul.msk.f32.gmra.mxu3 %vm1451_vm5, %v1443_v36  ;;  %v1434_v1 = vand.u32 2147483648, %v1317_v48  ;;  %v1432_v60 = vand.u32 2147483647, %v1317_v48  ;;  %vm1428_vm2 = vweird.f32 %v1317_v48 }
 0x1eb   : > { %v1412_v29 = vadd.f32 %v3570_v55, %v1411_v27 }
 0x1ec   : > { %v1435_v3 = vor.u32 1.1754944e-38, %v1434_v1  ;;  %vm1433_vm4 = vcmp.eq.f32.partialorder %v1432_v60, 8.507059e+37 }
 0x1ed   : > { %v1416_v24 = vsel %vm1415_vm14, %v3570_v55, %v1412_v29 }
 0x1ee   : > { %v1421_v43 = vsel %vm1418_vm15, %v1420_v57, %v1416_v24 }
 0x1ef   : > { %v1444_v15 = vmul.f32 %v1421_v43, %v4475_v14  ;;  %v3531_v14 = vld [vmem:[%s5771_s8] ss:$0 sm:$0xff] }
 0x1f0   : > { %v3574_v22 = vpop.eup %3573 }
 0x1f1   : > { %v1424_v58 = vmul.f32 %v3574_v22, %v1317_v48  ;;  %vm1429_vm1 = vweird.f32 %v3574_v22 }
 0x1f2   : > { %3282 = vmatmul.msk.f32.gmra.mxu3 %vm1451_vm5, %v1444_v15  ;;  %vm1430_vm3 = vmor %vm1428_vm2, %vm1429_vm1 }
 0x1f3   : > { %v1425_v5 = vsub.f32 1.0, %v1424_v58 }
 0x1f5   : > { %v1426_v34 = vmul.f32 %v3574_v22, %v1425_v5 }
 0x1f7   : > { %v1427_v21 = vadd.f32 %v3574_v22, %v1426_v34 }
 0x1f9   : > { %v1431_v4 = vsel %vm1430_vm3, %v3574_v22, %v1427_v21 }
 0x1fa   : > { %v1436_v47 = vsel %vm1433_vm4, %v1435_v3, %v1431_v4 }
 0x1fb   : > { %v1445_v51 = vmul.f32 %v1436_v47, %v1285_v33 }
 0x1fd   : > { %3283 = vmatmul.msk.f32.gmra.mxu3 %vm1451_vm5, %v1445_v51 }
 0x20a   : > { %v1493_v30 = vpop.f32.mrf.mxu3 }
 0x20b   : > { %v4493_v61 = vadd.f32 %v3531_v14, %v1493_v30 }
 0x20d   : > { %v3284_v31 = vmul.f32 -1.442695, %v4493_v61 }
 0x20f   : > { %3575 = vpow2.f32 %v3284_v31 }
 0x214   : > { %v1496_v8 = vpop.f32.mrf.mxu3 }
 0x215   : > { %v4495_v53 = vadd.f32 %v3531_v14, %v1496_v8  ;;  %v3576_v39 = vpop.eup %3575 }
 0x216   : > { %v4514_v38 = vadd.f32 1.0, %v3576_v39 }
 0x217   : > { %v3285_v20 = vmul.f32 -1.442695, %v4495_v53 }
 0x219   : > { %3577 = vpow2.f32 %v3285_v20 }
 0x21f   : > { %v3578_v16 = vpop.eup %3577 }
 0x220   : > { %v4516_v12 = vadd.f32 1.0, %v3578_v16 }
 0x222   : > { %vm1569_vm3 = vweird.f32 %v4516_v12 }
 0x22c   : > { %v1499_v35 = vpop.f32.mrf.mxu3 }
 0x22d   : > { %v4497_v32 = vadd.f32 %v3531_v14, %v1499_v35 }
 0x22f   : > { %v3286_v6 = vmul.f32 -1.442695, %v4497_v32 }
 0x231   : > { %3579 = vpow2.f32 %v3286_v6 }
 0x237   : > { %v3580_v13 = vpop.eup %3579 }
 0x238   : > { %v4518_v0 = vadd.f32 1.0, %v3580_v13 }
 0x244   : > { %v1502_v9 = vpop.f32.mrf.mxu3 }
 0x245   : > { %v4499_v2 = vadd.f32 %v3531_v14, %v1502_v9 }
 0x247   : > { %v3287_v23 = vmul.f32 -1.442695, %v4499_v2 }
 0x249   : > { %3581 = vpow2.f32 %v3287_v23 }
 0x24f   : > { %v3582_v17 = vpop.eup %3581 }
 0x250   : > { %v4520_v44 = vadd.f32 1.0, %v3582_v17 }
 0x252   : > { %vm1599_vm8 = vweird.f32 %v4520_v44 }
 0x25c   : > { %v1505_v45 = vpop.f32.mrf.mxu3 }
 0x25d   : > { %v4503_v62 = vadd.f32 %v3531_v14, %v1505_v45 }
 0x25f   : > { %v3288_v25 = vmul.f32 -1.442695, %v4503_v62 }
 0x261   : > { %3583 = vpow2.f32 %v3288_v25 }
 0x267   : > { %v3584_v33 = vpop.eup %3583 }
 0x268   : > { %v4524_v10 = vadd.f32 1.0, %v3584_v33 }
 0x26a   : > { %vm1614_vm6 = vweird.f32 %v4524_v10 }
 0x26d   : > { %v1508_v63 = vpop.f32.mrf.mxu3 }
 0x26e   : > { %v4506_v56 = vadd.f32 %v3531_v14, %v1508_v63 }
 0x270   : > { %v3289_v26 = vmul.f32 -1.442695, %v4506_v56 }
 0x272   : > { %3585 = vpow2.f32 %v3289_v26 }
 0x275   : > { %v1511_v40 = vpop.f32.mrf.mxu3 }
 0x276   : > { %v4511_v11 = vadd.f32 %v3531_v14, %v1511_v40 }
 0x278   : > { %v3290_v28 = vmul.f32 -1.442695, %v4511_v11  ;;  %v3586_v19 = vpop.eup %3585 }
 0x279   : > { %v4527_v55 = vadd.f32 1.0, %v3586_v19  ;;  %v3319_v19 = vld [vmem:[%s5826_s3 + $0x98] sm:$0xff] }
 0x27a   : > { %3587 = vpow2.f32 %v3290_v28 }
 0x27b   : > { %3589 = vrcp.f32 %v4514_v38  ;;  %vm1629_vm15 = vweird.f32 %v4527_v55  ;;  %v1635_v33 = vand.u32 2147483648, %v4527_v55 }
 0x27c   : > { %3591 = vrcp.f32 %v4516_v12 }
 0x27d   : > { %3593 = vrcp.f32 %v4518_v0 }
 0x27e   : > { %3595 = vrcp.f32 %v4520_v44 }
 0x280   : > { %v3588_v46 = vpop.eup %3587  ;;  %v1514_v59 = vpop.f32.mrf.mxu3 }
 0x281   : > { %v4529_v37 = vadd.f32 1.0, %v3588_v46  ;;  %v4531_v18 = vadd.f32 %v3531_v14, %v1514_v59  ;;  %v4537_v50 = vpop.eup %3589  ;;  %v1633_v59 = vand.u32 2147483647, %v4527_v55  ;;  %v3334_v46 = vld [vmem:[%s5826_s3 + $0xd0] sm:$0xff] }
 0x282   : > { %v4540_v41 = vpop.eup %3591  ;;  %v1550_v43 = vmul.f32 %v4537_v50, %v4514_v38  ;;  %vm1555_vm2 = vweird.f32 %v4537_v50 }
 0x283   : > { %3597 = vrcp.f32 %v4529_v37  ;;  %v3291_v49 = vmul.f32 -1.442695, %v4531_v18  ;;  %v4542_v52 = vpop.eup %3593  ;;  %v1565_v54 = vmul.f32 %v4540_v41, %v4516_v12  ;;  %vm1644_vm11 = vweird.f32 %v4529_v37 }
 0x284   : > { %3599 = vrcp.f32 %v4524_v10  ;;  %v4544_v7 = vpop.eup %3595  ;;  %v1580_v27 = vmul.f32 %v4542_v52, %v4518_v0  ;;  %v1551_v21 = vsub.f32 1.0, %v1550_v43  ;;  %vm1585_vm7 = vweird.f32 %v4542_v52 }
 0x285   : > { %3601 = vrcp.f32 %v4527_v55  ;;  %v1595_v29 = vmul.f32 %v4544_v7, %v4520_v44  ;;  %v1566_v22 = vsub.f32 1.0, %v1565_v54  ;;  %vm1600_vm5 = vweird.f32 %v4544_v7 }
 0x286   : > { %3603 = vpow2.f32 %v3291_v49  ;;  %v1581_v58 = vsub.f32 1.0, %v1580_v27  ;;  %v4571_v9 = vmul.f32 %v4537_v50, %v1551_v21  ;;  %v1648_v26 = vand.u32 2147483647, %v4529_v37 }
 0x287   : > { %v1596_v1 = vsub.f32 1.0, %v1595_v29  ;;  %v1567_v3 = vmul.f32 %v4540_v41, %v1566_v22  ;;  %v1650_v40 = vand.u32 2147483648, %v4529_v37  ;;  %vm1570_vm12 = vweird.f32 %v4540_v41 }
 0x288   : > { %v1582_v4 = vmul.f32 %v4542_v52, %v1581_v58  ;;  %v1618_v54 = vand.u32 2147483647, %v4524_v10  ;;  %v1620_v27 = vand.u32 2147483648, %v4524_v10  ;;  %v1605_v43 = vand.u32 2147483648, %v4520_v44 }
 0x289   : > { %v4546_v48 = vpop.eup %3597  ;;  %v1597_v51 = vmul.f32 %v4544_v7, %v1596_v1  ;;  %v4574_v45 = vadd.f32 %v4540_v41, %v1567_v3  ;;  %v1651_v29 = vor.u32 1.1754944e-38, %v1650_v40  ;;  %v3332_v40 = vld [vmem:[%s5826_s3 + $0xc0] sm:$0xff] }
 0x28a   : > { %v4548_v36 = vpop.eup %3599  ;;  %v1640_v24 = vmul.f32 %v4546_v48, %v4529_v37  ;;  %v4577_v14 = vadd.f32 %v4542_v52, %v1582_v4  ;;  %vm1645_vm10 = vweird.f32 %v4546_v48  ;;  %v1575_v4 = vand.u32 2147483648, %v4516_v12 }
 0x28b   : > { %v4554_v42 = vpop.eup %3601  ;;  %v1610_v34 = vmul.f32 %v4548_v36, %v4524_v10  ;;  %v4581_v20 = vadd.f32 %v4544_v7, %v1597_v51  ;;  %vm1615_vm14 = vweird.f32 %v4548_v36  ;;  %vm4602_vm1 = vmor %vm1644_vm11, %vm1645_vm10  ;;  %v1590_v10 = vand.u32 2147483648, %v4518_v0 }
 0x28c   : > { %v3604_v57 = vpop.eup %3603  ;;  %v1625_v5 = vmul.f32 %v4554_v42, %v4527_v55  ;;  %v1641_v60 = vsub.f32 1.0, %v1640_v24  ;;  %vm1630_vm9 = vweird.f32 %v4554_v42 }
 0x28d   : > { %v1548_v15 = vadd.f32 1.0, %v3604_v57  ;;  %v1611_v30 = vsub.f32 1.0, %v1610_v34  ;;  %vm4610_vm4 = vmor %vm1629_vm15, %vm1630_vm9  ;;  %vm1649_vm9 = vcmp.eq.f32.partialorder %v1648_v26, 8.507059e+37  ;;  %v3317_v26 = vld [vmem:[%s5826_s3 + $0x88] sm:$0xff]  ;;  %v3380_v34 = vld [vmem:[%s5826_s3 + $0x180] sm:$0xff] }
 0x28e   : > { %v1626_v47 = vsub.f32 1.0, %v1625_v5  ;;  %v1642_v8 = vmul.f32 %v4546_v48, %v1641_v60  ;;  %v1603_v5 = vand.u32 2147483647, %v4520_v44  ;;  %v1621_v60 = vor.u32 1.1754944e-38, %v1620_v27  ;;  %v1682_v27 = vld [vmem:[%s5826_s3 + $0x28] sm:$0xff] }
 0x28f   : > { %3605 = vrcp.f32 %v1548_v15  ;;  %v1612_v6 = vmul.f32 %v4548_v36, %v1611_v30  ;;  %v1665_v39 = vand.u32 2147483648, %v1548_v15  ;;  %v1663_v13 = vand.u32 2147483647, %v1548_v15 }
 0x290   : > { %v1627_v63 = vmul.f32 %v4554_v42, %v1626_v47  ;;  %v1643_v23 = vadd.f32 %v4546_v48, %v1642_v8  ;;  %vm1659_vm10 = vweird.f32 %v1548_v15  ;;  %v1573_v44 = vand.u32 2147483647, %v4516_v12 }
 0x291   : > { %v1613_v17 = vadd.f32 %v4548_v36, %v1612_v6  ;;  %v1666_v57 = vor.u32 1.1754944e-38, %v1665_v39  ;;  %vm1664_vm15 = vcmp.eq.f32.partialorder %v1663_v13, 8.507059e+37  ;;  %v1606_v47 = vor.u32 1.1754944e-38, %v1605_v43  ;;  %v1679_v39 = vld [vmem:[%s5826_s3 + $0x10] sm:$0xff]  ;;  %v3333_v13 = vld [vmem:[%s5826_s3 + $0xc8] sm:$0xff] }
 0x292   : > { %v1628_v28 = vadd.f32 %v4554_v42, %v1627_v63  ;;  %v1647_v37 = vsel %vm4602_vm1, %v4546_v48, %v1643_v23  ;;  %vm4629_vm1 = vmor %vm1614_vm6, %vm1615_vm14  ;;  %vm1619_vm14 = vcmp.eq.f32.partialorder %v1618_v54, 8.507059e+37  ;;  %v1560_v8 = vand.u32 2147483648, %v4514_v38  ;;  %v3316_v23 = vld [vmem:[%s5826_s3 + $0x80] sm:$0xff]  ;;  %v3335_v54 = vld [vmem:[%s5826_s3 + $0xd8] sm:$0xff] }
 0x293   : > { %v1652_v22 = vsel %vm1649_vm9, %v1651_v29, %v1647_v37  ;;  %vm4646_vm6 = vmor %vm1599_vm8, %vm1600_vm5  ;;  %vm1604_vm8 = vcmp.eq.f32.partialorder %v1603_v5, 8.507059e+37  ;;  %vm5792_vm9 = vcmask 523264   ;;  %v3303_v37 = vld [vmem:[%s5826_s3 + $0x58] sm:$0xff]  ;;  %v3304_v29 = vld [vmem:[%s5826_s3 + $0x60] sm:$0xff] }
 0x294   : > { %v1632_v24 = vsel %vm4610_vm4, %v4554_v42, %v1628_v28  ;;  %v1617_v42 = vsel %vm4629_vm1, %v4548_v36, %v1613_v17  ;;  %vm1584_vm4 = vweird.f32 %v4518_v0  ;;  %v1588_v36 = vand.u32 2147483647, %v4518_v0  ;;  %v3301_v28 = vld [vmem:[%s5826_s3 + $0x48] sm:$0xff]  ;;  %v1680_v17 = vld [vmem:[%s5826_s3 + $0x18] sm:$0xff]  ;;  %v3322_v48 = vld [vmem:[%s5826_s3 + $0xb0] sm:$0xff] }
 0x295   : > { %v3606_v35 = vpop.eup %3605  ;;  %v4656_v3 = vmul.f32 %v1652_v22, %v4511_v11  ;;  %vm4664_vm5 = vmor %vm1584_vm4, %vm1585_vm7  ;;  %v1553_v11 = vadd.f32 %v4537_v50, %v4571_v9  ;;  %vm1554_vm7 = vweird.f32 %v4514_v38  ;;  %v3305_v43 = vld [vmem:[%s5826_s3 + $0x68] sm:$0xff]  ;;  %v1684_v22 = vld [vmem:[%s5826_s3 + $0x38] sm:$0xff] }
 0x296   : > { %v1655_v31 = vmul.f32 %v3606_v35, %v1548_v15  ;;  %vm1660_vm13 = vweird.f32 %v3606_v35  ;;  %v1636_v15 = vor.u32 1.1754944e-38, %v1635_v33  ;;  %v1587_v51 = vsel %vm4664_vm5, %v4542_v52, %v4577_v14  ;;  %v3302_v33 = vld [vmem:[%s5826_s3 + $0x50] sm:$0xff]  ;;  %v3323_v5 = vld [vmem:[%s5826_s3 + $0xb8] sm:$0xff]  ;;  %v3401_v63 = vld [vmem:[%s5826_s3 + $0x1e8] sm:$0xff] }
 0x297   : > { %vm1661_vm11 = vmor %vm1659_vm10, %vm1660_vm13  ;;  %vm1634_vm13 = vcmp.eq.f32.partialorder %v1633_v59, 8.507059e+37  ;;  %v1591_v52 = vor.u32 1.1754944e-38, %v1590_v10  ;;  %v1681_v59 = vld [vmem:[%s5826_s3 + $0x20] sm:$0xff]  ;;  %v3307_v10 = vld [vmem:[%s5826_s3 + $0x78] sm:$0xff] }
 0x298   : > { %v1656_v25 = vsub.f32 1.0, %v1655_v31  ;;  %v1637_v21 = vsel %vm1634_vm13, %v1636_v15, %v1632_v24  ;;  %vm4687_vm10 = vmor %vm1569_vm3, %vm1570_vm12  ;;  %vm1574_vm3 = vcmp.eq.f32.partialorder %v1573_v44, 8.507059e+37  ;;  %v3336_v24 = vld [vmem:[%s5826_s3 + $0xe0] sm:$0xff]  ;;  %v3337_v15 = vld [vmem:[%s5826_s3 + $0xe8] sm:$0xff] }
 0x299   : > { %v4677_v30 = vmul.f32 %v1637_v21, %v4506_v56  ;;  %v1558_v56 = vand.u32 2147483647, %v4514_v38  ;;  %v1572_v14 = vsel %vm4687_vm10, %v4540_v41, %v4574_v45  ;;  %vm4705_vm12 = vmor %vm1554_vm7, %vm1555_vm2  ;;  %v1576_v38 = vor.u32 1.1754944e-38, %v1575_v4  ;;  %v3349_v21 = vld [vmem:[%s5826_s3 + $0x108] sm:$0xff]  ;;  %v3350_v44 = vld [vmem:[%s5826_s3 + $0x110] sm:$0xff] }
 0x29a   : > { %v1657_v16 = vmul.f32 %v3606_v35, %v1656_v25  ;;  %v1561_v45 = vor.u32 1.1754944e-38, %v1560_v8  ;;  %v3300_v25 = vld [vmem:[%s5826_s3 + $0x40] sm:$0xff]  ;;  %v3365_v4 = vld [vmem:[%s5826_s3 + $0x148] sm:$0xff]  ;;  %v3382_v0 = vld [vmem:[%s5826_s3 + $0x190] sm:$0xff] }
 0x29b   : > { %vm1559_vm2 = vcmp.eq.f32.partialorder %v1558_v56, 8.507059e+37  ;;  %v3352_v8 = vld [vmem:[%s5826_s3 + $0x120] sm:$0xff]  ;;  %v3353_v56 = vld [vmem:[%s5826_s3 + $0x128] sm:$0xff] }
 0x29c   : > { %v1658_v49 = vadd.f32 %v3606_v35, %v1657_v16  ;;  %v3318_v16 = vld [vmem:[%s5826_s3 + $0x90] sm:$0xff] }
 0x29e   : > { %v1662_v55 = vsel %vm1661_vm11, %v3606_v35, %v1658_v49  ;;  %vm1589_vm11 = vcmp.eq.f32.partialorder %v1588_v36, 8.507059e+37  ;;  %v3320_v49 = vld [vmem:[%s5826_s3 + $0xa0] sm:$0xff]  ;;  %v3367_v35 = vld [vmem:[%s5826_s3 + $0x158] sm:$0xff] }
 0x29f   : > { %v1667_v58 = vsel %vm1664_vm15, %v1666_v57, %v1662_v55  ;;  %v1592_v31 = vsel %vm1589_vm11, %v1591_v52, %v1587_v51  ;;  %v3321_v57 = vld [vmem:[%s5826_s3 + $0xa8] sm:$0xff]  ;;  %v1683_v55 = vld [vmem:[%s5826_s3 + $0x30] sm:$0xff]  ;;  %v3364_v36 = vld [vmem:[%s5826_s3 + $0x140] sm:$0xff]  ;;  %vm5791_vm11 = vcmask 261120  }
 0x2a0   : > { %v4638_v1 = vmul.f32 %v1667_v58, %v4531_v18  ;;  %v1602_v18 = vsel %vm4646_vm6, %v4544_v7, %v4581_v20  ;;  %v1622_v7 = vsel %vm1619_vm14, %v1621_v60, %v1617_v42  ;;  %v1577_v20 = vsel %vm1574_vm3, %v1576_v38, %v1572_v14  ;;  %v3306_v58 = vld [vmem:[%s5826_s3 + $0x70] sm:$0xff]  ;;  %v3339_v60 = vld [vmem:[%s5826_s3 + $0xf8] sm:$0xff]  ;;  %v3384_v52 = vld [vmem:[%s5826_s3 + $0x1a0] sm:$0xff] }
 0x2a1   : > { %v1607_v9 = vsel %vm1604_vm8, %v1606_v47, %v1602_v18  ;;  %v4699_v12 = vmul.f32 %v1622_v7, %v4503_v62  ;;  %v1557_v62 = vsel %vm4705_vm12, %v4537_v50, %v1553_v11  ;;  %v4722_v6 = vmul.f32 %v1592_v31, %v4497_v32  ;;  %v3338_v42 = vld [vmem:[%s5826_s3 + $0xf0] sm:$0xff]  ;;  %v3381_v18 = vld [vmem:[%s5826_s3 + $0x188] sm:$0xff]  ;;  %v3351_v7 = vld [vmem:[%s5826_s3 + $0x118] sm:$0xff] }
 0x2a2   : > { %1718 = vmatpush.msrb.mxu3 %v4638_v1  ;;  %1810 = vmatpush.msrb.mxu0 %v4638_v1  ;;  %v4715_v41 = vmul.f32 %v1607_v9, %v4499_v2  ;;  %v1562_v2 = vsel %vm1559_vm2, %v1561_v45, %v1557_v62  ;;  %v4729_v50 = vmul.f32 %v1577_v20, %v4495_v53  ;;  %v1677_v53 = vld [vmem:[%s5826_s3] sm:$0xff]  ;;  %v3398_v47 = vld [vmem:[%s5826_s3 + $0x1d0] sm:$0xff]  ;;  %v3383_v51 = vld [vmem:[%s5826_s3 + $0x198] sm:$0xff] }
 0x2a3   : > { %1902 = vmatpush.msra.mxu1 %v4638_v1  ;;  %1994 = vmatpush.msrb.mxu2 %v4638_v1  ;;  %v4736_v32 = vmul.f32 %v1562_v2, %v4493_v61  ;;  %v1678_v61 = vld [vmem:[%s5826_s3 + $0x8] sm:$0xff]  ;;  %v3366_v11 = vld [vmem:[%s5826_s3 + $0x150] sm:$0xff]  ;;  %v3400_v9 = vld [vmem:[%s5826_s3 + $0x1e0] sm:$0xff] }
 0x2a4   : > { %1719 = vmatpush.msrb.mxu3 %v4656_v3  ;;  %1811 = vmatpush.msrb.mxu0 %v4656_v3  ;;  %v3368_v14 = vld [vmem:[%s5826_s3 + $0x160] sm:$0xff]  ;;  %v3354_v38 = vld [vmem:[%s5826_s3 + $0x130] sm:$0xff]  ;;  %v3369_v31 = vld [vmem:[%s5826_s3 + $0x168] sm:$0xff] }
 0x2a5   : > { %1903 = vmatpush.msra.mxu1 %v4656_v3  ;;  %1995 = vmatpush.msrb.mxu2 %v4656_v3  ;;  %v3386_v62 = vld [vmem:[%s5826_s3 + $0x1b0] sm:$0xff]  ;;  %v3355_v45 = vld [vmem:[%s5826_s3 + $0x138] sm:$0xff] }
 0x2a6   : > { %1720 = vmatpush.msrb.mxu3 %v4677_v30  ;;  %1812 = vmatpush.msrb.mxu0 %v4677_v30  ;;  %v3370_v20 = vld [vmem:[%s5826_s3 + $0x170] sm:$0xff] }
 0x2a7   : > { %1904 = vmatpush.msra.mxu1 %v4677_v30  ;;  %1996 = vmatpush.msrb.mxu2 %v4677_v30 }
 0x2a8   : > { %1721 = vmatpush.msrb.mxu3 %v4699_v12  ;;  %1813 = vmatpush.msrb.mxu0 %v4699_v12 }
 0x2a9   : > { %1905 = vmatpush.msra.mxu1 %v4699_v12  ;;  %1997 = vmatpush.msrb.mxu2 %v4699_v12 }
 0x2aa   : > { %1722 = vmatpush.msrb.mxu3 %v4715_v41  ;;  %1814 = vmatpush.msrb.mxu0 %v4715_v41 }
 0x2ab   : > { %1906 = vmatpush.msra.mxu1 %v4715_v41  ;;  %1998 = vmatpush.msrb.mxu2 %v4715_v41 }
 0x2ac   : > { %1723 = vmatpush.msrb.mxu3 %v4722_v6  ;;  %1815 = vmatpush.msrb.mxu0 %v4722_v6 }
 0x2ad   : > { %1907 = vmatpush.msra.mxu1 %v4722_v6  ;;  %1999 = vmatpush.msrb.mxu2 %v4722_v6 }
 0x2ae   : > { %1724 = vmatpush.msrb.mxu3 %v4729_v50  ;;  %1816 = vmatpush.msrb.mxu0 %v4729_v50 }
 0x2af   : > { %1908 = vmatpush.msra.mxu1 %v4729_v50  ;;  %2000 = vmatpush.msrb.mxu2 %v4729_v50 }
 0x2b0   : > { %1725 = vmatpush.msrb.mxu3 %v4736_v32  ;;  %1817 = vmatpush.msrb.mxu0 %v4736_v32 }
 0x2b1   : > { %1909 = vmatpush.msra.mxu1 %v4736_v32  ;;  %2001 = vmatpush.msrb.mxu2 %v4736_v32 }
 0x2b2   : > { %3292 = vmatmul.msk.f32.vlgmr.msrb.gmra.mxu3 %vm5792_vm9, %v1677_v53  ;;  %3324 = vmatmul.msk.f32.vlgmr.msra.gmra.mxu1 %vm5792_vm9, %v3316_v23  ;;  %v5048_v53 = vld [vmem:[%s5772_s9] ss:$0 sm:$0xff]  ;;  %v3371_v23 = vld [vmem:[%s5826_s3 + $0x178] sm:$0xff] }
 0x2b3   : > { %2086 = vmatpush.msra.mxu3 %v4638_v1  ;;  %2178 = vmatpush.msra.mxu0 %v4638_v1 }
 0x2b4   : > { %2270 = vmatpush.msrb.mxu1 %v4638_v1  ;;  %3473 = vmatpush.msra.mxu2 %v4638_v1 }
 0x2b5   : > { %2087 = vmatpush.msra.mxu3 %v4656_v3  ;;  %2179 = vmatpush.msra.mxu0 %v4656_v3 }
 0x2b6   : > { %2271 = vmatpush.msrb.mxu1 %v4656_v3  ;;  %3474 = vmatpush.msra.mxu2 %v4656_v3 }
 0x2b7   : > { %2088 = vmatpush.msra.mxu3 %v4677_v30  ;;  %2180 = vmatpush.msra.mxu0 %v4677_v30 }
 0x2b8   : > { %2272 = vmatpush.msrb.mxu1 %v4677_v30  ;;  %3475 = vmatpush.msra.mxu2 %v4677_v30 }
 0x2b9   : > { %2089 = vmatpush.msra.mxu3 %v4699_v12  ;;  %2181 = vmatpush.msra.mxu0 %v4699_v12 }
 0x2ba   : > { %2273 = vmatpush.msrb.mxu1 %v4699_v12  ;;  %3476 = vmatpush.msra.mxu2 %v4699_v12 }
 0x2bb   : > { %3293 = vmatmul.msk.f32.gmra.mxu3 %vm5792_vm9, %v1678_v61  ;;  %3308 = vmatmul.msk.f32.vlgmr.msrb.gmra.mxu0 %vm5792_vm9, %v3300_v25  ;;  %v3396_v61 = vld [vmem:[%s5826_s3 + $0x1c0] sm:$0xff] }
 0x2bc   : > { %3325 = vmatmul.msk.f32.gmra.mxu1 %vm5792_vm9, %v3317_v26  ;;  %2090 = vmatpush.msra.mxu3 %v4715_v41  ;;  %v5059_v25 = vld [vmem:[%s5772_s9 + $0x2] ss:$0 sm:$0xff] }
 0x2bd   : > { %2182 = vmatpush.msra.mxu0 %v4715_v41  ;;  %2274 = vmatpush.msrb.mxu1 %v4715_v41 }
 0x2be   : > { %3477 = vmatpush.msra.mxu2 %v4715_v41  ;;  %2091 = vmatpush.msra.mxu3 %v4722_v6 }
 0x2bf   : > { %2183 = vmatpush.msra.mxu0 %v4722_v6  ;;  %2275 = vmatpush.msrb.mxu1 %v4722_v6 }
 0x2c0   : > { %3478 = vmatpush.msra.mxu2 %v4722_v6  ;;  %2092 = vmatpush.msra.mxu3 %v4729_v50 }
 0x2c1   : > { %2184 = vmatpush.msra.mxu0 %v4729_v50  ;;  %2276 = vmatpush.msrb.mxu1 %v4729_v50 }
 0x2c2   : > { %3479 = vmatpush.msra.mxu2 %v4729_v50  ;;  %2093 = vmatpush.msra.mxu3 %v4736_v32 }
 0x2c3   : > { %3340 = vmatmul.msk.f32.vlgmr.msrb.gmra.mxu2 %vm5792_vm9, %v3332_v40  ;;  %2185 = vmatpush.msra.mxu0 %v4736_v32  ;;  %v5064_v40 = vld [vmem:[%s5772_s9 + $0x1] ss:$0 sm:$0xff] }
 0x2c4   : > { %2277 = vmatpush.msrb.mxu1 %v4736_v32  ;;  %3480 = vmatpush.msra.mxu2 %v4736_v32 }
 0x2c5   : > { %2454 = vmatpush.msrb.mxu3 %v4638_v1  ;;  %3309 = vmatmul.msk.f32.gmra.mxu0 %vm5792_vm9, %v3301_v28 }
 0x2c6   : > { %2362 = vmatpush.msra.mxu1 %v4638_v1  ;;  %3294 = vmatmul.msk.f32.gmra.mxu3 %vm5792_vm9, %v1679_v39  ;;  %v3348_v1 = vld [vmem:[%s5826_s3 + $0x100] sm:$0xff] }
 0x2c7   : > { %3326 = vmatmul.msk.f32.gmra.mxu1 %vm5792_vm9, %v3318_v16  ;;  %2455 = vmatpush.msrb.mxu3 %v4656_v3 }
 0x2c8   : > { %2363 = vmatpush.msra.mxu1 %v4656_v3  ;;  %v3397_v3 = vld [vmem:[%s5826_s3 + $0x1c8] sm:$0xff] }
 0x2c9   : > { %2456 = vmatpush.msrb.mxu3 %v4677_v30 }
 0x2ca   : > { %2364 = vmatpush.msra.mxu1 %v4677_v30  ;;  %v3399_v30 = vld [vmem:[%s5826_s3 + $0x1d8] sm:$0xff] }
 0x2cb   : > { %2457 = vmatpush.msrb.mxu3 %v4699_v12  ;;  %3341 = vmatmul.msk.f32.gmra.mxu2 %vm5792_vm9, %v3333_v13 }
 0x2cc   : > { %2365 = vmatpush.msra.mxu1 %v4699_v12  ;;  %v3385_v12 = vld [vmem:[%s5826_s3 + $0x1a8] sm:$0xff] }
 0x2cd   : > { %2458 = vmatpush.msrb.mxu3 %v4715_v41  ;;  %3310 = vmatmul.msk.f32.gmra.mxu0 %vm5792_vm9, %v3302_v33 }
 0x2ce   : > { %2366 = vmatpush.msra.mxu1 %v4715_v41  ;;  %3295 = vmatmul.msk.f32.gmra.mxu3 %vm5792_vm9, %v1680_v17  ;;  %v3402_v41 = vld [vmem:[%s5826_s3 + $0x1f0] sm:$0xff] }
 0x2cf   : > { %3327 = vmatmul.msk.f32.gmra.mxu1 %vm5792_vm9, %v3319_v19  ;;  %2459 = vmatpush.msrb.mxu3 %v4722_v6  ;;  %v3413_v19 = vld [vmem:[%s5826_s3 + $0x208] sm:$0xff] }
 0x2d0   : > { %2367 = vmatpush.msra.mxu1 %v4722_v6  ;;  %v3387_v6 = vld [vmem:[%s5826_s3 + $0x1b8] sm:$0xff] }
 0x2d1   : > { %2460 = vmatpush.msrb.mxu3 %v4729_v50 }
 0x2d2   : > { %2368 = vmatpush.msra.mxu1 %v4729_v50  ;;  %v3403_v50 = vld [vmem:[%s5826_s3 + $0x1f8] sm:$0xff] }
 0x2d3   : > { %3342 = vmatmul.msk.f32.gmra.mxu2 %vm5792_vm9, %v3334_v46  ;;  %2461 = vmatpush.msrb.mxu3 %v4736_v32 }
 0x2d4   : > { %2369 = vmatpush.msra.mxu1 %v4736_v32  ;;  %v3412_v32 = vld [vmem:[%s5826_s3 + $0x200] sm:$0xff] }
 0x2d5   : > { %3311 = vmatmul.msk.f32.gmra.mxu0 %vm5792_vm9, %v3303_v37 }
 0x2d6   : > { %3296 = vmatmul.msk.f32.gmra.mxu3 %vm5792_vm9, %v1681_v59 }
 0x2d7   : > { %3328 = vmatmul.msk.f32.gmra.mxu1 %vm5792_vm9, %v3320_v49 }
 0x2db   : > { %3343 = vmatmul.msk.f32.gmra.mxu2 %vm5792_vm9, %v3335_v54  ;;  %v3414_v54 = vld [vmem:[%s5826_s3 + $0x210] sm:$0xff] }
 0x2dd   : > { %3312 = vmatmul.msk.f32.gmra.mxu0 %vm5792_vm9, %v3304_v29 }
 0x2de   : > { %3297 = vmatmul.msk.f32.gmra.mxu3 %vm5792_vm9, %v1682_v27  ;;  %v5083_v27 = vld [vmem:[%s5772_s9 + $0x3] ss:$0 sm:$0xff] }
 0x2df   : > { %3329 = vmatmul.msk.f32.gmra.mxu1 %vm5792_vm9, %v3321_v57 }
 0x2e3   : > { %3344 = vmatmul.msk.f32.gmra.mxu2 %vm5792_vm9, %v3336_v24 }
 0x2e5   : > { %3313 = vmatmul.msk.f32.gmra.mxu0 %vm5792_vm9, %v3305_v43 }
 0x2e6   : > { %3298 = vmatmul.msk.f32.gmra.mxu3 %vm5792_vm9, %v1683_v55 }
 0x2e7   : > { %3330 = vmatmul.msk.f32.gmra.mxu1 %vm5792_vm9, %v3322_v48 }
 0x2eb   : > { %3345 = vmatmul.msk.f32.gmra.mxu2 %vm5792_vm9, %v3337_v15 }
 0x2ed   : > { %3314 = vmatmul.msk.f32.gmra.mxu0 %vm5792_vm9, %v3306_v58 }
 0x2ee   : > { %3299 = vmatmul.msk.f32.gmra.mxu3 %vm5792_vm9, %v1684_v22 }
 0x2ef   : > { %3331 = vmatmul.msk.f32.gmra.mxu1 %vm5792_vm9, %v3323_v5 }
 0x2f3   : > { %3346 = vmatmul.msk.f32.gmra.mxu2 %vm5792_vm9, %v3338_v42  ;;  %v3415_v42 = vld [vmem:[%s5826_s3 + $0x218] sm:$0xff] }
 0x2f5   : > { %3315 = vmatmul.msk.f32.gmra.mxu0 %vm5792_vm9, %v3307_v10 }
 0x2f6   : > { %3356 = vmatmul.msk.f32.vlgmr.msra.gmra.mxu3 %vm5792_vm9, %v3348_v1 }
 0x2f7   : > { %3388 = vmatmul.msk.f32.vlgmr.msrb.gmra.mxu1 %vm5792_vm9, %v3380_v34 }
 0x2fb   : > { %3347 = vmatmul.msk.f32.gmra.mxu2 %vm5792_vm9, %v3339_v60 }
 0x2fd   : > { %3372 = vmatmul.msk.f32.vlgmr.msra.gmra.mxu0 %vm5792_vm9, %v3364_v36 }
 0x2fe   : > { %3357 = vmatmul.msk.f32.gmra.mxu3 %vm5792_vm9, %v3349_v21 }
 0x2ff   : > { %3389 = vmatmul.msk.f32.gmra.mxu1 %vm5792_vm9, %v3381_v18 }
 0x303   : > { %3405 = vmatmul.msk.f32.vlgmr.msra.gmra.mxu2 %vm5792_vm9, %v3397_v3 }
 0x305   : > { %3373 = vmatmul.msk.f32.gmra.mxu0 %vm5792_vm9, %v3365_v4 }
 0x306   : > { %3358 = vmatmul.msk.f32.gmra.mxu3 %vm5792_vm9, %v3350_v44 }
 0x307   : > { %3390 = vmatmul.msk.f32.gmra.mxu1 %vm5792_vm9, %v3382_v0 }
 0x30b   : > { %3406 = vmatmul.msk.f32.gmra.mxu2 %vm5792_vm9, %v3398_v47  ;;  %v3416_v47 = vld [vmem:[%s5826_s3 + $0x220] sm:$0xff] }
 0x30d   : > { %3374 = vmatmul.msk.f32.gmra.mxu0 %vm5792_vm9, %v3366_v11 }
 0x30e   : > { %3359 = vmatmul.msk.f32.gmra.mxu3 %vm5792_vm9, %v3351_v7 }
 0x30f   : > { %3391 = vmatmul.msk.f32.gmra.mxu1 %vm5792_vm9, %v3383_v51 }
 0x313   : > { %3407 = vmatmul.msk.f32.gmra.mxu2 %vm5792_vm9, %v3399_v30 }
 0x315   : > { %3375 = vmatmul.msk.f32.gmra.mxu0 %vm5792_vm9, %v3367_v35 }
 0x316   : > { %3360 = vmatmul.msk.f32.gmra.mxu3 %vm5792_vm9, %v3352_v8 }
 0x317   : > { %3392 = vmatmul.msk.f32.gmra.mxu1 %vm5792_vm9, %v3384_v52 }
 0x31b   : > { %3408 = vmatmul.msk.f32.gmra.mxu2 %vm5792_vm9, %v3400_v9 }
 0x31d   : > { %3376 = vmatmul.msk.f32.gmra.mxu0 %vm5792_vm9, %v3368_v14 }
 0x31e   : > { %3361 = vmatmul.msk.f32.gmra.mxu3 %vm5792_vm9, %v3353_v56 }
 0x31f   : > { %3393 = vmatmul.msk.f32.gmra.mxu1 %vm5792_vm9, %v3385_v12 }
 0x323   : > { %3409 = vmatmul.msk.f32.gmra.mxu2 %vm5792_vm9, %v3401_v63  ;;  %v3417_v63 = vld [vmem:[%s5826_s3 + $0x228] sm:$0xff] }
 0x325   : > { %3377 = vmatmul.msk.f32.gmra.mxu0 %vm5792_vm9, %v3369_v31 }
 0x326   : > { %3362 = vmatmul.msk.f32.gmra.mxu3 %vm5792_vm9, %v3354_v38 }
 0x327   : > { %3394 = vmatmul.msk.f32.gmra.mxu1 %vm5792_vm9, %v3386_v62 }
 0x32b   : > { %3410 = vmatmul.msk.f32.gmra.mxu2 %vm5792_vm9, %v3402_v41 }
 0x32d   : > { %3378 = vmatmul.msk.f32.gmra.mxu0 %vm5792_vm9, %v3370_v20 }
 0x32e   : > { %3363 = vmatmul.msk.f32.gmra.mxu3 %vm5792_vm9, %v3355_v45 }
 0x32f   : > { %3395 = vmatmul.msk.f32.gmra.mxu1 %vm5792_vm9, %v3387_v6  ;;  %v1911_v2 = vpop.f32.mrf.mxu1 }
 0x330   : > { %v1937_v16 = vmul.f32 %v5059_v25, %v1911_v2 }
 0x333   : > { %3411 = vmatmul.msk.f32.gmra.mxu2 %vm5792_vm9, %v3403_v50 }
 0x335   : > { %v1727_v26 = vpop.f32.mrf.mxu3  ;;  %3379 = vmatmul.msk.f32.gmra.mxu0 %vm5792_vm9, %v3371_v23 }
 0x336   : > { %3420 = vmatmul.msk.f32.vlgmr.msrb.gmra.mxu3 %vm5792_vm9, %v3412_v32  ;;  %v1753_v39 = vmul.f32 %v5048_v53, %v1727_v26 }
 0x337   : > { %3404 = vmatmul.msk.f32.vlgmr.msra.gmra.mxu1 %vm5792_vm9, %v3396_v61  ;;  %v3418_v61 = vld [vmem:[%s5826_s3 + $0x230] sm:$0xff] }
 0x338   : > { %v1819_v28 = vpop.f32.mrf.mxu0 }
 0x339   : > { %v1845_v13 = vmul.f32 %v5064_v40, %v1819_v28  ;;  %v1914_v17 = vpop.f32.mrf.mxu1 }
 0x33a   : > { %v1938_v29 = vmul.f32 %v5059_v25, %v1914_v17 }
 0x33b   : > { %v1853_v33 = vadd.f32 %v1845_v13, %v1753_v39 }
 0x33d   : > { %v1945_v46 = vadd.f32 %v1937_v16, %v1853_v33 }
 0x33e   : > { %3421 = vmatmul.msk.f32.gmra.mxu3 %vm5792_vm9, %v3413_v19  ;;  %v1730_v59 = vpop.f32.mrf.mxu3 }
 0x33f   : > { %v1754_v37 = vmul.f32 %v5048_v53, %v1730_v59 }
 0x342   : > { %v1822_v49 = vpop.f32.mrf.mxu0 }
 0x343   : > { %v1846_v57 = vmul.f32 %v5064_v40, %v1822_v49  ;;  %v3419_v49 = vld [vmem:[%s5826_s3 + $0x238] sm:$0xff]  ;;  %s3697_s3 = scalar_lea.hbm %s3696_s19, 8 }
 0x344   : > { %v1917_v24 = vpop.f32.mrf.mxu1  ;;  %p3698_p11 = scmp.ne.s32.totalorder %s3696_s19, %s3697_s3  ;;  %p3703_p1 = scmp.lt.s32.totalorder %s3701_s18, %s3697_s3 }
 0x345   : > { %v1854_v55 = vadd.f32 %v1846_v57, %v1754_v37  ;;  %v1939_v34 = vmul.f32 %v5059_v25, %v1917_v24 }
 0x346   : > { %3422 = vmatmul.msk.f32.gmra.mxu3 %vm5792_vm9, %v3414_v54  ;;  %v2003_v43 = vpop.f32.mrf.mxu2  ;;  %p3699_p12 = pnand %p3698_p11, %p3879_p5  ;;  %p3704_p2 = por %p3703_p1, %p3702_p0 }
 0x347   : > { %v2029_v48 = vmul.f32 %v5083_v27, %v2003_v43  ;;  %v1946_v15 = vadd.f32 %v1938_v29, %v1854_v55 }
 0x348   : > { %p3700_p13 = pneg %p3699_p12 }
 0x349   : > { %v5089_v22 = vadd.f32 %v2029_v48, %v1945_v46  ;;  %v1733_v58 = vpop.f32.mrf.mxu3 }
 0x34a   : > { %v1755_v5 = vmul.f32 %v5048_v53, %v1733_v58  ;;  %v1825_v1 = vpop.f32.mrf.mxu0  ;;  %p3705_p3 = pnand %p3704_p2, %p3700_p13 }
 0x34b   : > { %v1847_v60 = vmul.f32 %v5064_v40, %v1825_v1 }
 0x34c   : > { %v1920_v10 = vpop.f32.mrf.mxu1 }
 0x34d   : > { %v1855_v36 = vadd.f32 %v1847_v60, %v1755_v5  ;;  %v1940_v51 = vmul.f32 %v5059_v25, %v1920_v10  ;;  %v5140_v10 = vld [vmem:[%s5772_s9 + $0x4] ss:$0 sm:$0xff] }
 0x34e   : > { %3423 = vmatmul.msk.f32.gmra.mxu3 %vm5792_vm9, %v3415_v42  ;;  %v2006_v21 = vpop.f32.mrf.mxu2 }
 0x34f   : > { %v2030_v18 = vmul.f32 %v5083_v27, %v2006_v21  ;;  %v1947_v4 = vadd.f32 %v1939_v34, %v1855_v36 }
 0x351   : > { %v5099_v3 = vadd.f32 %v2030_v18, %v1946_v15  ;;  %v1736_v44 = vpop.f32.mrf.mxu3 }
 0x352   : > { %v1756_v0 = vmul.f32 %v5048_v53, %v1736_v44  ;;  %v1828_v7 = vpop.f32.mrf.mxu0 }
 0x353   : > { %v1848_v30 = vmul.f32 %v5064_v40, %v1828_v7 }
 0x354   : > { %v1923_v11 = vpop.f32.mrf.mxu1 }
 0x355   : > { %v1856_v35 = vadd.f32 %v1848_v30, %v1756_v0  ;;  %v1941_v62 = vmul.f32 %v5059_v25, %v1923_v11 }
 0x356   : > { %3424 = vmatmul.msk.f32.gmra.mxu3 %vm5792_vm9, %v3416_v47  ;;  %v2009_v8 = vpop.f32.mrf.mxu2 }
 0x357   : > { %v2031_v52 = vmul.f32 %v5083_v27, %v2009_v8  ;;  %v1948_v14 = vadd.f32 %v1940_v51, %v1856_v35 }
 0x359   : > { %v2039_v9 = vadd.f32 %v2031_v52, %v1947_v4  ;;  %v1739_v56 = vpop.f32.mrf.mxu3 }
 0x35a   : > { %v1757_v12 = vmul.f32 %v5048_v53, %v1739_v56  ;;  %v1831_v38 = vpop.f32.mrf.mxu0 }
 0x35b   : > { %v1849_v41 = vmul.f32 %v5064_v40, %v1831_v38 }
 0x35c   : > { %v1926_v31 = vpop.f32.mrf.mxu1 }
 0x35d   : > { %v1857_v20 = vadd.f32 %v1849_v41, %v1757_v12  ;;  %v1942_v28 = vmul.f32 %v5059_v25, %v1926_v31 }
 0x35e   : > { %3425 = vmatmul.msk.f32.gmra.mxu3 %vm5792_vm9, %v3417_v63  ;;  %v2012_v45 = vpop.f32.mrf.mxu2 }
 0x35f   : > { %v2032_v6 = vmul.f32 %v5083_v27, %v2012_v45  ;;  %v1949_v32 = vadd.f32 %v1941_v62, %v1857_v20 }
 0x361   : > { %v2040_v2 = vadd.f32 %v2032_v6, %v1948_v14  ;;  %v1742_v50 = vpop.f32.mrf.mxu3 }
 0x362   : > { %v1758_v23 = vmul.f32 %v5048_v53, %v1742_v50  ;;  %v1834_v26 = vpop.f32.mrf.mxu0 }
 0x363   : > { %v1850_v16 = vmul.f32 %v5064_v40, %v1834_v26  ;;  %v5176_v26 = vld [vmem:[%s5772_s9 + $0x5] ss:$0 sm:$0xff] }
 0x364   : > { %v1929_v39 = vpop.f32.mrf.mxu1 }
 0x365   : > { %v1858_v17 = vadd.f32 %v1850_v16, %v1758_v23  ;;  %v1943_v57 = vmul.f32 %v5059_v25, %v1929_v39 }
 0x366   : > { %3426 = vmatmul.msk.f32.gmra.mxu3 %vm5792_vm9, %v3418_v61  ;;  %v2015_v13 = vpop.f32.mrf.mxu2 }
 0x367   : > { %v2033_v33 = vmul.f32 %v5083_v27, %v2015_v13  ;;  %v1950_v59 = vadd.f32 %v1942_v28, %v1858_v17  ;;  %v5182_v17 = vld [vmem:[%s5772_s9 + $0x6] ss:$0 sm:$0xff] }
 0x369   : > { %v2041_v19 = vadd.f32 %v2033_v33, %v1949_v32  ;;  %v1745_v46 = vpop.f32.mrf.mxu3 }
 0x36a   : > { %v1759_v37 = vmul.f32 %v5048_v53, %v1745_v46  ;;  %v1837_v54 = vpop.f32.mrf.mxu0 }
 0x36b   : > { %v1851_v24 = vmul.f32 %v5064_v40, %v1837_v54 }
 0x36c   : > { %v1932_v29 = vpop.f32.mrf.mxu1 }
 0x36d   : > { %v1859_v55 = vadd.f32 %v1851_v24, %v1759_v37  ;;  %v1944_v42 = vmul.f32 %v5059_v25, %v1932_v29 }
 0x36e   : > { %3427 = vmatmul.msk.f32.gmra.mxu3 %vm5792_vm9, %v3419_v49  ;;  %v2018_v51 = vpop.f32.mrf.mxu2 }
 0x36f   : > { %v5132_v48 = vadd.f32 %v1943_v57, %v1859_v55  ;;  %v2034_v63 = vmul.f32 %v5083_v27, %v2018_v51  ;;  %v5196_v57 = vld [vmem:[%s5772_s9 + $0x8] ss:$0 sm:$0xff] }
 0x371   : > { %v1748_v43 = vpop.f32.mrf.mxu3  ;;  %v2042_v31 = vadd.f32 %v2034_v63, %v1950_v59  ;;  %v5189_v59 = vld [vmem:[%s5772_s9 + $0x7] ss:$0 sm:$0xff] }
 0x372   : > { %v1760_v15 = vmul.f32 %v5048_v53, %v1748_v43  ;;  %v1840_v58 = vpop.f32.mrf.mxu0 }
 0x373   : > { %v1852_v1 = vmul.f32 %v5064_v40, %v1840_v58 }
 0x374   : > { %v2279_v5 = vpop.f32.mrf.mxu1 }
 0x375   : > { %v1860_v34 = vadd.f32 %v1852_v1, %v1760_v15  ;;  %v2305_v49 = vmul.f32 %v5182_v17, %v2279_v5 }
 0x376   : > { %v5153_v14 = vpop.f32.mrf.mxu2 }
 0x377   : > { %v5142_v21 = vadd.f32 %v1944_v42, %v1860_v34 }
 0x379   : > { %v2095_v60 = vpop.f32.mrf.mxu3 }
 0x37a   : > { %v2121_v36 = vmul.f32 %v5140_v10, %v2095_v60  ;;  %v2187_v12 = vpop.f32.mrf.mxu0 }
 0x37b   : > { %v2213_v33 = vmul.f32 %v5176_v26, %v2187_v12 }
 0x37c   : > { %v2129_v18 = vadd.f32 %v2121_v36, %v5089_v22  ;;  %v2282_v53 = vpop.f32.mrf.mxu1 }
 0x37e   : > { %v5163_v45 = vpop.f32.mrf.mxu2  ;;  %v2221_v54 = vadd.f32 %v2213_v33, %v2129_v18 }
 0x380   : > { %v2313_v5 = vadd.f32 %v2305_v49, %v2221_v54 }
 0x381   : > { %v2098_v44 = vpop.f32.mrf.mxu3 }
 0x382   : > { %v2122_v4 = vmul.f32 %v5140_v10, %v2098_v44  ;;  %v2190_v20 = vpop.f32.mrf.mxu0 }
 0x383   : > { %v2214_v13 = vmul.f32 %v5176_v26, %v2190_v20 }
 0x384   : > { %v2130_v25 = vadd.f32 %v2122_v4, %v5099_v3  ;;  %v2285_v40 = vpop.f32.mrf.mxu1 }
 0x385   : > { %v2307_v42 = vmul.f32 %v5182_v17, %v2285_v40 }
 0x386   : > { %v2374_v50 = vpop.f32.mrf.mxu2  ;;  %v2222_v46 = vadd.f32 %v2214_v13, %v2130_v25 }
 0x387   : > { %v2398_v58 = vmul.f32 %v5189_v59, %v2374_v50 }
 0x389   : > { %v2101_v0 = vpop.f32.mrf.mxu3 }
 0x38a   : > { %v2123_v47 = vmul.f32 %v5140_v10, %v2101_v0  ;;  %v2193_v32 = vpop.f32.mrf.mxu0 }
 0x38b   : > { %v2215_v29 = vmul.f32 %v5176_v26, %v2193_v32 }
 0x38c   : > { %v2131_v7 = vadd.f32 %v2123_v47, %v2039_v9  ;;  %v2288_v11 = vpop.f32.mrf.mxu1 }
 0x38d   : > { %v2308_v40 = vmul.f32 %v5182_v17, %v2288_v11 }
 0x38e   : > { %v2377_v39 = vpop.f32.mrf.mxu2  ;;  %v2223_v1 = vadd.f32 %v2215_v29, %v2131_v7 }
 0x38f   : > { %v2399_v25 = vmul.f32 %v5189_v59, %v2377_v39 }
 0x390   : > { %v2315_v4 = vadd.f32 %v2307_v42, %v2223_v1 }
 0x391   : > { %v2104_v30 = vpop.f32.mrf.mxu3 }
 0x392   : > { %v2124_v8 = vmul.f32 %v5140_v10, %v2104_v30  ;;  %v2196_v28 = vpop.f32.mrf.mxu0 }
 0x393   : > { %v2216_v44 = vmul.f32 %v5176_v26, %v2196_v28 }
 0x394   : > { %v2132_v35 = vadd.f32 %v2124_v8, %v2040_v2  ;;  %v5150_v52 = vpop.f32.mrf.mxu1  ;;  %v2407_v8 = vadd.f32 %v2399_v25, %v2315_v4 }
 0x395   : > { %v2309_v50 = vmul.f32 %v5182_v17, %v5150_v52  ;;  %v2035_v52 = vmul.f32 %v5083_v27, %v5153_v14 }
 0x396   : > { %v2380_v24 = vpop.f32.mrf.mxu2  ;;  %v2224_v7 = vadd.f32 %v2216_v44, %v2132_v35 }
 0x397   : > { %v2043_v14 = vadd.f32 %v2035_v52, %v5132_v48 }
 0x399   : > { %v2107_v22 = vpop.f32.mrf.mxu3 }
 0x39a   : > { %v2125_v56 = vmul.f32 %v5140_v10, %v2107_v22  ;;  %v2199_v34 = vpop.f32.mrf.mxu0 }
 0x39b   : > { %v2217_v20 = vmul.f32 %v5176_v26, %v2199_v34 }
 0x39c   : > { %v5155_v3 = vadd.f32 %v2125_v56, %v2041_v19  ;;  %v5158_v38 = vpop.f32.mrf.mxu1  ;;  %v2306_v19 = vmul.f32 %v5182_v17, %v2282_v53 }
 0x39e   : > { %v2314_v15 = vadd.f32 %v2306_v19, %v2222_v46  ;;  %v2383_v22 = vpop.f32.mrf.mxu2  ;;  %v2225_v39 = vadd.f32 %v2217_v20, %v5155_v3 }
 0x3a0   : > { %v2406_v53 = vadd.f32 %v2398_v58, %v2314_v15  ;;  %v2317_v46 = vadd.f32 %v2309_v50, %v2225_v39  ;;  %v2310_v15 = vmul.f32 %v5182_v17, %v5158_v38 }
 0x3a1   : > { %v2110_v9 = vpop.f32.mrf.mxu3 }
 0x3a2   : > { %v2126_v62 = vmul.f32 %v5140_v10, %v2110_v9  ;;  %v2202_v63 = vpop.f32.mrf.mxu0 }
 0x3a3   : > { %v2218_v49 = vmul.f32 %v5176_v26, %v2202_v63 }
 0x3a4   : > { %v5161_v41 = vadd.f32 %v2126_v62, %v2042_v31  ;;  %v5167_v2 = vpop.f32.mrf.mxu1  ;;  %v2316_v31 = vadd.f32 %v2308_v40, %v2224_v7  ;;  %v2400_v62 = vmul.f32 %v5189_v59, %v2380_v24 }
 0x3a6   : > { %v2408_v32 = vadd.f32 %v2400_v62, %v2316_v31  ;;  %v2386_v33 = vpop.f32.mrf.mxu2  ;;  %v2226_v42 = vadd.f32 %v2218_v49, %v5161_v41 }
 0x3a7   : > { %v2402_v41 = vmul.f32 %v5189_v59, %v2386_v33 }
 0x3a8   : > { %v2318_v38 = vadd.f32 %v2310_v15, %v2226_v42 }
 0x3a9   : > { %v5165_v6 = vpop.f32.mrf.mxu3 }
 0x3aa   : > { %v2205_v29 = vpop.f32.mrf.mxu0  ;;  %v2127_v24 = vmul.f32 %v5140_v10, %v5165_v6  ;;  %v2036_v6 = vmul.f32 %v5083_v27, %v5163_v45  ;;  %v2311_v45 = vmul.f32 %v5182_v17, %v5167_v2 }
 0x3ac   : > { %v5171_v61 = vpop.f32.mrf.mxu1  ;;  %v2044_v27 = vadd.f32 %v2036_v6, %v5142_v21 }
 0x3ae   : > { %v2389_v44 = vpop.f32.mrf.mxu2 }
 0x3b1   : > { %v5169_v23 = vpop.f32.mrf.mxu3 }
 0x3b2   : > { %v2128_v4 = vmul.f32 %v5140_v10, %v5169_v23 }
 0x3b4   : > { %v2371_v37 = vpop.f32.mrf.mxu1  ;;  %v2136_v10 = vadd.f32 %v2128_v4, %v2044_v27 }
 0x3b5   : > { %v2397_v55 = vmul.f32 %v5189_v59, %v2371_v37  ;;  %v2401_v37 = vmul.f32 %v5189_v59, %v2383_v22 }
 0x3b7   : > { %v2405_v18 = vadd.f32 %v2397_v55, %v2313_v5  ;;  %v2409_v58 = vadd.f32 %v2401_v37, %v2317_v46 }
 0x3b9   : > { %v2463_v16 = vpop.f32.mrf.mxu3 }
 0x3ba   : > { %v2489_v60 = vmul.f32 %v5196_v57, %v2463_v16 }
 0x3bc   : > { %v5205_v0 = vadd.f32 %v2489_v60, %v2405_v18  ;;  %v2135_v60 = vadd.f32 %v2127_v24, %v2043_v14 }
 0x3be   : > { %v3428_v56 = vmul.f32 -1.442695, %v5205_v0 }
 0x3c0   : > { %3607 = vpow2.f32 %v3428_v56 }
 0x3c1   : > { %v2466_v43 = vpop.f32.mrf.mxu3 }
 0x3c2   : > { %v2490_v36 = vmul.f32 %v5196_v57, %v2466_v43 }
 0x3c4   : > { %v5207_v47 = vadd.f32 %v2490_v36, %v2406_v53  ;;  %v2219_v36 = vmul.f32 %v5176_v26, %v2205_v29 }
 0x3c6   : > { %v3429_v12 = vmul.f32 -1.442695, %v5207_v47  ;;  %v3608_v13 = vpop.eup %3607  ;;  %v2227_v25 = vadd.f32 %v2219_v36, %v2135_v60 }
 0x3c7   : > { %v5229_v3 = vadd.f32 1.0, %v3608_v13 }
 0x3c8   : > { %3609 = vpow2.f32 %v3429_v12  ;;  %v2319_v2 = vadd.f32 %v2311_v45, %v2227_v25  ;;  %v2403_v12 = vmul.f32 %v5189_v59, %v2389_v44 }
 0x3c9   : > { %v2469_v51 = vpop.f32.mrf.mxu3  ;;  %v2548_v14 = vand.u32 2147483648, %v5229_v3  ;;  %vm2542_vm13 = vweird.f32 %v5229_v3 }
 0x3ca   : > { %v2491_v30 = vmul.f32 %v5196_v57, %v2469_v51  ;;  %v2208_v51 = vpop.f32.mrf.mxu0 }
 0x3cb   : > { %v2220_v21 = vmul.f32 %v5176_v26, %v2208_v51  ;;  %v2312_v26 = vmul.f32 %v5182_v17, %v5171_v61  ;;  %v2549_v25 = vor.u32 1.1754944e-38, %v2548_v14 }
 0x3cc   : > { %v5213_v9 = vadd.f32 %v2491_v30, %v2407_v8  ;;  %v2410_v30 = vadd.f32 %v2402_v41, %v2318_v38 }
 0x3cd   : > { %v2228_v50 = vadd.f32 %v2220_v21, %v2136_v10 }
 0x3ce   : > { %v3430_v11 = vmul.f32 -1.442695, %v5213_v9  ;;  %v3610_v19 = vpop.eup %3609 }
 0x3cf   : > { %v5233_v55 = vadd.f32 1.0, %v3610_v19  ;;  %v2320_v49 = vadd.f32 %v2312_v26, %v2228_v50 }
 0x3d0   : > { %3611 = vpow2.f32 %v3430_v11 }
 0x3d1   : > { %v2472_v35 = vpop.f32.mrf.mxu3  ;;  %v2563_v6 = vand.u32 2147483648, %v5233_v55  ;;  %vm2557_vm6 = vweird.f32 %v5233_v55 }
 0x3d2   : > { %v2492_v28 = vmul.f32 %v5196_v57, %v2472_v35 }
 0x3d4   : > { %v5222_v16 = vadd.f32 %v2492_v28, %v2408_v32  ;;  %v2392_v32 = vpop.f32.mrf.mxu2  ;;  %v2411_v28 = vadd.f32 %v2403_v12, %v2319_v2 }
 0x3d6   : > { %v3431_v54 = vmul.f32 -1.442695, %v5222_v16  ;;  %v3612_v34 = vpop.eup %3611 }
 0x3d7   : > { %v5248_v18 = vadd.f32 1.0, %v3612_v34 }
 0x3d8   : > { %3613 = vpow2.f32 %v3431_v54  ;;  %v2404_v54 = vmul.f32 %v5189_v59, %v2392_v32  ;;  %v2546_v59 = vand.u32 2147483647, %v5229_v3 }
 0x3d9   : > { %v2475_v43 = vpop.f32.mrf.mxu3  ;;  %3615 = vrcp.f32 %v5229_v3  ;;  %vm2572_vm10 = vweird.f32 %v5248_v18 }
 0x3da   : > { %v2493_v1 = vmul.f32 %v5196_v57, %v2475_v43  ;;  %3617 = vrcp.f32 %v5233_v55  ;;  %vm5318_vm14 = vcmp.eq.f32.partialorder %v2546_v59, 8.507059e+37 }
 0x3dc   : > { %v5241_v5 = vadd.f32 %v2493_v1, %v2409_v58  ;;  %v2412_v1 = vadd.f32 %v2404_v54, %v2320_v49 }
 0x3de   : > { %v3432_v53 = vmul.f32 -1.442695, %v5241_v5  ;;  %v3614_v48 = vpop.eup %3613 }
 0x3df   : > { %v5256_v7 = vpop.eup %3615  ;;  %v5259_v8 = vadd.f32 1.0, %v3614_v48 }
 0x3e0   : > { %3619 = vpow2.f32 %v3432_v53  ;;  %v5262_v56 = vpop.eup %3617  ;;  %v2538_v31 = vmul.f32 %v5256_v7, %v5229_v3  ;;  %vm2543_vm15 = vweird.f32 %v5256_v7  ;;  %v2561_v3 = vand.u32 2147483647, %v5233_v55 }
 0x3e1   : > { %v2478_v40 = vpop.f32.mrf.mxu3  ;;  %3621 = vrcp.f32 %v5248_v18  ;;  %v2553_v62 = vmul.f32 %v5262_v56, %v5233_v55  ;;  %vm2558_vm1 = vweird.f32 %v5262_v56  ;;  %vm5311_vm4 = vmor %vm2542_vm13, %vm2543_vm15  ;;  %v2591_v50 = vand.u32 2147483647, %v5259_v8 }
 0x3e2   : > { %v2494_v22 = vmul.f32 %v5196_v57, %v2478_v40  ;;  %3623 = vrcp.f32 %v5259_v8  ;;  %v2539_v13 = vsub.f32 1.0, %v2538_v31  ;;  %vm5322_vm5 = vmor %vm2557_vm6, %vm2558_vm1  ;;  %vm2562_vm7 = vcmp.eq.f32.partialorder %v2561_v3, 8.507059e+37  ;;  %v2695_v3 = vld [vmem:[%s5773_s10] sm:$0xff] }
 0x3e3   : > { %v2554_v33 = vsub.f32 1.0, %v2553_v62  ;;  %v2576_v31 = vand.u32 2147483647, %v5248_v18  ;;  %vm2587_vm1 = vweird.f32 %v5259_v8  ;;  %vm5381_vm6 = vcmp.eq.f32.partialorder %v2591_v50, 8.507059e+37 }
 0x3e4   : > { %v5265_v23 = vadd.f32 %v2494_v22, %v2410_v30  ;;  %v2540_v52 = vmul.f32 %v5256_v7, %v2539_v13  ;;  %v2564_v22 = vor.u32 1.1754944e-38, %v2563_v6  ;;  %v2698_v6 = vld [vmem:[%s5773_s10 + $0x18] sm:$0xff] }
 0x3e5   : > { %v2555_v29 = vmul.f32 %v5262_v56, %v2554_v33  ;;  %vm2577_vm15 = vcmp.eq.f32.partialorder %v2576_v31, 8.507059e+37  ;;  %2715 = vmatpush.msrb.mxu0 %v2698_v6 }
 0x3e6   : > { %v3620_v63 = vpop.eup %3619  ;;  %v3433_v20 = vmul.f32 -1.442695, %v5265_v23  ;;  %v2541_v36 = vadd.f32 %v5256_v7, %v2540_v52 }
 0x3e7   : > { %v5274_v11 = vadd.f32 1.0, %v3620_v63  ;;  %v5276_v35 = vpop.eup %3621  ;;  %v2556_v38 = vadd.f32 %v5262_v56, %v2555_v29  ;;  %v2578_v63 = vand.u32 2147483648, %v5248_v18 }
 0x3e8   : > { %3625 = vpow2.f32 %v3433_v20  ;;  %v2568_v46 = vmul.f32 %v5276_v35, %v5248_v18  ;;  %v5284_v37 = vpop.eup %3623  ;;  %v2545_v40 = vsel %vm5311_vm4, %v5256_v7, %v2541_v36  ;;  %vm2573_vm8 = vweird.f32 %v5276_v35 }
 0x3e9   : > { %3627 = vrcp.f32 %v5274_v11  ;;  %v2481_v39 = vpop.f32.mrf.mxu3  ;;  %v2583_v58 = vmul.f32 %v5284_v37, %v5259_v8  ;;  %v2560_v30 = vsel %vm5322_vm5, %v5262_v56, %v2556_v38  ;;  %v2550_v62 = vsel %vm5318_vm14, %v2549_v25, %v2545_v40  ;;  %vm5350_vm12 = vmor %vm2572_vm10, %vm2573_vm8 }
 0x3ea   : > { %v2495_v19 = vmul.f32 %v5196_v57, %v2481_v39  ;;  %v2569_v15 = vsub.f32 1.0, %v2568_v46  ;;  %v2565_v20 = vsel %vm2562_vm7, %v2564_v22, %v2560_v30  ;;  %vm2588_vm3 = vweird.f32 %v5284_v37 }
 0x3eb   : > { %v2584_v48 = vsub.f32 1.0, %v2583_v58  ;;  %v2579_v13 = vor.u32 1.1754944e-38, %v2578_v63  ;;  %v5365_v46 = vmul.f32 %v2550_v62, %v5205_v0  ;;  %v5370_v54 = vmul.f32 %v2565_v20, %v5207_v47  ;;  %vm5372_vm13 = vmor %vm2587_vm1, %vm2588_vm3 }
 0x3ec   : > { %v5287_v61 = vadd.f32 %v2495_v19, %v2411_v28  ;;  %v2570_v53 = vmul.f32 %v5276_v35, %v2569_v15  ;;  %v2593_v28 = vand.u32 2147483648, %v5259_v8  ;;  %vm2602_vm4 = vweird.f32 %v5274_v11 }
 0x3ed   : > { %v2585_v55 = vmul.f32 %v5284_v37, %v2584_v48  ;;  %v2606_v29 = vand.u32 2147483647, %v5274_v11  ;;  %v2666_v45 = vsel %vm5791_vm11, %v5365_v46, 0.0  ;;  %v2667_v25 = vsel %vm5791_vm11, %v5370_v54, 0.0 }
 0x3ee   : > { %v3626_v17 = vpop.eup %3625  ;;  %v3434_v24 = vmul.f32 -1.442695, %v5287_v61  ;;  %v2571_v2 = vadd.f32 %v5276_v35, %v2570_v53  ;;  %v2594_v47 = vor.u32 1.1754944e-38, %v2593_v28 }
 0x3ef   : > { %v5292_v43 = vpop.eup %3627  ;;  %v5296_v42 = vadd.f32 1.0, %v3626_v17  ;;  %v2586_v18 = vadd.f32 %v5284_v37, %v2585_v55  ;;  %vm2607_vm8 = vcmp.eq.f32.partialorder %v2606_v29, 8.507059e+37 }
 0x3f0   : > { %v2598_v34 = vmul.f32 %v5292_v43, %v5274_v11  ;;  %3629 = vpow2.f32 %v3434_v24  ;;  %v2575_v39 = vsel %vm5350_vm12, %v5276_v35, %v2571_v2  ;;  %vm2603_vm2 = vweird.f32 %v5292_v43 }
 0x3f1   : > { %3631 = vrcp.f32 %v5296_v42  ;;  %v2484_v60 = vpop.f32.mrf.mxu3  ;;  %v2608_v35 = vand.u32 2147483648, %v5274_v11  ;;  %v2580_v17 = vsel %vm2577_vm15, %v2579_v13, %v2575_v39  ;;  %v2590_v8 = vsel %vm5372_vm13, %v5284_v37, %v2586_v18  ;;  %vm5387_vm14 = vmor %vm2602_vm4, %vm2603_vm2 }
 0x3f2   : > { %v2496_v41 = vmul.f32 %v5196_v57, %v2484_v60  ;;  %v2599_v4 = vsub.f32 1.0, %v2598_v34  ;;  %v5400_v59 = vmul.f32 %v2580_v17, %v5213_v9  ;;  %v2623_v14 = vand.u32 2147483648, %v5296_v42 }
 0x3f3   : > { %v2609_v34 = vor.u32 1.1754944e-38, %v2608_v35  ;;  %vm2617_vm7 = vweird.f32 %v5296_v42  ;;  %v2621_v60 = vand.u32 2147483647, %v5296_v42  ;;  %v2595_v36 = vsel %vm5381_vm6, %v2594_v47, %v2590_v8 }
 0x3f4   : > { %v5316_v27 = vadd.f32 %v2496_v41, %v2412_v1  ;;  %v2600_v7 = vmul.f32 %v5292_v43, %v2599_v4  ;;  %v2624_v57 = vor.u32 1.1754944e-38, %v2623_v14  ;;  %v3745_v2 = vmov 64.0  }
 0x3f5   : > { %vm2622_vm3 = vcmp.eq.f32.partialorder %v2621_v60, 8.507059e+37  ;;  %v2669_v55 = vsel %vm5791_vm11, %v5400_v59, 0.0 }
 0x3f6   : > { %v3630_v51 = vpop.eup %3629  ;;  %v3435_v10 = vmul.f32 -1.442695, %v5316_v27  ;;  %v2601_v33 = vadd.f32 %v5292_v43, %v2600_v7  ;;  %v2668_v7 = vadd.f32 %v2667_v25, %v2666_v45 }
 0x3f7   : > { %v5334_v21 = vpop.eup %3631  ;;  %v5339_v12 = vadd.f32 1.0, %v3630_v51  ;;  %v5436_v51 = vmul.f32 %v2595_v36, %v5222_v16 }
 0x3f8   : > { %v2613_v56 = vmul.f32 %v5334_v21, %v5296_v42  ;;  %3633 = vpow2.f32 %v3435_v10  ;;  %v2605_v11 = vsel %vm5387_vm14, %v5292_v43, %v2601_v33  ;;  %vm2618_vm5 = vweird.f32 %v5334_v21  ;;  %v2697_v43 = vld [vmem:[%s5773_s10 + $0x10] sm:$0xff]  ;;  %v2696_v42 = vld [vmem:[%s5773_s10 + $0x8] sm:$0xff] }
 0x3f9   : > { %3635 = vrcp.f32 %v5339_v12  ;;  %v2610_v38 = vsel %vm2607_vm8, %v2609_v34, %v2605_v11  ;;  %vm5416_vm10 = vmor %vm2617_vm7, %vm2618_vm5  ;;  %v2636_v53 = vand.u32 2147483647, %v5339_v12  ;;  %v2638_v48 = vand.u32 2147483648, %v5339_v12  ;;  %2716 = vmatpush.msrb.mxu0 %v2697_v43 }
 0x3fa   : > { %v2614_v32 = vsub.f32 1.0, %v2613_v56  ;;  %vm2632_vm2 = vweird.f32 %v5339_v12  ;;  %v5440_v22 = vmul.f32 %v2610_v38, %v5241_v5  ;;  %v2671_v56 = vsel %vm5791_vm11, %v5436_v51, 0.0 }
 0x3fb   : > { %2717 = vmatpush.msrb.mxu0 %v2696_v42  ;;  %vm2637_vm1 = vcmp.eq.f32.partialorder %v2636_v53, 8.507059e+37  ;;  %v2670_v62 = vadd.f32 %v2669_v55, %v2668_v7  ;;  %vm2749_vm8 = vcmask 1041408   ;;  %v2804_v55 = vld [vmem:[%s5777_s14 + $0x18] sm:$0xff] }
 0x3fc   : > { %v2615_v19 = vmul.f32 %v5334_v21, %v2614_v32  ;;  %v2673_v20 = vsel %vm5791_vm11, %v5440_v22, 0.0  ;;  %2845 = vmatpush.msrb.mxu2 %v2804_v55 }
 0x3fd   : > { %2718 = vmatpush.msrb.mxu0 %v2695_v3  ;;  %v2672_v28 = vadd.f32 %v2671_v56, %v2670_v62 }
 0x3fe   : > { %v3634_v49 = vpop.eup %3633  ;;  %v2616_v1 = vadd.f32 %v5334_v21, %v2615_v19 }
 0x3ff   : > { %v3636_v0 = vpop.eup %3635  ;;  %v5391_v58 = vadd.f32 1.0, %v3634_v49  ;;  %v2674_v33 = vadd.f32 %v2673_v20, %v2672_v28 }
 0x400   : > { %v2628_v37 = vmul.f32 %v3636_v0, %v5339_v12  ;;  %v2620_v44 = vsel %vm5416_vm10, %v5334_v21, %v2616_v1  ;;  %vm2633_vm12 = vweird.f32 %v3636_v0  ;;  %v2639_v21 = vor.u32 1.1754944e-38, %v2638_v48 }
 0x401   : > { %3637 = vrcp.f32 %v5391_v58  ;;  %v2625_v10 = vsel %vm2622_vm3, %v2624_v57, %v2620_v44  ;;  %vm2634_vm15 = vmor %vm2632_vm2, %vm2633_vm12  ;;  %v2653_v26 = vand.u32 2147483648, %v5391_v58  ;;  %v2651_v39 = vand.u32 2147483647, %v5391_v58 }
 0x402   : > { %v2629_v9 = vsub.f32 1.0, %v2628_v37  ;;  %3639 = vrcp.f32 %v3745_v2  ;;  %v5448_v5 = vmul.f32 %v2625_v10, %v5265_v23  ;;  %vm2647_vm4 = vweird.f32 %v5391_v58  ;;  %v2744_v2 = vld [vmem:[%s5776_s13] sm:$0x1] }
 0x403   : > { %v2654_v19 = vor.u32 1.1754944e-38, %v2653_v26  ;;  %vm2652_vm14 = vcmp.eq.f32.partialorder %v2651_v39, 8.507059e+37  ;;  %vm2745_vm2 = vcmask 15360  }
 0x404   : > { %v2630_v4 = vmul.f32 %v3636_v0, %v2629_v9  ;;  %v2675_v23 = vsel %vm5791_vm11, %v5448_v5, 0.0  ;;  %v2743_v9 = vld [vmem:[%s5775_s12] sm:$0x3] }
 0x405   : > { %v2676_v17 = vadd.f32 %v2675_v23, %v2674_v33  ;;  %3438 = vmatpush.msk.msrb.mxu1 %vm2749_vm8, %v2743_v9 }
 0x406   : > { %v2631_v40 = vadd.f32 %v3636_v0, %v2630_v4 }
 0x407   : > { %v3638_v30 = vpop.eup %3637 }
 0x408   : > { %v2635_v63 = vsel %vm2634_vm15, %v3636_v0, %v2631_v40  ;;  %v2643_v16 = vmul.f32 %v3638_v30, %v5391_v58  ;;  %vm2648_vm13 = vweird.f32 %v3638_v30  ;;  %v3640_v18 = vpop.eup %3639 }
 0x409   : > { %v2640_v12 = vsel %vm2637_vm1, %v2639_v21, %v2635_v63  ;;  %vm2649_vm6 = vmor %vm2647_vm4, %vm2648_vm13  ;;  %v2688_v49 = vmul.f32 64.0, %v3640_v18  ;;  %vm2692_vm5 = vweird.f32 %v3640_v18  ;;  %v2803_v63 = vld [vmem:[%s5777_s14 + $0x10] sm:$0xff] }
 0x40a   : > { %v2644_v31 = vsub.f32 1.0, %v2643_v16  ;;  %v5454_v50 = vmul.f32 %v2640_v12, %v5287_v61  ;;  %v2802_v12 = vld [vmem:[%s5777_s14 + $0x8] sm:$0xff]  ;;  %2846 = vmatpush.msrb.mxu2 %v2803_v63 }
 0x40b   : > { %v2689_v24 = vsub.f32 1.0, %v2688_v49 }
 0x40c   : > { %v2645_v32 = vmul.f32 %v3638_v30, %v2644_v31  ;;  %v2677_v35 = vsel %vm5791_vm11, %v5454_v50, 0.0  ;;  %v2801_v31 = vld [vmem:[%s5777_s14] sm:$0xff]  ;;  %2847 = vmatpush.msrb.mxu2 %v2802_v12 }
 0x40d   : > { %v2678_v0 = vadd.f32 %v2677_v35, %v2676_v17  ;;  %v2690_v58 = vmul.f32 %v3640_v18, %v2689_v24 }
 0x40e   : > { %v2646_v13 = vadd.f32 %v3638_v30, %v2645_v32  ;;  %2848 = vmatpush.msrb.mxu2 %v2801_v31 }
 0x40f   : > { %v2691_v37 = vadd.f32 %v3640_v18, %v2690_v58 }
 0x410   : > { %v2650_v61 = vsel %vm2649_vm6, %v3638_v30, %v2646_v13 }
 0x411   : > { %v2655_v52 = vsel %vm2652_vm14, %v2654_v19, %v2650_v61  ;;  %v2693_v6 = vsel %vm2692_vm5, %v3640_v18, %v2691_v37 }
 0x412   : > { %v5463_v29 = vmul.f32 %v2655_v52, %v5316_v27  ;;  %v2699_v27 = vld [vmem:[%s5774_s11] sm:$0x1] }
 0x414   : > { %v2679_v8 = vsel %vm5791_vm11, %v5463_v29, 0.0 }
 0x415   : > { %v2680_v47 = vadd.f32 %v2679_v8, %v2678_v0 }
 0x417   : > { %v2681_v15 = vrot.slane %v2680_v47, 4 }
 0x419   : > { %v2682_v11 = vadd.f32 %v2681_v15, %v2680_v47 }
 0x41b   : > { %v2683_v1 = vrot.slane %v2682_v11, 2 }
 0x41d   : > { %v2684_v34 = vadd.f32 %v2683_v1, %v2682_v11 }
 0x41f   : > { %v2685_v14 = vrot.slane %v2684_v34, 1 }
 0x421   : > { %v2686_v43 = vadd.f32 %v2685_v14, %v2684_v34 }
 0x423   : > { %v2694_v60 = vmul.f32 %v2693_v6, %v2686_v43 }
 0x425   : > { %3436 = vmatmul.msk.f32.vlgmr.msrb.gmra.mxu0 %vm5791_vm11, %v2694_v60 }
 0x4a2   : > { %v2720_v36 = vpop.f32.mrf.mxu0 }
 0x4a3   : > { %v2721_v38 = vadd.f32 %v2720_v36, %v2699_v27 }
 0x4a5   : > { %v3437_v41 = vmul.f32 -1.442695, %v2721_v38 }
 0x4a7   : > { %3641 = vpow2.f32 %v3437_v41 }
 0x4ad   : > { %v3642_v53 = vpop.eup %3641 }
 0x4ae   : > { %v2726_v48 = vadd.f32 1.0, %v3642_v53 }
 0x4b0   : > { %3643 = vrcp.f32 %v2726_v48  ;;  %v2738_v45 = vand.u32 2147483648, %v2726_v48  ;;  %v2736_v57 = vand.u32 2147483647, %v2726_v48  ;;  %vm2732_vm10 = vweird.f32 %v2726_v48 }
 0x4b2   : > { %v2739_v40 = vor.u32 1.1754944e-38, %v2738_v45  ;;  %vm2737_vm3 = vcmp.eq.f32.partialorder %v2736_v57, 8.507059e+37 }
 0x4b6   : > { %v3644_v42 = vpop.eup %3643 }
 0x4b7   : > { %v2728_v44 = vmul.f32 %v3644_v42, %v2726_v48  ;;  %vm2733_vm7 = vweird.f32 %v3644_v42  ;;  %v3542_v48 = vld [vmem:[%s5780_s17] ss:$0 sm:$0xff] }
 0x4b8   : > { %vm2734_vm12 = vmor %vm2732_vm10, %vm2733_vm7 }
 0x4b9   : > { %v2729_v4 = vsub.f32 1.0, %v2728_v44 }
 0x4bb   : > { %v2730_v25 = vmul.f32 %v3644_v42, %v2729_v4 }
 0x4bd   : > { %v2731_v3 = vadd.f32 %v3644_v42, %v2730_v25 }
 0x4bf   : > { %v2735_v30 = vsel %vm2734_vm12, %v3644_v42, %v2731_v3 }
 0x4c0   : > { %v2740_v10 = vsel %vm2737_vm3, %v2739_v40, %v2735_v30 }
 0x4c1   : > { %v2742_v21 = vmul.f32 %v2740_v10, %v2721_v38 }
 0x4c3   : > { %3439 = vmatmul.msk.f32.vlgmr.msrb.gmra.mxu1 %vm2745_vm2, %v2742_v21 }
 0x540   : > { %v2770_v16 = vpop.f32.mrf.mxu1 }
 0x541   : > { %v2771_v7 = vadd.f32 %v2770_v16, %v2744_v2 }
 0x543   : > { %v3440_v56 = vmul.f32 -1.442695, %v2771_v7 }
 0x545   : > { %3645 = vpow2.f32 %v3440_v56 }
 0x54b   : > { %v3646_v62 = vpop.eup %3645 }
 0x54c   : > { %v2776_v20 = vadd.f32 1.0, %v3646_v62 }
 0x54e   : > { %3647 = vrcp.f32 %v2776_v20  ;;  %v2788_v18 = vand.u32 2147483648, %v2776_v20  ;;  %v2786_v23 = vand.u32 2147483647, %v2776_v20  ;;  %vm2782_vm1 = vweird.f32 %v2776_v20 }
 0x550   : > { %v2789_v33 = vor.u32 1.1754944e-38, %v2788_v18  ;;  %vm2787_vm4 = vcmp.eq.f32.partialorder %v2786_v23, 8.507059e+37 }
 0x554   : > { %v3648_v26 = vpop.eup %3647 }
 0x555   : > { %v2778_v32 = vmul.f32 %v3648_v26, %v2776_v20  ;;  %vm2783_vm15 = vweird.f32 %v3648_v26 }
 0x556   : > { %vm2784_vm13 = vmor %vm2782_vm1, %vm2783_vm15 }
 0x557   : > { %v2779_v39 = vsub.f32 1.0, %v2778_v32 }
 0x559   : > { %v2780_v28 = vmul.f32 %v3648_v26, %v2779_v39 }
 0x55b   : > { %v2781_v13 = vadd.f32 %v3648_v26, %v2780_v28 }
 0x55d   : > { %v2785_v19 = vsel %vm2784_vm13, %v3648_v26, %v2781_v13 }
 0x55e   : > { %v2790_v35 = vsel %vm2787_vm4, %v2789_v33, %v2785_v19 }
 0x55f   : > { %v2792_v61 = vperm.slane %v2790_v35, 0 }
 0x561   : > { %v2793_v49 = vmul.f32 %v2792_v61, %v5365_v46  ;;  %v2794_v17 = vmul.f32 %v2792_v61, %v5370_v54  ;;  %v2795_v52 = vmul.f32 %v2792_v61, %v5400_v59  ;;  %v2796_v0 = vmul.f32 %v2792_v61, %v5436_v51  ;;  %v2875_v51 = vld [vmem:[%s5779_s16 + $0x8] sm:$0xff] }
 0x562   : > { %v2797_v8 = vmul.f32 %v2792_v61, %v5440_v22  ;;  %v2798_v46 = vmul.f32 %v2792_v61, %v5448_v5  ;;  %v2799_v54 = vmul.f32 %v2792_v61, %v5454_v50  ;;  %v2800_v59 = vmul.f32 %v2792_v61, %v5463_v29  ;;  %v2874_v22 = vld [vmem:[%s5779_s16] sm:$0xff]  ;;  %2918 = vmatpush.msra.mxu0 %v2875_v51 }
 0x563   : > { %3441 = vmatmul.msk.f32.vlgmr.msrb.gmra.mxu2 %vm5791_vm11, %v2793_v49  ;;  %v3541_v5 = vld [vmem:[%s5778_s15] ss:$0 sm:$0xff] }
 0x564   : > { %2919 = vmatpush.msra.mxu0 %v2874_v22 }
 0x56b   : > { %3442 = vmatmul.msk.f32.gmra.mxu2 %vm5791_vm11, %v2794_v17 }
 0x573   : > { %3443 = vmatmul.msk.f32.gmra.mxu2 %vm5791_vm11, %v2795_v52 }
 0x57b   : > { %3444 = vmatmul.msk.f32.gmra.mxu2 %vm5791_vm11, %v2796_v0 }
 0x583   : > { %3445 = vmatmul.msk.f32.gmra.mxu2 %vm5791_vm11, %v2797_v8 }
 0x58b   : > { %3446 = vmatmul.msk.f32.gmra.mxu2 %vm5791_vm11, %v2798_v46 }
 0x593   : > { %3447 = vmatmul.msk.f32.gmra.mxu2 %vm5791_vm11, %v2799_v54 }
 0x59b   : > { %3448 = vmatmul.msk.f32.gmra.mxu2 %vm5791_vm11, %v2800_v59 }
 0x5e6   : > { %v2850_v50 = vpop.f32.mrf.mxu2 }
 0x5e7   : > { %v2851_v24 = vadd.f32 %v3541_v5, %v2850_v50 }
 0x5e9   : > { %3449 = vmatmul.msk.f32.vlgmr.msra.gmra.mxu0 %vm584_vm0, %v2851_v24 }
 0x5ee   : > { %v2853_v29 = vpop.f32.mrf.mxu2 }
 0x5ef   : > { %v2854_v47 = vadd.f32 %v3541_v5, %v2853_v29 }
 0x5f1   : > { %3450 = vmatmul.msk.f32.gmra.mxu0 %vm584_vm0, %v2854_v47 }
 0x5f6   : > { %v2856_v15 = vpop.f32.mrf.mxu2 }
 0x5f7   : > { %v2857_v58 = vadd.f32 %v3541_v5, %v2856_v15 }
 0x5f9   : > { %3451 = vmatmul.msk.f32.gmra.mxu0 %vm584_vm0, %v2857_v58 }
 0x5fe   : > { %v2859_v11 = vpop.f32.mrf.mxu2 }
 0x5ff   : > { %v2860_v1 = vadd.f32 %v3541_v5, %v2859_v11 }
 0x601   : > { %3452 = vmatmul.msk.f32.gmra.mxu0 %vm584_vm0, %v2860_v1 }
 0x606   : > { %v2862_v37 = vpop.f32.mrf.mxu2 }
 0x607   : > { %v2863_v34 = vadd.f32 %v3541_v5, %v2862_v37 }
 0x609   : > { %3453 = vmatmul.msk.f32.gmra.mxu0 %vm584_vm0, %v2863_v34 }
 0x60e   : > { %v2865_v14 = vpop.f32.mrf.mxu2 }
 0x60f   : > { %v2866_v6 = vadd.f32 %v3541_v5, %v2865_v14 }
 0x611   : > { %3454 = vmatmul.msk.f32.gmra.mxu0 %vm584_vm0, %v2866_v6 }
 0x616   : > { %v2868_v43 = vpop.f32.mrf.mxu2 }
 0x617   : > { %v2869_v60 = vadd.f32 %v3541_v5, %v2868_v43 }
 0x619   : > { %3455 = vmatmul.msk.f32.gmra.mxu0 %vm584_vm0, %v2869_v60 }
 0x61e   : > { %v2871_v27 = vpop.f32.mrf.mxu2 }
 0x61f   : > { %v2872_v9 = vadd.f32 %v3541_v5, %v2871_v27 }
 0x621   : > { %3456 = vmatmul.msk.f32.gmra.mxu0 %vm584_vm0, %v2872_v9 }
 0x666   : > { %v2921_v36 = vpop.f32.mrf.mxu0 }
 0x667   : > { %v5525_v44 = vadd.f32 %v3542_v48, %v2921_v36 }
 0x669   : > { %v3457_v57 = vmul.f32 -1.442695, %v5525_v44 }
 0x66b   : > { %3649 = vpow2.f32 %v3457_v57 }
 0x66e   : > { %v2924_v38 = vpop.f32.mrf.mxu0 }
 0x66f   : > { %v5527_v4 = vadd.f32 %v3542_v48, %v2924_v38 }
 0x671   : > { %v3458_v40 = vmul.f32 -1.442695, %v5527_v4  ;;  %v3650_v16 = vpop.eup %3649 }
 0x672   : > { %v5545_v20 = vadd.f32 1.0, %v3650_v16 }
 0x673   : > { %3651 = vpow2.f32 %v3458_v40 }
 0x676   : > { %v2927_v41 = vpop.f32.mrf.mxu0 }
 0x677   : > { %v5529_v45 = vadd.f32 %v3542_v48, %v2927_v41 }
 0x679   : > { %v3459_v30 = vmul.f32 -1.442695, %v5529_v45  ;;  %v3652_v12 = vpop.eup %3651 }
 0x67a   : > { %v5548_v39 = vadd.f32 1.0, %v3652_v12 }
 0x67b   : > { %3653 = vpow2.f32 %v3459_v30 }
 0x67c   : > { %vm2997_vm11 = vweird.f32 %v5548_v39 }
 0x67e   : > { %v2930_v53 = vpop.f32.mrf.mxu0 }
 0x67f   : > { %v5531_v25 = vadd.f32 %v3542_v48, %v2930_v53 }
 0x681   : > { %v3460_v21 = vmul.f32 -1.442695, %v5531_v25  ;;  %v3654_v31 = vpop.eup %3653 }
 0x682   : > { %v5550_v28 = vadd.f32 1.0, %v3654_v31 }
 0x683   : > { %3655 = vpow2.f32 %v3460_v21 }
 0x684   : > { %vm3012_vm3 = vweird.f32 %v5550_v28 }
 0x686   : > { %v2933_v42 = vpop.f32.mrf.mxu0 }
 0x687   : > { %v5534_v3 = vadd.f32 %v3542_v48, %v2933_v42 }
 0x689   : > { %v3461_v55 = vmul.f32 -1.442695, %v5534_v3  ;;  %v3656_v62 = vpop.eup %3655 }
 0x68a   : > { %v5552_v23 = vadd.f32 1.0, %v3656_v62 }
 0x68b   : > { %3657 = vpow2.f32 %v3461_v55 }
 0x68c   : > { %v3031_v41 = vand.u32 2147483647, %v5552_v23  ;;  %vm3027_vm5 = vweird.f32 %v5552_v23 }
 0x68e   : > { %v2936_v10 = vpop.f32.mrf.mxu0 }
 0x68f   : > { %v5539_v2 = vadd.f32 %v3542_v48, %v2936_v10 }
 0x691   : > { %v3462_v63 = vmul.f32 -1.442695, %v5539_v2  ;;  %v3658_v32 = vpop.eup %3657 }
 0x692   : > { %v5555_v13 = vadd.f32 1.0, %v3658_v32 }
 0x693   : > { %3659 = vpow2.f32 %v3462_v63 }
 0x694   : > { %vm3042_vm6 = vweird.f32 %v5555_v13  ;;  %v3046_v30 = vand.u32 2147483647, %v5555_v13 }
 0x696   : > { %v2939_v7 = vpop.f32.mrf.mxu0 }
 0x697   : > { %v5543_v56 = vadd.f32 %v3542_v48, %v2939_v7 }
 0x699   : > { %v3463_v26 = vmul.f32 -1.442695, %v5543_v56  ;;  %v3660_v18 = vpop.eup %3659 }
 0x69a   : > { %v5558_v33 = vadd.f32 1.0, %v3660_v18 }
 0x69b   : > { %3661 = vpow2.f32 %v3463_v26 }
 0x69c   : > { %3663 = vrcp.f32 %v5545_v20  ;;  %vm3057_vm1 = vweird.f32 %v5558_v33  ;;  %v3061_v62 = vand.u32 2147483647, %v5558_v33  ;;  %v3063_v26 = vand.u32 2147483648, %v5558_v33 }
 0x69d   : > { %3665 = vrcp.f32 %v5548_v39 }
 0x69e   : > { %v2942_v19 = vpop.f32.mrf.mxu0  ;;  %3667 = vrcp.f32 %v5550_v28 }
 0x69f   : > { %v5561_v35 = vadd.f32 %v3542_v48, %v2942_v19  ;;  %3669 = vrcp.f32 %v5552_v23 }
 0x6a0   : > { %3671 = vrcp.f32 %v5555_v13 }
 0x6a1   : > { %v3662_v61 = vpop.eup %3661  ;;  %v3464_v49 = vmul.f32 -1.442695, %v5561_v35  ;;  %3673 = vrcp.f32 %v5558_v33 }
 0x6a2   : > { %v5567_v17 = vadd.f32 1.0, %v3662_v61  ;;  %v5569_v52 = vpop.eup %3663 }
 0x6a3   : > { %3675 = vpow2.f32 %v3464_v49  ;;  %v5571_v0 = vpop.eup %3665  ;;  %v2978_v5 = vmul.f32 %v5569_v52, %v5545_v20  ;;  %vm2983_vm4 = vweird.f32 %v5569_v52 }
 0x6a4   : > { %3677 = vrcp.f32 %v5567_v17  ;;  %v5574_v8 = vpop.eup %3667  ;;  %v2993_v50 = vmul.f32 %v5571_v0, %v5548_v39  ;;  %vm3072_vm10 = vweird.f32 %v5567_v17  ;;  %v3076_v55 = vand.u32 2147483647, %v5567_v17 }
 0x6a5   : > { %v5576_v46 = vpop.eup %3669  ;;  %v3008_v29 = vmul.f32 %v5574_v8, %v5550_v28  ;;  %v2979_v37 = vsub.f32 1.0, %v2978_v5  ;;  %vm3013_vm14 = vweird.f32 %v5574_v8  ;;  %v3078_v63 = vand.u32 2147483648, %v5567_v17 }
 0x6a6   : > { %v5578_v54 = vpop.eup %3671  ;;  %v3023_v58 = vmul.f32 %v5576_v46, %v5552_v23  ;;  %v2994_v34 = vsub.f32 1.0, %v2993_v50  ;;  %vm3028_vm0 = vweird.f32 %v5576_v46  ;;  %vm2998_vm12 = vweird.f32 %v5571_v0 }
 0x6a7   : > { %v5580_v59 = vpop.eup %3673  ;;  %v3038_v11 = vmul.f32 %v5578_v54, %v5555_v13  ;;  %v3009_v14 = vsub.f32 1.0, %v3008_v29  ;;  %v5603_v36 = vmul.f32 %v5569_v52, %v2979_v37  ;;  %vm3043_vm15 = vweird.f32 %v5578_v54 }
 0x6a8   : > { %v3053_v47 = vmul.f32 %v5580_v59, %v5558_v33  ;;  %v3024_v43 = vsub.f32 1.0, %v3023_v58  ;;  %v2995_v38 = vmul.f32 %v5571_v0, %v2994_v34  ;;  %vm3058_vm8 = vweird.f32 %v5580_v59 }
 0x6a9   : > { %v3676_v51 = vpop.eup %3675  ;;  %v3039_v60 = vsub.f32 1.0, %v3038_v11  ;;  %v3010_v53 = vmul.f32 %v5574_v8, %v3009_v14  ;;  %vm5643_vm9 = vmor %vm3057_vm1, %vm3058_vm8  ;;  %vm3077_vm8 = vcmp.eq.f32.partialorder %v3076_v55, 8.507059e+37  ;;  %v3016_v37 = vand.u32 2147483647, %v5550_v28 }
 0x6aa   : > { %v5582_v22 = vpop.eup %3677  ;;  %v5588_v24 = vadd.f32 1.0, %v3676_v51  ;;  %v3054_v6 = vsub.f32 1.0, %v3053_v47  ;;  %v3025_v57 = vmul.f32 %v5576_v46, %v3024_v43  ;;  %v3079_v51 = vor.u32 1.1754944e-38, %v3078_v63 }
 0x6ab   : > { %v3068_v15 = vmul.f32 %v5582_v22, %v5567_v17  ;;  %v3040_v40 = vmul.f32 %v5578_v54, %v3039_v60  ;;  %vm3073_vm7 = vweird.f32 %v5582_v22  ;;  %v3048_v17 = vand.u32 2147483648, %v5555_v13 }
 0x6ac   : > { %3679 = vrcp.f32 %v5588_v24  ;;  %v3055_v48 = vmul.f32 %v5580_v59, %v3054_v6  ;;  %v3093_v16 = vand.u32 2147483648, %v5588_v24  ;;  %v3091_v31 = vand.u32 2147483647, %v5588_v24  ;;  %vm5634_vm13 = vmor %vm3072_vm10, %vm3073_vm7 }
 0x6ad   : > { %v3069_v1 = vsub.f32 1.0, %v3068_v15  ;;  %v3041_v18 = vadd.f32 %v5578_v54, %v3040_v40  ;;  %vm3087_vm7 = vweird.f32 %v5588_v24  ;;  %v3026_v49 = vadd.f32 %v5576_v46, %v3025_v57 }
 0x6ae   : > { %v3056_v7 = vadd.f32 %v5580_v59, %v3055_v48  ;;  %v3094_v5 = vor.u32 1.1754944e-38, %v3093_v16  ;;  %vm3092_vm1 = vcmp.eq.f32.partialorder %v3091_v31, 8.507059e+37  ;;  %v3064_v47 = vor.u32 1.1754944e-38, %v3063_v26 }
 0x6af   : > { %v3070_v27 = vmul.f32 %v5582_v22, %v3069_v1  ;;  %v3011_v11 = vadd.f32 %v5574_v8, %v3010_v53  ;;  %v3018_v13 = vand.u32 2147483648, %v5550_v28  ;;  %v3049_v14 = vor.u32 1.1754944e-38, %v3048_v17 }
 0x6b0   : > { %v3060_v50 = vsel %vm5643_vm9, %v5580_v59, %v3056_v7  ;;  %vm3062_vm9 = vcmp.eq.f32.partialorder %v3061_v62, 8.507059e+37  ;;  %v2996_v43 = vadd.f32 %v5571_v0, %v2995_v38  ;;  %v3001_v60 = vand.u32 2147483647, %v5548_v39 }
 0x6b1   : > { %v3071_v10 = vadd.f32 %v5582_v22, %v3070_v27  ;;  %v3065_v6 = vsel %vm3062_vm9, %v3064_v47, %v3060_v50  ;;  %v3003_v27 = vand.u32 2147483648, %v5548_v39  ;;  %v2988_v28 = vand.u32 2147483648, %v5545_v20 }
 0x6b2   : > { %v3680_v9 = vpop.eup %3679  ;;  %v3102_v48 = vmul.f32 %v3065_v6, %v5539_v2 }
 0x6b3   : > { %v3083_v42 = vmul.f32 %v3680_v9, %v5588_v24  ;;  %vm3088_vm2 = vweird.f32 %v3680_v9  ;;  %v3075_v33 = vsel %vm5634_vm13, %v5582_v22, %v3071_v10  ;;  %v3033_v22 = vand.u32 2147483648, %v5552_v23  ;;  %vm5662_vm13 = vmor %vm3042_vm6, %vm3043_vm15 }
 0x6b4   : > { %vm3089_vm10 = vmor %vm3087_vm7, %vm3088_vm2  ;;  %v3080_v15 = vsel %vm3077_vm8, %v3079_v51, %v3075_v33  ;;  %v3045_v59 = vsel %vm5662_vm13, %v5578_v54, %v3041_v18  ;;  %vm3047_vm2 = vcmp.eq.f32.partialorder %v3046_v30, 8.507059e+37  ;;  %v2986_v23 = vand.u32 2147483647, %v5545_v20 }
 0x6b5   : > { %v3084_v21 = vsub.f32 1.0, %v3083_v42  ;;  %vm5677_vm6 = vmor %vm3027_vm5, %vm3028_vm0  ;;  %v3103_v54 = vmul.f32 %v3080_v15, %v5543_v56  ;;  %v3034_v38 = vor.u32 1.1754944e-38, %v3033_v22  ;;  %v3050_v53 = vsel %vm3047_vm2, %v3049_v14, %v3045_v59 }
 0x6b6   : > { %vm5692_vm0 = vmor %vm3012_vm3, %vm3013_vm14  ;;  %vm3032_vm5 = vcmp.eq.f32.partialorder %v3031_v41, 8.507059e+37  ;;  %vm2982_vm14 = vweird.f32 %v5545_v20  ;;  %v3019_v42 = vor.u32 1.1754944e-38, %v3018_v13  ;;  %vm3017_vm15 = vcmp.eq.f32.partialorder %v3016_v37, 8.507059e+37 }
 0x6b7   : > { %v3085_v12 = vmul.f32 %v3680_v9, %v3084_v21  ;;  %v3015_v56 = vsel %vm5692_vm0, %v5574_v8, %v3011_v11  ;;  %vm5710_vm3 = vmor %vm2997_vm11, %vm2998_vm12  ;;  %v3101_v41 = vmul.f32 %v3050_v53, %v5534_v3  ;;  %v3004_v39 = vor.u32 1.1754944e-38, %v3003_v27 }
 0x6b8   : > { %v3000_v2 = vsel %vm5710_vm3, %v5571_v0, %v2996_v43  ;;  %vm2984_vm7 = vmor %vm2982_vm14, %vm2983_vm4  ;;  %v3020_v57 = vsel %vm3017_vm15, %v3019_v42, %v3015_v56  ;;  %vm3002_vm11 = vcmp.eq.f32.partialorder %v3001_v60, 8.507059e+37  ;;  %v2989_v20 = vor.u32 1.1754944e-38, %v2988_v28 }
 0x6b9   : > { %v3086_v61 = vadd.f32 %v3680_v9, %v3085_v12  ;;  %v3005_v10 = vsel %vm3002_vm11, %v3004_v39, %v3000_v2  ;;  %vm2987_vm12 = vcmp.eq.f32.partialorder %v2986_v23, 8.507059e+37  ;;  %v3099_v0 = vmul.f32 %v3020_v57, %v5529_v45 }
 0x6ba   : > { %v3098_v21 = vmul.f32 %v3005_v10, %v5527_v4  ;;  %vm5856_vm4 = vcmask 523264  }
 0x6bb   : > { %v3090_v29 = vsel %vm3089_vm10, %v3680_v9, %v3086_v61  ;;  %vm5858_vm10 = vcmask 261120  }
 0x6bc   : > { %v3095_v58 = vsel %vm3092_vm1, %v3094_v5, %v3090_v29 }
 0x6bd   : > { %v3104_v1 = vmul.f32 %v3095_v58, %v5561_v35  ;;  %v3030_v35 = vsel %vm5677_vm6, %v5576_v46, %v3026_v49  ;;  %v2981_v46 = vadd.f32 %v5569_v52, %v5603_v36 }
 0x6be   : > { %v3035_v8 = vsel %vm3032_vm5, %v3034_v38, %v3030_v35 }
 0x6bf   : > { %3117 = vmatpush.msra.mxu1 %v3104_v1  ;;  %v2985_v40 = vsel %vm2984_vm7, %v5569_v52, %v2981_v46  ;;  %v3100_v30 = vmul.f32 %v3035_v8, %v5531_v25  ;;  %v3105_v52 = vld [vmem:[%s5855_s4] sm:$0xff] }
 0x6c0   : > { %v2990_v3 = vsel %vm2987_vm12, %v2989_v20, %v2985_v40 }
 0x6c1   : > { %3118 = vmatpush.msra.mxu1 %v3103_v54  ;;  %v3097_v55 = vmul.f32 %v2990_v3, %v5525_v44 }
 0x6c3   : > { %3119 = vmatpush.msra.mxu1 %v3102_v48 }
 0x6c5   : > { %3120 = vmatpush.msra.mxu1 %v3101_v41 }
 0x6c7   : > { %3121 = vmatpush.msra.mxu1 %v3100_v30 }
 0x6c9   : > { %3122 = vmatpush.msra.mxu1 %v3099_v0 }
 0x6cb   : > { %3123 = vmatpush.msra.mxu1 %v3098_v21 }
 0x6cd   : > { %3124 = vmatpush.msra.mxu1 %v3097_v55 }
 0x6ce   : > { %3465 = vmatmul.msk.f32.vlgmr.msra.gmra.mxu1 %vm5856_vm4, %v3105_v52 }
 0x74b   : > { %v3126_v44 = vpop.f32.mrf.mxu1 }
 0x74c   : > { %3129 = vst.msk [vmem:[%s568_s24] sm:$0xff] %vm5858_vm10, %v3126_v44 }
 0x74d   : > { %3708 = shalt.err (!%p3705_p3)
}
 0x74e   : > { %3481 = dma.vmem_to_hbm [thread:$0]  (%p3879_p5), %s3144_s25, 128, %s3146_s1, %s3131_s26  }
 0x74f PF: > { %s5859_s20 = sld [smem:[#allocation7_spill]] }
 0x750   : > { %s5860_s29 = sld [smem:[#allocation5_spill]] }
 0x755   : > { %p3487_p4 = scmp.ge.s32.totalorder %s5859_s20, 2 }
 0x756   : > { %s3157_s24 = sand.u32 1, %s5860_s29  }
 0x757   : > { %p3484_p7 = pnand %p3487_p4, %p3883_p6  ;;  %s3158_s4 = scalar_lea.sflag [#allocation3], %s3157_s24 }
 0x759   : > { %p3485_p8 = pneg %p3484_p7 }
 0x75b   : > { %3726 = dma.done.wait (%p3485_p8), %s3158_s4, 128  }
 0x75c   : > { %3728 = vsyncadd (%p3485_p8), %s3158_s4, 4294967168  ;;  %s5862_s30 = sld [smem:[#allocation8_spill]]  ;;  %s5865_s27 = smov %s3735_s28 }
 0x75d   : > { %s5863_s3 = sld [smem:[#allocation6_spill]] }
 0x75e   : > { %s5864_s29 = sld [smem:[#allocation9_spill]] }
 0x762   : > { %p28_p9 = scmp.ge.s32.totalorder %s5862_s30, 4  }
 0x763   : > { %s5866_s28 = smov %s5863_s3 }
 0x764   :  { %30 = sbr.rel (!%p28_p9) target bundleno = 10 (0xa), region = 139 }
 0x769   :  { %3164 = vsyncpa [#allocation3], 1 }
 0x76a   :  { %3166 = vsyncpa [#allocation3 + $0x1], 1 }

</bundles_post_ra>
